<compile_context>
chip_gen: v7x
topology: tpu7x:2x2x1
jax: 0.10.0
libtpu: 0.0.40
codegen_flags: <defaults>
</compile_context>

<pallas_src>
import math
import numpy as np
import jax
import jax.numpy as jnp
from jax.experimental import pallas as pl
from jax.experimental.pallas import tpu as pltpu

_MAX_TILE = 1024          # lane tile of the conv-GEMM output
_USE_BF16_MXU = True      # bf16 MXU operands, f32 accumulation + epilogue


def _round_up(v, m):
    return (v + m - 1) // m * m


# ----------------------------------------------------------------------------
# Pallas kernel: fused 3x3-conv implicit GEMM + BN-shift (+ residual) epilogue
# ----------------------------------------------------------------------------
def _make_conv_kernel(taps, tile, grid, has_res):
    """taps: tuple of (phase_index, lane_offset) static python ints."""

    def kernel(x_ref, w_ref, b_ref, *rest):
        if has_res:
            r_ref, o_ref = rest
        else:
            (o_ref,) = rest
        cout = w_ref.shape[1]
        if grid > 1:
            base = pl.multiple_of(pl.program_id(0) * tile, 128)
        acc = jnp.zeros((cout, tile), jnp.float32)
        for k, (p, off) in enumerate(taps):
            if grid > 1:
                a = x_ref[p, :, pl.ds(base + off, tile)]     # (Cin, tile)
            else:
                a = x_ref[p, :, off:off + tile]               # static slice
            wk = w_ref[k]                                      # (Cout, Cin)
            if _USE_BF16_MXU:
                a = a.astype(jnp.bfloat16)
                wk = wk.astype(jnp.bfloat16)
            acc = acc + jnp.dot(wk, a, preferred_element_type=jnp.float32)
        acc = acc + b_ref[...]                 # BN shift (Cout, 1), lane bcast
        if has_res:
            acc = acc + r_ref[...]             # fused post-conv skip add
        o_ref[...] = acc

    return kernel


# ----------------------------------------------------------------------------
# BasicConv = 3x3 conv (bias=False) + BatchNorm2d (eval), channel-major layout
# ----------------------------------------------------------------------------
def conv3x3_bn(p, x, stride, pad, dil, residual=None):
    """x: (Cin, N, H, W) f32 -> (Cout, N, Ho, Wo) f32."""
    w9, shift = p["w9"], p["shift"]                 # (9, Cout, Cin), (Cout, 1)
    cin, n, h, w = x.shape
    cout = w9.shape[1]
    hp, wp = h + 2 * pad, w + 2 * pad
    ho = (hp - 2 * dil - 1) // stride + 1
    wo = (wp - 2 * dil - 1) // stride + 1

    xp = jnp.pad(x, ((0, 0), (0, 0), (pad, pad), (pad, pad)))

    if stride == 1:
        hrow, wrow = hp, wp
        flat = xp.reshape(cin, n * hp * wp)[None]           # (1, Cin, L)
        taps = tuple((0, kh * dil * wp + kw * dil)
                     for kh in range(3) for kw in range(3))
    elif stride == 2:
        # TODO(synk): odd padded sizes would need per-phase shapes; every
        # spatial size hit by this module is even, so the 2x2 split is uniform.
        assert hp % 2 == 0 and wp % 2 == 0
        hrow, wrow = hp // 2, wp // 2
        ph = xp.reshape(cin, n, hrow, 2, wrow, 2).transpose(3, 5, 0, 1, 2, 4)
        flat = ph.reshape(4, cin, n * hrow * wrow)          # (4, Cin, L)
        taps = tuple(((kh % 2) * 2 + (kw % 2), (kh // 2) * wrow + (kw // 2))
                     for kh in range(3) for kw in range(3))
    else:
        raise NotImplementedError(stride)

    simg = hrow * wrow
    l_in = n * simg
    l_need = (n - 1) * simg + (ho - 1) * wrow + wo   # last valid flat idx + 1
    off_max = max(off for _, off in taps)
    l_out = _round_up(l_need, 128)                   # lane-dense output width
    if l_out > _MAX_TILE:
        l_out = _round_up(l_out, _MAX_TILE)          # no partial tiles
    tile = min(_MAX_TILE, l_out)
    grid = l_out // tile
    l_pad = off_max + l_out                          # >= l_in by construction

    flat = jnp.pad(flat, ((0, 0), (0, 0), (0, l_pad - l_in)))

    in_specs = [
        pl.BlockSpec(flat.shape, lambda j: (0, 0, 0)),   # whole image resident
        pl.BlockSpec(w9.shape, lambda j: (0, 0, 0)),
        pl.BlockSpec(shift.shape, lambda j: (0, 0)),
    ]
    args = [flat, w9, shift]
    if residual is not None:
        # Embed the residual at the valid positions of the flat layout.
        r = jnp.pad(residual, ((0, 0), (0, 0), (0, hrow - ho), (0, wrow - wo)))
        r = r.reshape(cout, l_in)
        r = r[:, :l_out] if l_in >= l_out else jnp.pad(r, ((0, 0), (0, l_out - l_in)))
        in_specs.append(pl.BlockSpec((cout, tile), lambda j: (0, j)))
        args.append(r)

    out_flat = pl.pallas_call(
        _make_conv_kernel(taps, tile, grid, residual is not None),
        grid=(grid,),
        out_shape=jax.ShapeDtypeStruct((cout, l_out), jnp.float32),
        in_specs=in_specs,
        out_specs=pl.BlockSpec((cout, tile), lambda j: (0, j)),
        compiler_params=pltpu.CompilerParams(
            dimension_semantics=("parallel",)),
    )(*args)

    # Drop the "garbage" columns (windows wrapping a row / image boundary).
    if l_out >= l_in:
        valid = out_flat[:, :l_in]
    else:
        valid = jnp.pad(out_flat, ((0, 0), (0, l_in - l_out)))
    return valid.reshape(cout, n, hrow, wrow)[:, :, :ho, :wo]


# ----------------------------------------------------------------------------
# Parameters (Conv2d weight + BN eval-mode stats, scale folded into weights)
# ----------------------------------------------------------------------------
_CFG = {  # name -> (stride, padding, dilation)
    "conv1": (2, 1, 1), "conv2": (2, 1, 1), "conv3": (1, 2, 2),
    "conv4": (2, 1, 1), "conv5": (1, 2, 2),
    "conv_rev1": (1, 1, 1), "conv_rev2": (1, 1, 1),
    "conv_rev3": (1, 1, 1), "conv_rev4": (1, 1, 1),
    "conv_sum1": (1, 1, 1), "conv_sum2": (1, 1, 1),
    "conv_sum3": (1, 1, 1), "conv_sum4": (1, 1, 1),
}


def _init_basic_conv(key, ch):
    w = jax.random.normal(key, (3, 3, ch, ch), jnp.float32) / math.sqrt(9 * ch)
    eps = 1e-5
    gamma = jnp.ones((ch,), jnp.float32)
    beta = jnp.zeros((ch,), jnp.float32)
    r_mean = jnp.zeros((ch,), jnp.float32)
    r_var = jnp.ones((ch,), jnp.float32)
    scale = gamma / jnp.sqrt(r_var + eps)
    shift = beta - r_mean * scale
    # Fold BN scale into the weights; layout (tap k = kh*3+kw, Cout, Cin).
    w9 = jnp.transpose(w, (0, 1, 3, 2)).reshape(9, ch, ch) * scale[None, :, None]
    return dict(w9=w9, shift=shift.reshape(ch, 1))


def init_usrm5_2(key, ch):
    keys = jax.random.split(key, len(_CFG))
    return {name: _init_basic_conv(k, ch) for name, k in zip(_CFG, keys)}


# ----------------------------------------------------------------------------
# Bilinear resize (align_corners=True) on (C, N, H, W) — plain JAX two-tap mix
# ----------------------------------------------------------------------------
def _interp_weights(out_size, in_size):
    if out_size == 1:
        src = np.zeros((1,), np.float64)
    else:
        src = np.arange(out_size, dtype=np.float64) * (in_size - 1) / (out_size - 1)
    i0 = np.clip(np.floor(src).astype(np.int32), 0, in_size - 1)
    i1 = np.minimum(i0 + 1, in_size - 1)
    w1 = (src - i0).astype(np.float32)
    w0 = (1.0 - w1).astype(np.float32)
    return jnp.asarray(i0), jnp.asarray(i1), jnp.asarray(w0), jnp.asarray(w1)


def bilinear_resize(x, out_hw):
    c, n, h, w = x.shape
    ho, wo = int(out_hw[0]), int(out_hw[1])
    if ho != h:
        i0, i1, w0, w1 = _interp_weights(ho, h)
        x = (jnp.take(x, i0, axis=2) * w0[None, None, :, None]
             + jnp.take(x, i1, axis=2) * w1[None, None, :, None])
    if wo != w:
        i0, i1, w0, w1 = _interp_weights(wo, w)
        x = (jnp.take(x, i0, axis=3) * w0[None, None, None, :]
             + jnp.take(x, i1, axis=3) * w1[None, None, None, :])
    return x


def _conv_out_hw(hw, stride, pad, dil):
    h, w = hw
    return ((h + 2 * pad - 2 * dil - 1) // stride + 1,
            (w + 2 * pad - 2 * dil - 1) // stride + 1)


# ----------------------------------------------------------------------------
# USRM5_2 forward (inputs / outputs NCHW, matching the PyTorch module)
# ----------------------------------------------------------------------------
def usrm5_2_forward(params, x, h1, h2, h3):
    xc, h1c, h2c, h3c = (jnp.transpose(t, (1, 0, 2, 3)) for t in (x, h1, h2, h3))
    hw = xc.shape[2:]

    def conv(name, inp, residual=None):
        s, p, d = _CFG[name]
        return conv3x3_bn(params[name], inp, s, p, d, residual=residual)

    # The "+ interpolate(h*)" right after conv1/2/3 is fused into the kernels.
    y1_hw = _conv_out_hw(hw, *_CFG["conv1"])
    y1 = conv("conv1", xc, residual=bilinear_resize(h1c, y1_hw))
    y2_hw = _conv_out_hw(y1_hw, *_CFG["conv2"])
    y2 = conv("conv2", y1, residual=bilinear_resize(h2c, y2_hw))
    y3_hw = _conv_out_hw(y2_hw, *_CFG["conv3"])
    y3 = conv("conv3", y2, residual=bilinear_resize(h3c, y3_hw))
    y4 = conv("conv4", y3)
    y5 = conv("conv5", y4)

    y4up = bilinear_resize(y5, y4.shape[2:])
    y4 = conv("conv_rev1", y4 + y4up)
    y3up = bilinear_resize(y4, y3.shape[2:])
    y3 = conv("conv_rev2", y3 + y3up)
    y2up = bilinear_resize(y3, y2.shape[2:])
    y2 = conv("conv_rev3", y2 + y2up)
    y1up = bilinear_resize(y2, y1.shape[2:])
    y1 = conv("conv_rev4", y1 + y1up)
    y = bilinear_resize(y1, hw)

    o1 = conv("conv_sum1", jax.nn.relu(xc + y))
    o2 = conv("conv_sum2", jax.nn.relu(h1c + bilinear_resize(y1up, h1c.shape[2:])))
    o3 = conv("conv_sum3", jax.nn.relu(h2c + bilinear_resize(y2up, h2c.shape[2:])))
    o4 = conv("conv_sum4", jax.nn.relu(h3c + bilinear_resize(y3up, h3c.shape[2:])))
    return tuple(jnp.transpose(t, (1, 0, 2, 3)) for t in (o1, o2, o3, o4))


if __name__ == "__main__":
    channel, N = 8, 2
    key = jax.random.PRNGKey(0)
    kp, kx, k1, k2, k3 = jax.random.split(key, 5)
    params = init_usrm5_2(kp, channel)

    # Pyramid-consistent NCHW inputs: x largest, h1/h2/h3 at 1/2, 1/4, 1/8.
    x = jax.random.normal(kx, (N, channel, 16, 16), jnp.float32)
    h1 = jax.random.normal(k1, (N, channel, 8, 8), jnp.float32)
    h2 = jax.random.normal(k2, (N, channel, 4, 4), jnp.float32)
    h3 = jax.random.normal(k3, (N, channel, 2, 2), jnp.float32)

    fwd = jax.jit(usrm5_2_forward)
    outs = fwd(params, x, h1, h2, h3)
    outs = jax.block_until_ready(outs)

    assert outs[0].shape == (N, channel, 16, 16)
    assert outs[1].shape == (N, channel, 8, 8)
    assert outs[2].shape == (N, channel, 4, 4)
    assert outs[3].shape == (N, channel, 2, 2)
    assert all(bool(jnp.all(jnp.isfinite(o))) for o in outs)
    print("KERNEL_OK")
</pallas_src>

<mosaic_0001>
module attributes {stable_mosaic.version = 11 : i64} {
  func.func @kernel(%arg0: i32, %arg1: memref<4x8x266xf32, #tpu.memory_space<vmem>>, %arg2: memref<9x8x8xf32, #tpu.memory_space<vmem>>, %arg3: memref<8x1xf32, #tpu.memory_space<vmem>>, %arg4: memref<8x256xf32, #tpu.memory_space<vmem>>, %arg5: memref<8x256xf32, #tpu.memory_space<vmem>>) attributes {dimension_semantics = [#tpu.dimension_semantics<parallel>], iteration_bounds = array<i64: 1>, scalar_prefetch = 0 : i64, scratch_operands = 0 : i64, tpu.core_type = #tpu.core_type<tc>, window_params = [{pipeline_mode = #tpu.pipeline_mode<synchronous>, transform_indices = @transform_0, window_bounds = array<i64: 4, 8, 266>}, {pipeline_mode = #tpu.pipeline_mode<synchronous>, transform_indices = @transform_1, window_bounds = array<i64: 9, 8, 8>}, {pipeline_mode = #tpu.pipeline_mode<synchronous>, transform_indices = @transform_2, window_bounds = array<i64: 8, 1>}, {transform_indices = @transform_3, window_bounds = array<i64: 8, 256>}, {transform_indices = @transform_4, window_bounds = array<i64: 8, 256>}]} {
    %cst = arith.constant 0.000000e+00 : f32
    %0 = vector.broadcast %cst : f32 to vector<8x256xf32>
    %c0 = arith.constant 0 : index
    %c0_0 = arith.constant 0 : index
    %c0_1 = arith.constant 0 : index
    %1 = vector.load %arg1[%c0, %c0_0, %c0_1] : memref<4x8x266xf32, #tpu.memory_space<vmem>>, vector<1x8x256xf32>
    %2 = vector.shape_cast %1 : vector<1x8x256xf32> to vector<8x256xf32>
    %c0_2 = arith.constant 0 : index
    %c0_3 = arith.constant 0 : index
    %c0_4 = arith.constant 0 : index
    %3 = vector.load %arg2[%c0_2, %c0_3, %c0_4] : memref<9x8x8xf32, #tpu.memory_space<vmem>>, vector<1x8x8xf32>
    %4 = vector.shape_cast %3 : vector<1x8x8xf32> to vector<8x8xf32>
    %5 = arith.truncf %2 : vector<8x256xf32> to vector<8x256xbf16>
    %6 = arith.truncf %4 : vector<8x8xf32> to vector<8x8xbf16>
    %cst_5 = arith.constant dense<0.000000e+00> : vector<8x256xf32>
    %7 = tpu.matmul %6, %5, %cst_5 {dimension_numbers = #tpu.dot_dimension_numbers<[1], [0], [0], [1], [0, 0, 1, 1], [], []>} : vector<8x8xbf16>, vector<8x256xbf16>, vector<8x256xf32> -> vector<8x256xf32>
    %8 = arith.addf %0, %7 : vector<8x256xf32>
    %c1 = arith.constant 1 : index
    %c0_6 = arith.constant 0 : index
    %c0_7 = arith.constant 0 : index
    %9 = vector.load %arg1[%c1, %c0_6, %c0_7] : memref<4x8x266xf32, #tpu.memory_space<vmem>>, vector<1x8x256xf32>
    %10 = vector.shape_cast %9 : vector<1x8x256xf32> to vector<8x256xf32>
    %c1_8 = arith.constant 1 : index
    %c0_9 = arith.constant 0 : index
    %c0_10 = arith.constant 0 : index
    %11 = vector.load %arg2[%c1_8, %c0_9, %c0_10] : memref<9x8x8xf32, #tpu.memory_space<vmem>>, vector<1x8x8xf32>
    %12 = vector.shape_cast %11 : vector<1x8x8xf32> to vector<8x8xf32>
    %13 = arith.truncf %10 : vector<8x256xf32> to vector<8x256xbf16>
    %14 = arith.truncf %12 : vector<8x8xf32> to vector<8x8xbf16>
    %cst_11 = arith.constant dense<0.000000e+00> : vector<8x256xf32>
    %15 = tpu.matmul %14, %13, %cst_11 {dimension_numbers = #tpu.dot_dimension_numbers<[1], [0], [0], [1], [0, 0, 1, 1], [], []>} : vector<8x8xbf16>, vector<8x256xbf16>, vector<8x256xf32> -> vector<8x256xf32>
    %16 = arith.addf %8, %15 : vector<8x256xf32>
    %c0_12 = arith.constant 0 : index
    %c0_13 = arith.constant 0 : index
    %c1_14 = arith.constant 1 : index
    %17 = vector.load %arg1[%c0_12, %c0_13, %c1_14] : memref<4x8x266xf32, #tpu.memory_space<vmem>>, vector<1x8x256xf32>
    %18 = vector.shape_cast %17 : vector<1x8x256xf32> to vector<8x256xf32>
    %c2 = arith.constant 2 : index
    %c0_15 = arith.constant 0 : index
    %c0_16 = arith.constant 0 : index
    %19 = vector.load %arg2[%c2, %c0_15, %c0_16] : memref<9x8x8xf32, #tpu.memory_space<vmem>>, vector<1x8x8xf32>
    %20 = vector.shape_cast %19 : vector<1x8x8xf32> to vector<8x8xf32>
    %21 = arith.truncf %18 : vector<8x256xf32> to vector<8x256xbf16>
    %22 = arith.truncf %20 : vector<8x8xf32> to vector<8x8xbf16>
    %cst_17 = arith.constant dense<0.000000e+00> : vector<8x256xf32>
    %23 = tpu.matmul %22, %21, %cst_17 {dimension_numbers = #tpu.dot_dimension_numbers<[1], [0], [0], [1], [0, 0, 1, 1], [], []>} : vector<8x8xbf16>, vector<8x256xbf16>, vector<8x256xf32> -> vector<8x256xf32>
    %24 = arith.addf %16, %23 : vector<8x256xf32>
    %c2_18 = arith.constant 2 : index
    %c0_19 = arith.constant 0 : index
    %c0_20 = arith.constant 0 : index
    %25 = vector.load %arg1[%c2_18, %c0_19, %c0_20] : memref<4x8x266xf32, #tpu.memory_space<vmem>>, vector<1x8x256xf32>
    %26 = vector.shape_cast %25 : vector<1x8x256xf32> to vector<8x256xf32>
    %c3 = arith.constant 3 : index
    %c0_21 = arith.constant 0 : index
    %c0_22 = arith.constant 0 : index
    %27 = vector.load %arg2[%c3, %c0_21, %c0_22] : memref<9x8x8xf32, #tpu.memory_space<vmem>>, vector<1x8x8xf32>
    %28 = vector.shape_cast %27 : vector<1x8x8xf32> to vector<8x8xf32>
    %29 = arith.truncf %26 : vector<8x256xf32> to vector<8x256xbf16>
    %30 = arith.truncf %28 : vector<8x8xf32> to vector<8x8xbf16>
    %cst_23 = arith.constant dense<0.000000e+00> : vector<8x256xf32>
    %31 = tpu.matmul %30, %29, %cst_23 {dimension_numbers = #tpu.dot_dimension_numbers<[1], [0], [0], [1], [0, 0, 1, 1], [], []>} : vector<8x8xbf16>, vector<8x256xbf16>, vector<8x256xf32> -> vector<8x256xf32>
    %32 = arith.addf %24, %31 : vector<8x256xf32>
    %c3_24 = arith.constant 3 : index
    %c0_25 = arith.constant 0 : index
    %c0_26 = arith.constant 0 : index
    %33 = vector.load %arg1[%c3_24, %c0_25, %c0_26] : memref<4x8x266xf32, #tpu.memory_space<vmem>>, vector<1x8x256xf32>
    %34 = vector.shape_cast %33 : vector<1x8x256xf32> to vector<8x256xf32>
    %c4 = arith.constant 4 : index
    %c0_27 = arith.constant 0 : index
    %c0_28 = arith.constant 0 : index
    %35 = vector.load %arg2[%c4, %c0_27, %c0_28] : memref<9x8x8xf32, #tpu.memory_space<vmem>>, vector<1x8x8xf32>
    %36 = vector.shape_cast %35 : vector<1x8x8xf32> to vector<8x8xf32>
    %37 = arith.truncf %34 : vector<8x256xf32> to vector<8x256xbf16>
    %38 = arith.truncf %36 : vector<8x8xf32> to vector<8x8xbf16>
    %cst_29 = arith.constant dense<0.000000e+00> : vector<8x256xf32>
    %39 = tpu.matmul %38, %37, %cst_29 {dimension_numbers = #tpu.dot_dimension_numbers<[1], [0], [0], [1], [0, 0, 1, 1], [], []>} : vector<8x8xbf16>, vector<8x256xbf16>, vector<8x256xf32> -> vector<8x256xf32>
    %40 = arith.addf %32, %39 : vector<8x256xf32>
    %c2_30 = arith.constant 2 : index
    %c0_31 = arith.constant 0 : index
    %c1_32 = arith.constant 1 : index
    %41 = vector.load %arg1[%c2_30, %c0_31, %c1_32] : memref<4x8x266xf32, #tpu.memory_space<vmem>>, vector<1x8x256xf32>
    %42 = vector.shape_cast %41 : vector<1x8x256xf32> to vector<8x256xf32>
    %c5 = arith.constant 5 : index
    %c0_33 = arith.constant 0 : index
    %c0_34 = arith.constant 0 : index
    %43 = vector.load %arg2[%c5, %c0_33, %c0_34] : memref<9x8x8xf32, #tpu.memory_space<vmem>>, vector<1x8x8xf32>
    %44 = vector.shape_cast %43 : vector<1x8x8xf32> to vector<8x8xf32>
    %45 = arith.truncf %42 : vector<8x256xf32> to vector<8x256xbf16>
    %46 = arith.truncf %44 : vector<8x8xf32> to vector<8x8xbf16>
    %cst_35 = arith.constant dense<0.000000e+00> : vector<8x256xf32>
    %47 = tpu.matmul %46, %45, %cst_35 {dimension_numbers = #tpu.dot_dimension_numbers<[1], [0], [0], [1], [0, 0, 1, 1], [], []>} : vector<8x8xbf16>, vector<8x256xbf16>, vector<8x256xf32> -> vector<8x256xf32>
    %48 = arith.addf %40, %47 : vector<8x256xf32>
    %c0_36 = arith.constant 0 : index
    %c0_37 = arith.constant 0 : index
    %c9 = arith.constant 9 : index
    %49 = vector.load %arg1[%c0_36, %c0_37, %c9] : memref<4x8x266xf32, #tpu.memory_space<vmem>>, vector<1x8x256xf32>
    %50 = vector.shape_cast %49 : vector<1x8x256xf32> to vector<8x256xf32>
    %c6 = arith.constant 6 : index
    %c0_38 = arith.constant 0 : index
    %c0_39 = arith.constant 0 : index
    %51 = vector.load %arg2[%c6, %c0_38, %c0_39] : memref<9x8x8xf32, #tpu.memory_space<vmem>>, vector<1x8x8xf32>
    %52 = vector.shape_cast %51 : vector<1x8x8xf32> to vector<8x8xf32>
    %53 = arith.truncf %50 : vector<8x256xf32> to vector<8x256xbf16>
    %54 = arith.truncf %52 : vector<8x8xf32> to vector<8x8xbf16>
    %cst_40 = arith.constant dense<0.000000e+00> : vector<8x256xf32>
    %55 = tpu.matmul %54, %53, %cst_40 {dimension_numbers = #tpu.dot_dimension_numbers<[1], [0], [0], [1], [0, 0, 1, 1], [], []>} : vector<8x8xbf16>, vector<8x256xbf16>, vector<8x256xf32> -> vector<8x256xf32>
    %56 = arith.addf %48, %55 : vector<8x256xf32>
    %c1_41 = arith.constant 1 : index
    %c0_42 = arith.constant 0 : index
    %c9_43 = arith.constant 9 : index
    %57 = vector.load %arg1[%c1_41, %c0_42, %c9_43] : memref<4x8x266xf32, #tpu.memory_space<vmem>>, vector<1x8x256xf32>
    %58 = vector.shape_cast %57 : vector<1x8x256xf32> to vector<8x256xf32>
    %c7 = arith.constant 7 : index
    %c0_44 = arith.constant 0 : index
    %c0_45 = arith.constant 0 : index
    %59 = vector.load %arg2[%c7, %c0_44, %c0_45] : memref<9x8x8xf32, #tpu.memory_space<vmem>>, vector<1x8x8xf32>
    %60 = vector.shape_cast %59 : vector<1x8x8xf32> to vector<8x8xf32>
    %61 = arith.truncf %58 : vector<8x256xf32> to vector<8x256xbf16>
    %62 = arith.truncf %60 : vector<8x8xf32> to vector<8x8xbf16>
    %cst_46 = arith.constant dense<0.000000e+00> : vector<8x256xf32>
    %63 = tpu.matmul %62, %61, %cst_46 {dimension_numbers = #tpu.dot_dimension_numbers<[1], [0], [0], [1], [0, 0, 1, 1], [], []>} : vector<8x8xbf16>, vector<8x256xbf16>, vector<8x256xf32> -> vector<8x256xf32>
    %64 = arith.addf %56, %63 : vector<8x256xf32>
    %c0_47 = arith.constant 0 : index
    %c0_48 = arith.constant 0 : index
    %c10 = arith.constant 10 : index
    %65 = vector.load %arg1[%c0_47, %c0_48, %c10] : memref<4x8x266xf32, #tpu.memory_space<vmem>>, vector<1x8x256xf32>
    %66 = vector.shape_cast %65 : vector<1x8x256xf32> to vector<8x256xf32>
    %c8 = arith.constant 8 : index
    %c0_49 = arith.constant 0 : index
    %c0_50 = arith.constant 0 : index
    %67 = vector.load %arg2[%c8, %c0_49, %c0_50] : memref<9x8x8xf32, #tpu.memory_space<vmem>>, vector<1x8x8xf32>
    %68 = vector.shape_cast %67 : vector<1x8x8xf32> to vector<8x8xf32>
    %69 = arith.truncf %66 : vector<8x256xf32> to vector<8x256xbf16>
    %70 = arith.truncf %68 : vector<8x8xf32> to vector<8x8xbf16>
    %cst_51 = arith.constant dense<0.000000e+00> : vector<8x256xf32>
    %71 = tpu.matmul %70, %69, %cst_51 {dimension_numbers = #tpu.dot_dimension_numbers<[1], [0], [0], [1], [0, 0, 1, 1], [], []>} : vector<8x8xbf16>, vector<8x256xbf16>, vector<8x256xf32> -> vector<8x256xf32>
    %72 = arith.addf %64, %71 : vector<8x256xf32>
    %c0_52 = arith.constant 0 : index
    %c0_53 = arith.constant 0 : index
    %73 = vector.load %arg3[%c0_52, %c0_53] : memref<8x1xf32, #tpu.memory_space<vmem>>, vector<8x1xf32>
    %74 = vector.broadcast %73 : vector<8x1xf32> to vector<8x256xf32>
    %75 = arith.addf %72, %74 : vector<8x256xf32>
    %c0_54 = arith.constant 0 : index
    %c0_55 = arith.constant 0 : index
    %76 = vector.load %arg4[%c0_54, %c0_55] : memref<8x256xf32, #tpu.memory_space<vmem>>, vector<8x256xf32>
    %77 = arith.addf %75, %76 : vector<8x256xf32>
    %c0_56 = arith.constant 0 : index
    %c0_57 = arith.constant 0 : index
    %78 = vector.load %arg5[%c0_56, %c0_57] : memref<8x256xf32, #tpu.memory_space<vmem>>, vector<8x256xf32>
    tpu.vector_store %arg5[%c0_56, %c0_57], %77 {strides = array<i32>} : memref<8x256xf32, #tpu.memory_space<vmem>>, vector<8x256xf32>,
    return
  }
  func.func @transform_0(%arg0: i32) -> (i32, i32, i32) {
    %c0_i32 = arith.constant 0 : i32
    %c0_i32_0 = arith.constant 0 : i32
    %c0_i32_1 = arith.constant 0 : i32
    %c0_i32_2 = arith.constant 0 : i32
    return %c0_i32, %c0_i32_0, %c0_i32_1 : i32, i32, i32
  }
  func.func @transform_1(%arg0: i32) -> (i32, i32, i32) {
    %c0_i32 = arith.constant 0 : i32
    %c0_i32_0 = arith.constant 0 : i32
    %c0_i32_1 = arith.constant 0 : i32
    %c0_i32_2 = arith.constant 0 : i32
    return %c0_i32, %c0_i32_0, %c0_i32_1 : i32, i32, i32
  }
  func.func @transform_2(%arg0: i32) -> (i32, i32) {
    %c0_i32 = arith.constant 0 : i32
    %c0_i32_0 = arith.constant 0 : i32
    %c0_i32_1 = arith.constant 0 : i32
    return %c0_i32, %c0_i32_0 : i32, i32
  }
  func.func @transform_3(%arg0: i32) -> (i32, i32) {
    %c0_i32 = arith.constant 0 : i32
    %c0_i32_0 = arith.constant 0 : i32
    return %c0_i32, %arg0 : i32, i32
  }
  func.func @transform_4(%arg0: i32) -> (i32, i32) {
    %c0_i32 = arith.constant 0 : i32
    %c0_i32_0 = arith.constant 0 : i32
    return %c0_i32, %arg0 : i32, i32
  }
}

module attributes {stable_mosaic.version = 11 : i64} {
  func.func @kernel(%arg0: i32, %arg1: memref<4x8x134xf32, #tpu.memory_space<vmem>>, %arg2: memref<9x8x8xf32, #tpu.memory_space<vmem>>, %arg3: memref<8x1xf32, #tpu.memory_space<vmem>>, %arg4: memref<8x128xf32, #tpu.memory_space<vmem>>, %arg5: memref<8x128xf32, #tpu.memory_space<vmem>>) attributes {dimension_semantics = [#tpu.dimension_semantics<parallel>], iteration_bounds = array<i64: 1>, scalar_prefetch = 0 : i64, scratch_operands = 0 : i64, tpu.core_type = #tpu.core_type<tc>, window_params = [{pipeline_mode = #tpu.pipeline_mode<synchronous>, transform_indices = @transform_0, window_bounds = array<i64: 4, 8, 134>}, {pipeline_mode = #tpu.pipeline_mode<synchronous>, transform_indices = @transform_1, window_bounds = array<i64: 9, 8, 8>}, {pipeline_mode = #tpu.pipeline_mode<synchronous>, transform_indices = @transform_2, window_bounds = array<i64: 8, 1>}, {transform_indices = @transform_3, window_bounds = array<i64: 8, 128>}, {transform_indices = @transform_4, window_bounds = array<i64: 8, 128>}]} {
    %cst = arith.constant 0.000000e+00 : f32
    %0 = vector.broadcast %cst : f32 to vector<8x128xf32>
    %c0 = arith.constant 0 : index
    %c0_0 = arith.constant 0 : index
    %c0_1 = arith.constant 0 : index
    %1 = vector.load %arg1[%c0, %c0_0, %c0_1] : memref<4x8x134xf32, #tpu.memory_space<vmem>>, vector<1x8x128xf32>
    %2 = vector.shape_cast %1 : vector<1x8x128xf32> to vector<8x128xf32>
    %c0_2 = arith.constant 0 : index
    %c0_3 = arith.constant 0 : index
    %c0_4 = arith.constant 0 : index
    %3 = vector.load %arg2[%c0_2, %c0_3, %c0_4] : memref<9x8x8xf32, #tpu.memory_space<vmem>>, vector<1x8x8xf32>
    %4 = vector.shape_cast %3 : vector<1x8x8xf32> to vector<8x8xf32>
    %5 = arith.truncf %2 : vector<8x128xf32> to vector<8x128xbf16>
    %6 = arith.truncf %4 : vector<8x8xf32> to vector<8x8xbf16>
    %cst_5 = arith.constant dense<0.000000e+00> : vector<8x128xf32>
    %7 = tpu.matmul %6, %5, %cst_5 {dimension_numbers = #tpu.dot_dimension_numbers<[1], [0], [0], [1], [0, 0, 1, 1], [], []>} : vector<8x8xbf16>, vector<8x128xbf16>, vector<8x128xf32> -> vector<8x128xf32>
    %8 = arith.addf %0, %7 : vector<8x128xf32>
    %c1 = arith.constant 1 : index
    %c0_6 = arith.constant 0 : index
    %c0_7 = arith.constant 0 : index
    %9 = vector.load %arg1[%c1, %c0_6, %c0_7] : memref<4x8x134xf32, #tpu.memory_space<vmem>>, vector<1x8x128xf32>
    %10 = vector.shape_cast %9 : vector<1x8x128xf32> to vector<8x128xf32>
    %c1_8 = arith.constant 1 : index
    %c0_9 = arith.constant 0 : index
    %c0_10 = arith.constant 0 : index
    %11 = vector.load %arg2[%c1_8, %c0_9, %c0_10] : memref<9x8x8xf32, #tpu.memory_space<vmem>>, vector<1x8x8xf32>
    %12 = vector.shape_cast %11 : vector<1x8x8xf32> to vector<8x8xf32>
    %13 = arith.truncf %10 : vector<8x128xf32> to vector<8x128xbf16>
    %14 = arith.truncf %12 : vector<8x8xf32> to vector<8x8xbf16>
    %cst_11 = arith.constant dense<0.000000e+00> : vector<8x128xf32>
    %15 = tpu.matmul %14, %13, %cst_11 {dimension_numbers = #tpu.dot_dimension_numbers<[1], [0], [0], [1], [0, 0, 1, 1], [], []>} : vector<8x8xbf16>, vector<8x128xbf16>, vector<8x128xf32> -> vector<8x128xf32>
    %16 = arith.addf %8, %15 : vector<8x128xf32>
    %c0_12 = arith.constant 0 : index
    %c0_13 = arith.constant 0 : index
    %c1_14 = arith.constant 1 : index
    %17 = vector.load %arg1[%c0_12, %c0_13, %c1_14] : memref<4x8x134xf32, #tpu.memory_space<vmem>>, vector<1x8x128xf32>
    %18 = vector.shape_cast %17 : vector<1x8x128xf32> to vector<8x128xf32>
    %c2 = arith.constant 2 : index
    %c0_15 = arith.constant 0 : index
    %c0_16 = arith.constant 0 : index
    %19 = vector.load %arg2[%c2, %c0_15, %c0_16] : memref<9x8x8xf32, #tpu.memory_space<vmem>>, vector<1x8x8xf32>
    %20 = vector.shape_cast %19 : vector<1x8x8xf32> to vector<8x8xf32>
    %21 = arith.truncf %18 : vector<8x128xf32> to vector<8x128xbf16>
    %22 = arith.truncf %20 : vector<8x8xf32> to vector<8x8xbf16>
    %cst_17 = arith.constant dense<0.000000e+00> : vector<8x128xf32>
    %23 = tpu.matmul %22, %21, %cst_17 {dimension_numbers = #tpu.dot_dimension_numbers<[1], [0], [0], [1], [0, 0, 1, 1], [], []>} : vector<8x8xbf16>, vector<8x128xbf16>, vector<8x128xf32> -> vector<8x128xf32>
    %24 = arith.addf %16, %23 : vector<8x128xf32>
    %c2_18 = arith.constant 2 : index
    %c0_19 = arith.constant 0 : index
    %c0_20 = arith.constant 0 : index
    %25 = vector.load %arg1[%c2_18, %c0_19, %c0_20] : memref<4x8x134xf32, #tpu.memory_space<vmem>>, vector<1x8x128xf32>
    %26 = vector.shape_cast %25 : vector<1x8x128xf32> to vector<8x128xf32>
    %c3 = arith.constant 3 : index
    %c0_21 = arith.constant 0 : index
    %c0_22 = arith.constant 0 : index
    %27 = vector.load %arg2[%c3, %c0_21, %c0_22] : memref<9x8x8xf32, #tpu.memory_space<vmem>>, vector<1x8x8xf32>
    %28 = vector.shape_cast %27 : vector<1x8x8xf32> to vector<8x8xf32>
    %29 = arith.truncf %26 : vector<8x128xf32> to vector<8x128xbf16>
    %30 = arith.truncf %28 : vector<8x8xf32> to vector<8x8xbf16>
    %cst_23 = arith.constant dense<0.000000e+00> : vector<8x128xf32>
    %31 = tpu.matmul %30, %29, %cst_23 {dimension_numbers = #tpu.dot_dimension_numbers<[1], [0], [0], [1], [0, 0, 1, 1], [], []>} : vector<8x8xbf16>, vector<8x128xbf16>, vector<8x128xf32> -> vector<8x128xf32>
    %32 = arith.addf %24, %31 : vector<8x128xf32>
    %c3_24 = arith.constant 3 : index
    %c0_25 = arith.constant 0 : index
    %c0_26 = arith.constant 0 : index
    %33 = vector.load %arg1[%c3_24, %c0_25, %c0_26] : memref<4x8x134xf32, #tpu.memory_space<vmem>>, vector<1x8x128xf32>
    %34 = vector.shape_cast %33 : vector<1x8x128xf32> to vector<8x128xf32>
    %c4 = arith.constant 4 : index
    %c0_27 = arith.constant 0 : index
    %c0_28 = arith.constant 0 : index
    %35 = vector.load %arg2[%c4, %c0_27, %c0_28] : memref<9x8x8xf32, #tpu.memory_space<vmem>>, vector<1x8x8xf32>
    %36 = vector.shape_cast %35 : vector<1x8x8xf32> to vector<8x8xf32>
    %37 = arith.truncf %34 : vector<8x128xf32> to vector<8x128xbf16>
    %38 = arith.truncf %36 : vector<8x8xf32> to vector<8x8xbf16>
    %cst_29 = arith.constant dense<0.000000e+00> : vector<8x128xf32>
    %39 = tpu.matmul %38, %37, %cst_29 {dimension_numbers = #tpu.dot_dimension_numbers<[1], [0], [0], [1], [0, 0, 1, 1], [], []>} : vector<8x8xbf16>, vector<8x128xbf16>, vector<8x128xf32> -> vector<8x128xf32>
    %40 = arith.addf %32, %39 : vector<8x128xf32>
    %c2_30 = arith.constant 2 : index
    %c0_31 = arith.constant 0 : index
    %c1_32 = arith.constant 1 : index
    %41 = vector.load %arg1[%c2_30, %c0_31, %c1_32] : memref<4x8x134xf32, #tpu.memory_space<vmem>>, vector<1x8x128xf32>
    %42 = vector.shape_cast %41 : vector<1x8x128xf32> to vector<8x128xf32>
    %c5 = arith.constant 5 : index
    %c0_33 = arith.constant 0 : index
    %c0_34 = arith.constant 0 : index
    %43 = vector.load %arg2[%c5, %c0_33, %c0_34] : memref<9x8x8xf32, #tpu.memory_space<vmem>>, vector<1x8x8xf32>
    %44 = vector.shape_cast %43 : vector<1x8x8xf32> to vector<8x8xf32>
    %45 = arith.truncf %42 : vector<8x128xf32> to vector<8x128xbf16>
    %46 = arith.truncf %44 : vector<8x8xf32> to vector<8x8xbf16>
    %cst_35 = arith.constant dense<0.000000e+00> : vector<8x128xf32>
    %47 = tpu.matmul %46, %45, %cst_35 {dimension_numbers = #tpu.dot_dimension_numbers<[1], [0], [0], [1], [0, 0, 1, 1], [], []>} : vector<8x8xbf16>, vector<8x128xbf16>, vector<8x128xf32> -> vector<8x128xf32>
    %48 = arith.addf %40, %47 : vector<8x128xf32>
    %c0_36 = arith.constant 0 : index
    %c0_37 = arith.constant 0 : index
    %c5_38 = arith.constant 5 : index
    %49 = vector.load %arg1[%c0_36, %c0_37, %c5_38] : memref<4x8x134xf32, #tpu.memory_space<vmem>>, vector<1x8x128xf32>
    %50 = vector.shape_cast %49 : vector<1x8x128xf32> to vector<8x128xf32>
    %c6 = arith.constant 6 : index
    %c0_39 = arith.constant 0 : index
    %c0_40 = arith.constant 0 : index
    %51 = vector.load %arg2[%c6, %c0_39, %c0_40] : memref<9x8x8xf32, #tpu.memory_space<vmem>>, vector<1x8x8xf32>
    %52 = vector.shape_cast %51 : vector<1x8x8xf32> to vector<8x8xf32>
    %53 = arith.truncf %50 : vector<8x128xf32> to vector<8x128xbf16>
    %54 = arith.truncf %52 : vector<8x8xf32> to vector<8x8xbf16>
    %cst_41 = arith.constant dense<0.000000e+00> : vector<8x128xf32>
    %55 = tpu.matmul %54, %53, %cst_41 {dimension_numbers = #tpu.dot_dimension_numbers<[1], [0], [0], [1], [0, 0, 1, 1], [], []>} : vector<8x8xbf16>, vector<8x128xbf16>, vector<8x128xf32> -> vector<8x128xf32>
    %56 = arith.addf %48, %55 : vector<8x128xf32>
    %c1_42 = arith.constant 1 : index
    %c0_43 = arith.constant 0 : index
    %c5_44 = arith.constant 5 : index
    %57 = vector.load %arg1[%c1_42, %c0_43, %c5_44] : memref<4x8x134xf32, #tpu.memory_space<vmem>>, vector<1x8x128xf32>
    %58 = vector.shape_cast %57 : vector<1x8x128xf32> to vector<8x128xf32>
    %c7 = arith.constant 7 : index
    %c0_45 = arith.constant 0 : index
    %c0_46 = arith.constant 0 : index
    %59 = vector.load %arg2[%c7, %c0_45, %c0_46] : memref<9x8x8xf32, #tpu.memory_space<vmem>>, vector<1x8x8xf32>
    %60 = vector.shape_cast %59 : vector<1x8x8xf32> to vector<8x8xf32>
    %61 = arith.truncf %58 : vector<8x128xf32> to vector<8x128xbf16>
    %62 = arith.truncf %60 : vector<8x8xf32> to vector<8x8xbf16>
    %cst_47 = arith.constant dense<0.000000e+00> : vector<8x128xf32>
    %63 = tpu.matmul %62, %61, %cst_47 {dimension_numbers = #tpu.dot_dimension_numbers<[1], [0], [0], [1], [0, 0, 1, 1], [], []>} : vector<8x8xbf16>, vector<8x128xbf16>, vector<8x128xf32> -> vector<8x128xf32>
    %64 = arith.addf %56, %63 : vector<8x128xf32>
    %c0_48 = arith.constant 0 : index
    %c0_49 = arith.constant 0 : index
    %c6_50 = arith.constant 6 : index
    %65 = vector.load %arg1[%c0_48, %c0_49, %c6_50] : memref<4x8x134xf32, #tpu.memory_space<vmem>>, vector<1x8x128xf32>
    %66 = vector.shape_cast %65 : vector<1x8x128xf32> to vector<8x128xf32>
    %c8 = arith.constant 8 : index
    %c0_51 = arith.constant 0 : index
    %c0_52 = arith.constant 0 : index
    %67 = vector.load %arg2[%c8, %c0_51, %c0_52] : memref<9x8x8xf32, #tpu.memory_space<vmem>>, vector<1x8x8xf32>
    %68 = vector.shape_cast %67 : vector<1x8x8xf32> to vector<8x8xf32>
    %69 = arith.truncf %66 : vector<8x128xf32> to vector<8x128xbf16>
    %70 = arith.truncf %68 : vector<8x8xf32> to vector<8x8xbf16>
    %cst_53 = arith.constant dense<0.000000e+00> : vector<8x128xf32>
    %71 = tpu.matmul %70, %69, %cst_53 {dimension_numbers = #tpu.dot_dimension_numbers<[1], [0], [0], [1], [0, 0, 1, 1], [], []>} : vector<8x8xbf16>, vector<8x128xbf16>, vector<8x128xf32> -> vector<8x128xf32>
    %72 = arith.addf %64, %71 : vector<8x128xf32>
    %c0_54 = arith.constant 0 : index
    %c0_55 = arith.constant 0 : index
    %73 = vector.load %arg3[%c0_54, %c0_55] : memref<8x1xf32, #tpu.memory_space<vmem>>, vector<8x1xf32>
    %74 = vector.broadcast %73 : vector<8x1xf32> to vector<8x128xf32>
    %75 = arith.addf %72, %74 : vector<8x128xf32>
    %c0_56 = arith.constant 0 : index
    %c0_57 = arith.constant 0 : index
    %76 = vector.load %arg4[%c0_56, %c0_57] : memref<8x128xf32, #tpu.memory_space<vmem>>, vector<8x128xf32>
    %77 = arith.addf %75, %76 : vector<8x128xf32>
    %c0_58 = arith.constant 0 : index
    %c0_59 = arith.constant 0 : index
    %78 = vector.load %arg5[%c0_58, %c0_59] : memref<8x128xf32, #tpu.memory_space<vmem>>, vector<8x128xf32>
    tpu.vector_store %arg5[%c0_58, %c0_59], %77 {strides = array<i32>} : memref<8x128xf32, #tpu.memory_space<vmem>>, vector<8x128xf32>,
    return
  }
  func.func @transform_0(%arg0: i32) -> (i32, i32, i32) {
    %c0_i32 = arith.constant 0 : i32
    %c0_i32_0 = arith.constant 0 : i32
    %c0_i32_1 = arith.constant 0 : i32
    %c0_i32_2 = arith.constant 0 : i32
    return %c0_i32, %c0_i32_0, %c0_i32_1 : i32, i32, i32
  }
  func.func @transform_1(%arg0: i32) -> (i32, i32, i32) {
    %c0_i32 = arith.constant 0 : i32
    %c0_i32_0 = arith.constant 0 : i32
    %c0_i32_1 = arith.constant 0 : i32
    %c0_i32_2 = arith.constant 0 : i32
    return %c0_i32, %c0_i32_0, %c0_i32_1 : i32, i32, i32
  }
  func.func @transform_2(%arg0: i32) -> (i32, i32) {
    %c0_i32 = arith.constant 0 : i32
    %c0_i32_0 = arith.constant 0 : i32
    %c0_i32_1 = arith.constant 0 : i32
    return %c0_i32, %c0_i32_0 : i32, i32
  }
  func.func @transform_3(%arg0: i32) -> (i32, i32) {
    %c0_i32 = arith.constant 0 : i32
    %c0_i32_0 = arith.constant 0 : i32
    return %c0_i32, %arg0 : i32, i32
  }
  func.func @transform_4(%arg0: i32) -> (i32, i32) {
    %c0_i32 = arith.constant 0 : i32
    %c0_i32_0 = arith.constant 0 : i32
    return %c0_i32, %arg0 : i32, i32
  }
}

module attributes {stable_mosaic.version = 11 : i64} {
  func.func @kernel(%arg0: i32, %arg1: memref<1x8x164xf32, #tpu.memory_space<vmem>>, %arg2: memref<9x8x8xf32, #tpu.memory_space<vmem>>, %arg3: memref<8x1xf32, #tpu.memory_space<vmem>>, %arg4: memref<8x128xf32, #tpu.memory_space<vmem>>, %arg5: memref<8x128xf32, #tpu.memory_space<vmem>>) attributes {dimension_semantics = [#tpu.dimension_semantics<parallel>], iteration_bounds = array<i64: 1>, scalar_prefetch = 0 : i64, scratch_operands = 0 : i64, tpu.core_type = #tpu.core_type<tc>, window_params = [{pipeline_mode = #tpu.pipeline_mode<synchronous>, transform_indices = @transform_0, window_bounds = array<i64: 1, 8, 164>}, {pipeline_mode = #tpu.pipeline_mode<synchronous>, transform_indices = @transform_1, window_bounds = array<i64: 9, 8, 8>}, {pipeline_mode = #tpu.pipeline_mode<synchronous>, transform_indices = @transform_2, window_bounds = array<i64: 8, 1>}, {transform_indices = @transform_3, window_bounds = array<i64: 8, 128>}, {transform_indices = @transform_4, window_bounds = array<i64: 8, 128>}]} {
    %cst = arith.constant 0.000000e+00 : f32
    %0 = vector.broadcast %cst : f32 to vector<8x128xf32>
    %c0 = arith.constant 0 : index
    %c0_0 = arith.constant 0 : index
    %c0_1 = arith.constant 0 : index
    %1 = vector.load %arg1[%c0, %c0_0, %c0_1] : memref<1x8x164xf32, #tpu.memory_space<vmem>>, vector<1x8x128xf32>
    %2 = vector.shape_cast %1 : vector<1x8x128xf32> to vector<8x128xf32>
    %c0_2 = arith.constant 0 : index
    %c0_3 = arith.constant 0 : index
    %c0_4 = arith.constant 0 : index
    %3 = vector.load %arg2[%c0_2, %c0_3, %c0_4] : memref<9x8x8xf32, #tpu.memory_space<vmem>>, vector<1x8x8xf32>
    %4 = vector.shape_cast %3 : vector<1x8x8xf32> to vector<8x8xf32>
    %5 = arith.truncf %2 : vector<8x128xf32> to vector<8x128xbf16>
    %6 = arith.truncf %4 : vector<8x8xf32> to vector<8x8xbf16>
    %cst_5 = arith.constant dense<0.000000e+00> : vector<8x128xf32>
    %7 = tpu.matmul %6, %5, %cst_5 {dimension_numbers = #tpu.dot_dimension_numbers<[1], [0], [0], [1], [0, 0, 1, 1], [], []>} : vector<8x8xbf16>, vector<8x128xbf16>, vector<8x128xf32> -> vector<8x128xf32>
    %8 = arith.addf %0, %7 : vector<8x128xf32>
    %c0_6 = arith.constant 0 : index
    %c0_7 = arith.constant 0 : index
    %c2 = arith.constant 2 : index
    %9 = vector.load %arg1[%c0_6, %c0_7, %c2] : memref<1x8x164xf32, #tpu.memory_space<vmem>>, vector<1x8x128xf32>
    %10 = vector.shape_cast %9 : vector<1x8x128xf32> to vector<8x128xf32>
    %c1 = arith.constant 1 : index
    %c0_8 = arith.constant 0 : index
    %c0_9 = arith.constant 0 : index
    %11 = vector.load %arg2[%c1, %c0_8, %c0_9] : memref<9x8x8xf32, #tpu.memory_space<vmem>>, vector<1x8x8xf32>
    %12 = vector.shape_cast %11 : vector<1x8x8xf32> to vector<8x8xf32>
    %13 = arith.truncf %10 : vector<8x128xf32> to vector<8x128xbf16>
    %14 = arith.truncf %12 : vector<8x8xf32> to vector<8x8xbf16>
    %cst_10 = arith.constant dense<0.000000e+00> : vector<8x128xf32>
    %15 = tpu.matmul %14, %13, %cst_10 {dimension_numbers = #tpu.dot_dimension_numbers<[1], [0], [0], [1], [0, 0, 1, 1], [], []>} : vector<8x8xbf16>, vector<8x128xbf16>, vector<8x128xf32> -> vector<8x128xf32>
    %16 = arith.addf %8, %15 : vector<8x128xf32>
    %c0_11 = arith.constant 0 : index
    %c0_12 = arith.constant 0 : index
    %c4 = arith.constant 4 : index
    %17 = vector.load %arg1[%c0_11, %c0_12, %c4] : memref<1x8x164xf32, #tpu.memory_space<vmem>>, vector<1x8x128xf32>
    %18 = vector.shape_cast %17 : vector<1x8x128xf32> to vector<8x128xf32>
    %c2_13 = arith.constant 2 : index
    %c0_14 = arith.constant 0 : index
    %c0_15 = arith.constant 0 : index
    %19 = vector.load %arg2[%c2_13, %c0_14, %c0_15] : memref<9x8x8xf32, #tpu.memory_space<vmem>>, vector<1x8x8xf32>
    %20 = vector.shape_cast %19 : vector<1x8x8xf32> to vector<8x8xf32>
    %21 = arith.truncf %18 : vector<8x128xf32> to vector<8x128xbf16>
    %22 = arith.truncf %20 : vector<8x8xf32> to vector<8x8xbf16>
    %cst_16 = arith.constant dense<0.000000e+00> : vector<8x128xf32>
    %23 = tpu.matmul %22, %21, %cst_16 {dimension_numbers = #tpu.dot_dimension_numbers<[1], [0], [0], [1], [0, 0, 1, 1], [], []>} : vector<8x8xbf16>, vector<8x128xbf16>, vector<8x128xf32> -> vector<8x128xf32>
    %24 = arith.addf %16, %23 : vector<8x128xf32>
    %c0_17 = arith.constant 0 : index
    %c0_18 = arith.constant 0 : index
    %c16 = arith.constant 16 : index
    %25 = vector.load %arg1[%c0_17, %c0_18, %c16] : memref<1x8x164xf32, #tpu.memory_space<vmem>>, vector<1x8x128xf32>
    %26 = vector.shape_cast %25 : vector<1x8x128xf32> to vector<8x128xf32>
    %c3 = arith.constant 3 : index
    %c0_19 = arith.constant 0 : index
    %c0_20 = arith.constant 0 : index
    %27 = vector.load %arg2[%c3, %c0_19, %c0_20] : memref<9x8x8xf32, #tpu.memory_space<vmem>>, vector<1x8x8xf32>
    %28 = vector.shape_cast %27 : vector<1x8x8xf32> to vector<8x8xf32>
    %29 = arith.truncf %26 : vector<8x128xf32> to vector<8x128xbf16>
    %30 = arith.truncf %28 : vector<8x8xf32> to vector<8x8xbf16>
    %cst_21 = arith.constant dense<0.000000e+00> : vector<8x128xf32>
    %31 = tpu.matmul %30, %29, %cst_21 {dimension_numbers = #tpu.dot_dimension_numbers<[1], [0], [0], [1], [0, 0, 1, 1], [], []>} : vector<8x8xbf16>, vector<8x128xbf16>, vector<8x128xf32> -> vector<8x128xf32>
    %32 = arith.addf %24, %31 : vector<8x128xf32>
    %c0_22 = arith.constant 0 : index
    %c0_23 = arith.constant 0 : index
    %c18 = arith.constant 18 : index
    %33 = vector.load %arg1[%c0_22, %c0_23, %c18] : memref<1x8x164xf32, #tpu.memory_space<vmem>>, vector<1x8x128xf32>
    %34 = vector.shape_cast %33 : vector<1x8x128xf32> to vector<8x128xf32>
    %c4_24 = arith.constant 4 : index
    %c0_25 = arith.constant 0 : index
    %c0_26 = arith.constant 0 : index
    %35 = vector.load %arg2[%c4_24, %c0_25, %c0_26] : memref<9x8x8xf32, #tpu.memory_space<vmem>>, vector<1x8x8xf32>
    %36 = vector.shape_cast %35 : vector<1x8x8xf32> to vector<8x8xf32>
    %37 = arith.truncf %34 : vector<8x128xf32> to vector<8x128xbf16>
    %38 = arith.truncf %36 : vector<8x8xf32> to vector<8x8xbf16>
    %cst_27 = arith.constant dense<0.000000e+00> : vector<8x128xf32>
    %39 = tpu.matmul %38, %37, %cst_27 {dimension_numbers = #tpu.dot_dimension_numbers<[1], [0], [0], [1], [0, 0, 1, 1], [], []>} : vector<8x8xbf16>, vector<8x128xbf16>, vector<8x128xf32> -> vector<8x128xf32>
    %40 = arith.addf %32, %39 : vector<8x128xf32>
    %c0_28 = arith.constant 0 : index
    %c0_29 = arith.constant 0 : index
    %c20 = arith.constant 20 : index
    %41 = vector.load %arg1[%c0_28, %c0_29, %c20] : memref<1x8x164xf32, #tpu.memory_space<vmem>>, vector<1x8x128xf32>
    %42 = vector.shape_cast %41 : vector<1x8x128xf32> to vector<8x128xf32>
    %c5 = arith.constant 5 : index
    %c0_30 = arith.constant 0 : index
    %c0_31 = arith.constant 0 : index
    %43 = vector.load %arg2[%c5, %c0_30, %c0_31] : memref<9x8x8xf32, #tpu.memory_space<vmem>>, vector<1x8x8xf32>
    %44 = vector.shape_cast %43 : vector<1x8x8xf32> to vector<8x8xf32>
    %45 = arith.truncf %42 : vector<8x128xf32> to vector<8x128xbf16>
    %46 = arith.truncf %44 : vector<8x8xf32> to vector<8x8xbf16>
    %cst_32 = arith.constant dense<0.000000e+00> : vector<8x128xf32>
    %47 = tpu.matmul %46, %45, %cst_32 {dimension_numbers = #tpu.dot_dimension_numbers<[1], [0], [0], [1], [0, 0, 1, 1], [], []>} : vector<8x8xbf16>, vector<8x128xbf16>, vector<8x128xf32> -> vector<8x128xf32>
    %48 = arith.addf %40, %47 : vector<8x128xf32>
    %c0_33 = arith.constant 0 : index
    %c0_34 = arith.constant 0 : index
    %c32 = arith.constant 32 : index
    %49 = vector.load %arg1[%c0_33, %c0_34, %c32] : memref<1x8x164xf32, #tpu.memory_space<vmem>>, vector<1x8x128xf32>
    %50 = vector.shape_cast %49 : vector<1x8x128xf32> to vector<8x128xf32>
    %c6 = arith.constant 6 : index
    %c0_35 = arith.constant 0 : index
    %c0_36 = arith.constant 0 : index
    %51 = vector.load %arg2[%c6, %c0_35, %c0_36] : memref<9x8x8xf32, #tpu.memory_space<vmem>>, vector<1x8x8xf32>
    %52 = vector.shape_cast %51 : vector<1x8x8xf32> to vector<8x8xf32>
    %53 = arith.truncf %50 : vector<8x128xf32> to vector<8x128xbf16>
    %54 = arith.truncf %52 : vector<8x8xf32> to vector<8x8xbf16>
    %cst_37 = arith.constant dense<0.000000e+00> : vector<8x128xf32>
    %55 = tpu.matmul %54, %53, %cst_37 {dimension_numbers = #tpu.dot_dimension_numbers<[1], [0], [0], [1], [0, 0, 1, 1], [], []>} : vector<8x8xbf16>, vector<8x128xbf16>, vector<8x128xf32> -> vector<8x128xf32>
    %56 = arith.addf %48, %55 : vector<8x128xf32>
    %c0_38 = arith.constant 0 : index
    %c0_39 = arith.constant 0 : index
    %c34 = arith.constant 34 : index
    %57 = vector.load %arg1[%c0_38, %c0_39, %c34] : memref<1x8x164xf32, #tpu.memory_space<vmem>>, vector<1x8x128xf32>
    %58 = vector.shape_cast %57 : vector<1x8x128xf32> to vector<8x128xf32>
    %c7 = arith.constant 7 : index
    %c0_40 = arith.constant 0 : index
    %c0_41 = arith.constant 0 : index
    %59 = vector.load %arg2[%c7, %c0_40, %c0_41] : memref<9x8x8xf32, #tpu.memory_space<vmem>>, vector<1x8x8xf32>
    %60 = vector.shape_cast %59 : vector<1x8x8xf32> to vector<8x8xf32>
    %61 = arith.truncf %58 : vector<8x128xf32> to vector<8x128xbf16>
    %62 = arith.truncf %60 : vector<8x8xf32> to vector<8x8xbf16>
    %cst_42 = arith.constant dense<0.000000e+00> : vector<8x128xf32>
    %63 = tpu.matmul %62, %61, %cst_42 {dimension_numbers = #tpu.dot_dimension_numbers<[1], [0], [0], [1], [0, 0, 1, 1], [], []>} : vector<8x8xbf16>, vector<8x128xbf16>, vector<8x128xf32> -> vector<8x128xf32>
    %64 = arith.addf %56, %63 : vector<8x128xf32>
    %c0_43 = arith.constant 0 : index
    %c0_44 = arith.constant 0 : index
    %c36 = arith.constant 36 : index
    %65 = vector.load %arg1[%c0_43, %c0_44, %c36] : memref<1x8x164xf32, #tpu.memory_space<vmem>>, vector<1x8x128xf32>
    %66 = vector.shape_cast %65 : vector<1x8x128xf32> to vector<8x128xf32>
    %c8 = arith.constant 8 : index
    %c0_45 = arith.constant 0 : index
    %c0_46 = arith.constant 0 : index
    %67 = vector.load %arg2[%c8, %c0_45, %c0_46] : memref<9x8x8xf32, #tpu.memory_space<vmem>>, vector<1x8x8xf32>
    %68 = vector.shape_cast %67 : vector<1x8x8xf32> to vector<8x8xf32>
    %69 = arith.truncf %66 : vector<8x128xf32> to vector<8x128xbf16>
    %70 = arith.truncf %68 : vector<8x8xf32> to vector<8x8xbf16>
    %cst_47 = arith.constant dense<0.000000e+00> : vector<8x128xf32>
    %71 = tpu.matmul %70, %69, %cst_47 {dimension_numbers = #tpu.dot_dimension_numbers<[1], [0], [0], [1], [0, 0, 1, 1], [], []>} : vector<8x8xbf16>, vector<8x128xbf16>, vector<8x128xf32> -> vector<8x128xf32>
    %72 = arith.addf %64, %71 : vector<8x128xf32>
    %c0_48 = arith.constant 0 : index
    %c0_49 = arith.constant 0 : index
    %73 = vector.load %arg3[%c0_48, %c0_49] : memref<8x1xf32, #tpu.memory_space<vmem>>, vector<8x1xf32>
    %74 = vector.broadcast %73 : vector<8x1xf32> to vector<8x128xf32>
    %75 = arith.addf %72, %74 : vector<8x128xf32>
    %c0_50 = arith.constant 0 : index
    %c0_51 = arith.constant 0 : index
    %76 = vector.load %arg4[%c0_50, %c0_51] : memref<8x128xf32, #tpu.memory_space<vmem>>, vector<8x128xf32>
    %77 = arith.addf %75, %76 : vector<8x128xf32>
    %c0_52 = arith.constant 0 : index
    %c0_53 = arith.constant 0 : index
    %78 = vector.load %arg5[%c0_52, %c0_53] : memref<8x128xf32, #tpu.memory_space<vmem>>, vector<8x128xf32>
    tpu.vector_store %arg5[%c0_52, %c0_53], %77 {strides = array<i32>} : memref<8x128xf32, #tpu.memory_space<vmem>>, vector<8x128xf32>,
    return
  }
  func.func @transform_0(%arg0: i32) -> (i32, i32, i32) {
    %c0_i32 = arith.constant 0 : i32
    %c0_i32_0 = arith.constant 0 : i32
    %c0_i32_1 = arith.constant 0 : i32
    %c0_i32_2 = arith.constant 0 : i32
    return %c0_i32, %c0_i32_0, %c0_i32_1 : i32, i32, i32
  }
  func.func @transform_1(%arg0: i32) -> (i32, i32, i32) {
    %c0_i32 = arith.constant 0 : i32
    %c0_i32_0 = arith.constant 0 : i32
    %c0_i32_1 = arith.constant 0 : i32
    %c0_i32_2 = arith.constant 0 : i32
    return %c0_i32, %c0_i32_0, %c0_i32_1 : i32, i32, i32
  }
  func.func @transform_2(%arg0: i32) -> (i32, i32) {
    %c0_i32 = arith.constant 0 : i32
    %c0_i32_0 = arith.constant 0 : i32
    %c0_i32_1 = arith.constant 0 : i32
    return %c0_i32, %c0_i32_0 : i32, i32
  }
  func.func @transform_3(%arg0: i32) -> (i32, i32) {
    %c0_i32 = arith.constant 0 : i32
    %c0_i32_0 = arith.constant 0 : i32
    return %c0_i32, %arg0 : i32, i32
  }
  func.func @transform_4(%arg0: i32) -> (i32, i32) {
    %c0_i32 = arith.constant 0 : i32
    %c0_i32_0 = arith.constant 0 : i32
    return %c0_i32, %arg0 : i32, i32
  }
}

module attributes {stable_mosaic.version = 11 : i64} {
  func.func @kernel(%arg0: i32, %arg1: memref<4x8x132xf32, #tpu.memory_space<vmem>>, %arg2: memref<9x8x8xf32, #tpu.memory_space<vmem>>, %arg3: memref<8x1xf32, #tpu.memory_space<vmem>>, %arg4: memref<8x128xf32, #tpu.memory_space<vmem>>) attributes {dimension_semantics = [#tpu.dimension_semantics<parallel>], iteration_bounds = array<i64: 1>, scalar_prefetch = 0 : i64, scratch_operands = 0 : i64, tpu.core_type = #tpu.core_type<tc>, window_params = [{pipeline_mode = #tpu.pipeline_mode<synchronous>, transform_indices = @transform_0, window_bounds = array<i64: 4, 8, 132>}, {pipeline_mode = #tpu.pipeline_mode<synchronous>, transform_indices = @transform_1, window_bounds = array<i64: 9, 8, 8>}, {pipeline_mode = #tpu.pipeline_mode<synchronous>, transform_indices = @transform_2, window_bounds = array<i64: 8, 1>}, {transform_indices = @transform_3, window_bounds = array<i64: 8, 128>}]} {
    %cst = arith.constant 0.000000e+00 : f32
    %0 = vector.broadcast %cst : f32 to vector<8x128xf32>
    %c0 = arith.constant 0 : index
    %c0_0 = arith.constant 0 : index
    %c0_1 = arith.constant 0 : index
    %1 = vector.load %arg1[%c0, %c0_0, %c0_1] : memref<4x8x132xf32, #tpu.memory_space<vmem>>, vector<1x8x128xf32>
    %2 = vector.shape_cast %1 : vector<1x8x128xf32> to vector<8x128xf32>
    %c0_2 = arith.constant 0 : index
    %c0_3 = arith.constant 0 : index
    %c0_4 = arith.constant 0 : index
    %3 = vector.load %arg2[%c0_2, %c0_3, %c0_4] : memref<9x8x8xf32, #tpu.memory_space<vmem>>, vector<1x8x8xf32>
    %4 = vector.shape_cast %3 : vector<1x8x8xf32> to vector<8x8xf32>
    %5 = arith.truncf %2 : vector<8x128xf32> to vector<8x128xbf16>
    %6 = arith.truncf %4 : vector<8x8xf32> to vector<8x8xbf16>
    %cst_5 = arith.constant dense<0.000000e+00> : vector<8x128xf32>
    %7 = tpu.matmul %6, %5, %cst_5 {dimension_numbers = #tpu.dot_dimension_numbers<[1], [0], [0], [1], [0, 0, 1, 1], [], []>} : vector<8x8xbf16>, vector<8x128xbf16>, vector<8x128xf32> -> vector<8x128xf32>
    %8 = arith.addf %0, %7 : vector<8x128xf32>
    %c1 = arith.constant 1 : index
    %c0_6 = arith.constant 0 : index
    %c0_7 = arith.constant 0 : index
    %9 = vector.load %arg1[%c1, %c0_6, %c0_7] : memref<4x8x132xf32, #tpu.memory_space<vmem>>, vector<1x8x128xf32>
    %10 = vector.shape_cast %9 : vector<1x8x128xf32> to vector<8x128xf32>
    %c1_8 = arith.constant 1 : index
    %c0_9 = arith.constant 0 : index
    %c0_10 = arith.constant 0 : index
    %11 = vector.load %arg2[%c1_8, %c0_9, %c0_10] : memref<9x8x8xf32, #tpu.memory_space<vmem>>, vector<1x8x8xf32>
    %12 = vector.shape_cast %11 : vector<1x8x8xf32> to vector<8x8xf32>
    %13 = arith.truncf %10 : vector<8x128xf32> to vector<8x128xbf16>
    %14 = arith.truncf %12 : vector<8x8xf32> to vector<8x8xbf16>
    %cst_11 = arith.constant dense<0.000000e+00> : vector<8x128xf32>
    %15 = tpu.matmul %14, %13, %cst_11 {dimension_numbers = #tpu.dot_dimension_numbers<[1], [0], [0], [1], [0, 0, 1, 1], [], []>} : vector<8x8xbf16>, vector<8x128xbf16>, vector<8x128xf32> -> vector<8x128xf32>
    %16 = arith.addf %8, %15 : vector<8x128xf32>
    %c0_12 = arith.constant 0 : index
    %c0_13 = arith.constant 0 : index
    %c1_14 = arith.constant 1 : index
    %17 = vector.load %arg1[%c0_12, %c0_13, %c1_14] : memref<4x8x132xf32, #tpu.memory_space<vmem>>, vector<1x8x128xf32>
    %18 = vector.shape_cast %17 : vector<1x8x128xf32> to vector<8x128xf32>
    %c2 = arith.constant 2 : index
    %c0_15 = arith.constant 0 : index
    %c0_16 = arith.constant 0 : index
    %19 = vector.load %arg2[%c2, %c0_15, %c0_16] : memref<9x8x8xf32, #tpu.memory_space<vmem>>, vector<1x8x8xf32>
    %20 = vector.shape_cast %19 : vector<1x8x8xf32> to vector<8x8xf32>
    %21 = arith.truncf %18 : vector<8x128xf32> to vector<8x128xbf16>
    %22 = arith.truncf %20 : vector<8x8xf32> to vector<8x8xbf16>
    %cst_17 = arith.constant dense<0.000000e+00> : vector<8x128xf32>
    %23 = tpu.matmul %22, %21, %cst_17 {dimension_numbers = #tpu.dot_dimension_numbers<[1], [0], [0], [1], [0, 0, 1, 1], [], []>} : vector<8x8xbf16>, vector<8x128xbf16>, vector<8x128xf32> -> vector<8x128xf32>
    %24 = arith.addf %16, %23 : vector<8x128xf32>
    %c2_18 = arith.constant 2 : index
    %c0_19 = arith.constant 0 : index
    %c0_20 = arith.constant 0 : index
    %25 = vector.load %arg1[%c2_18, %c0_19, %c0_20] : memref<4x8x132xf32, #tpu.memory_space<vmem>>, vector<1x8x128xf32>
    %26 = vector.shape_cast %25 : vector<1x8x128xf32> to vector<8x128xf32>
    %c3 = arith.constant 3 : index
    %c0_21 = arith.constant 0 : index
    %c0_22 = arith.constant 0 : index
    %27 = vector.load %arg2[%c3, %c0_21, %c0_22] : memref<9x8x8xf32, #tpu.memory_space<vmem>>, vector<1x8x8xf32>
    %28 = vector.shape_cast %27 : vector<1x8x8xf32> to vector<8x8xf32>
    %29 = arith.truncf %26 : vector<8x128xf32> to vector<8x128xbf16>
    %30 = arith.truncf %28 : vector<8x8xf32> to vector<8x8xbf16>
    %cst_23 = arith.constant dense<0.000000e+00> : vector<8x128xf32>
    %31 = tpu.matmul %30, %29, %cst_23 {dimension_numbers = #tpu.dot_dimension_numbers<[1], [0], [0], [1], [0, 0, 1, 1], [], []>} : vector<8x8xbf16>, vector<8x128xbf16>, vector<8x128xf32> -> vector<8x128xf32>
    %32 = arith.addf %24, %31 : vector<8x128xf32>
    %c3_24 = arith.constant 3 : index
    %c0_25 = arith.constant 0 : index
    %c0_26 = arith.constant 0 : index
    %33 = vector.load %arg1[%c3_24, %c0_25, %c0_26] : memref<4x8x132xf32, #tpu.memory_space<vmem>>, vector<1x8x128xf32>
    %34 = vector.shape_cast %33 : vector<1x8x128xf32> to vector<8x128xf32>
    %c4 = arith.constant 4 : index
    %c0_27 = arith.constant 0 : index
    %c0_28 = arith.constant 0 : index
    %35 = vector.load %arg2[%c4, %c0_27, %c0_28] : memref<9x8x8xf32, #tpu.memory_space<vmem>>, vector<1x8x8xf32>
    %36 = vector.shape_cast %35 : vector<1x8x8xf32> to vector<8x8xf32>
    %37 = arith.truncf %34 : vector<8x128xf32> to vector<8x128xbf16>
    %38 = arith.truncf %36 : vector<8x8xf32> to vector<8x8xbf16>
    %cst_29 = arith.constant dense<0.000000e+00> : vector<8x128xf32>
    %39 = tpu.matmul %38, %37, %cst_29 {dimension_numbers = #tpu.dot_dimension_numbers<[1], [0], [0], [1], [0, 0, 1, 1], [], []>} : vector<8x8xbf16>, vector<8x128xbf16>, vector<8x128xf32> -> vector<8x128xf32>
    %40 = arith.addf %32, %39 : vector<8x128xf32>
    %c2_30 = arith.constant 2 : index
    %c0_31 = arith.constant 0 : index
    %c1_32 = arith.constant 1 : index
    %41 = vector.load %arg1[%c2_30, %c0_31, %c1_32] : memref<4x8x132xf32, #tpu.memory_space<vmem>>, vector<1x8x128xf32>
    %42 = vector.shape_cast %41 : vector<1x8x128xf32> to vector<8x128xf32>
    %c5 = arith.constant 5 : index
    %c0_33 = arith.constant 0 : index
    %c0_34 = arith.constant 0 : index
    %43 = vector.load %arg2[%c5, %c0_33, %c0_34] : memref<9x8x8xf32, #tpu.memory_space<vmem>>, vector<1x8x8xf32>
    %44 = vector.shape_cast %43 : vector<1x8x8xf32> to vector<8x8xf32>
    %45 = arith.truncf %42 : vector<8x128xf32> to vector<8x128xbf16>
    %46 = arith.truncf %44 : vector<8x8xf32> to vector<8x8xbf16>
    %cst_35 = arith.constant dense<0.000000e+00> : vector<8x128xf32>
    %47 = tpu.matmul %46, %45, %cst_35 {dimension_numbers = #tpu.dot_dimension_numbers<[1], [0], [0], [1], [0, 0, 1, 1], [], []>} : vector<8x8xbf16>, vector<8x128xbf16>, vector<8x128xf32> -> vector<8x128xf32>
    %48 = arith.addf %40, %47 : vector<8x128xf32>
    %c0_36 = arith.constant 0 : index
    %c0_37 = arith.constant 0 : index
    %c3_38 = arith.constant 3 : index
    %49 = vector.load %arg1[%c0_36, %c0_37, %c3_38] : memref<4x8x132xf32, #tpu.memory_space<vmem>>, vector<1x8x128xf32>
    %50 = vector.shape_cast %49 : vector<1x8x128xf32> to vector<8x128xf32>
    %c6 = arith.constant 6 : index
    %c0_39 = arith.constant 0 : index
    %c0_40 = arith.constant 0 : index
    %51 = vector.load %arg2[%c6, %c0_39, %c0_40] : memref<9x8x8xf32, #tpu.memory_space<vmem>>, vector<1x8x8xf32>
    %52 = vector.shape_cast %51 : vector<1x8x8xf32> to vector<8x8xf32>
    %53 = arith.truncf %50 : vector<8x128xf32> to vector<8x128xbf16>
    %54 = arith.truncf %52 : vector<8x8xf32> to vector<8x8xbf16>
    %cst_41 = arith.constant dense<0.000000e+00> : vector<8x128xf32>
    %55 = tpu.matmul %54, %53, %cst_41 {dimension_numbers = #tpu.dot_dimension_numbers<[1], [0], [0], [1], [0, 0, 1, 1], [], []>} : vector<8x8xbf16>, vector<8x128xbf16>, vector<8x128xf32> -> vector<8x128xf32>
    %56 = arith.addf %48, %55 : vector<8x128xf32>
    %c1_42 = arith.constant 1 : index
    %c0_43 = arith.constant 0 : index
    %c3_44 = arith.constant 3 : index
    %57 = vector.load %arg1[%c1_42, %c0_43, %c3_44] : memref<4x8x132xf32, #tpu.memory_space<vmem>>, vector<1x8x128xf32>
    %58 = vector.shape_cast %57 : vector<1x8x128xf32> to vector<8x128xf32>
    %c7 = arith.constant 7 : index
    %c0_45 = arith.constant 0 : index
    %c0_46 = arith.constant 0 : index
    %59 = vector.load %arg2[%c7, %c0_45, %c0_46] : memref<9x8x8xf32, #tpu.memory_space<vmem>>, vector<1x8x8xf32>
    %60 = vector.shape_cast %59 : vector<1x8x8xf32> to vector<8x8xf32>
    %61 = arith.truncf %58 : vector<8x128xf32> to vector<8x128xbf16>
    %62 = arith.truncf %60 : vector<8x8xf32> to vector<8x8xbf16>
    %cst_47 = arith.constant dense<0.000000e+00> : vector<8x128xf32>
    %63 = tpu.matmul %62, %61, %cst_47 {dimension_numbers = #tpu.dot_dimension_numbers<[1], [0], [0], [1], [0, 0, 1, 1], [], []>} : vector<8x8xbf16>, vector<8x128xbf16>, vector<8x128xf32> -> vector<8x128xf32>
    %64 = arith.addf %56, %63 : vector<8x128xf32>
    %c0_48 = arith.constant 0 : index
    %c0_49 = arith.constant 0 : index
    %c4_50 = arith.constant 4 : index
    %65 = vector.load %arg1[%c0_48, %c0_49, %c4_50] : memref<4x8x132xf32, #tpu.memory_space<vmem>>, vector<1x8x128xf32>
    %66 = vector.shape_cast %65 : vector<1x8x128xf32> to vector<8x128xf32>
    %c8 = arith.constant 8 : index
    %c0_51 = arith.constant 0 : index
    %c0_52 = arith.constant 0 : index
    %67 = vector.load %arg2[%c8, %c0_51, %c0_52] : memref<9x8x8xf32, #tpu.memory_space<vmem>>, vector<1x8x8xf32>
    %68 = vector.shape_cast %67 : vector<1x8x8xf32> to vector<8x8xf32>
    %69 = arith.truncf %66 : vector<8x128xf32> to vector<8x128xbf16>
    %70 = arith.truncf %68 : vector<8x8xf32> to vector<8x8xbf16>
    %cst_53 = arith.constant dense<0.000000e+00> : vector<8x128xf32>
    %71 = tpu.matmul %70, %69, %cst_53 {dimension_numbers = #tpu.dot_dimension_numbers<[1], [0], [0], [1], [0, 0, 1, 1], [], []>} : vector<8x8xbf16>, vector<8x128xbf16>, vector<8x128xf32> -> vector<8x128xf32>
    %72 = arith.addf %64, %71 : vector<8x128xf32>
    %c0_54 = arith.constant 0 : index
    %c0_55 = arith.constant 0 : index
    %73 = vector.load %arg3[%c0_54, %c0_55] : memref<8x1xf32, #tpu.memory_space<vmem>>, vector<8x1xf32>
    %74 = vector.broadcast %73 : vector<8x1xf32> to vector<8x128xf32>
    %75 = arith.addf %72, %74 : vector<8x128xf32>
    %c0_56 = arith.constant 0 : index
    %c0_57 = arith.constant 0 : index
    %76 = vector.load %arg4[%c0_56, %c0_57] : memref<8x128xf32, #tpu.memory_space<vmem>>, vector<8x128xf32>
    tpu.vector_store %arg4[%c0_56, %c0_57], %75 {strides = array<i32>} : memref<8x128xf32, #tpu.memory_space<vmem>>, vector<8x128xf32>,
    return
  }
  func.func @transform_0(%arg0: i32) -> (i32, i32, i32) {
    %c0_i32 = arith.constant 0 : i32
    %c0_i32_0 = arith.constant 0 : i32
    %c0_i32_1 = arith.constant 0 : i32
    %c0_i32_2 = arith.constant 0 : i32
    return %c0_i32, %c0_i32_0, %c0_i32_1 : i32, i32, i32
  }
  func.func @transform_1(%arg0: i32) -> (i32, i32, i32) {
    %c0_i32 = arith.constant 0 : i32
    %c0_i32_0 = arith.constant 0 : i32
    %c0_i32_1 = arith.constant 0 : i32
    %c0_i32_2 = arith.constant 0 : i32
    return %c0_i32, %c0_i32_0, %c0_i32_1 : i32, i32, i32
  }
  func.func @transform_2(%arg0: i32) -> (i32, i32) {
    %c0_i32 = arith.constant 0 : i32
    %c0_i32_0 = arith.constant 0 : i32
    %c0_i32_1 = arith.constant 0 : i32
    return %c0_i32, %c0_i32_0 : i32, i32
  }
  func.func @transform_3(%arg0: i32) -> (i32, i32) {
    %c0_i32 = arith.constant 0 : i32
    %c0_i32_0 = arith.constant 0 : i32
    return %c0_i32, %arg0 : i32, i32
  }
}

module attributes {stable_mosaic.version = 11 : i64} {
  func.func @kernel(%arg0: i32, %arg1: memref<1x8x156xf32, #tpu.memory_space<vmem>>, %arg2: memref<9x8x8xf32, #tpu.memory_space<vmem>>, %arg3: memref<8x1xf32, #tpu.memory_space<vmem>>, %arg4: memref<8x128xf32, #tpu.memory_space<vmem>>) attributes {dimension_semantics = [#tpu.dimension_semantics<parallel>], iteration_bounds = array<i64: 1>, scalar_prefetch = 0 : i64, scratch_operands = 0 : i64, tpu.core_type = #tpu.core_type<tc>, window_params = [{pipeline_mode = #tpu.pipeline_mode<synchronous>, transform_indices = @transform_0, window_bounds = array<i64: 1, 8, 156>}, {pipeline_mode = #tpu.pipeline_mode<synchronous>, transform_indices = @transform_1, window_bounds = array<i64: 9, 8, 8>}, {pipeline_mode = #tpu.pipeline_mode<synchronous>, transform_indices = @transform_2, window_bounds = array<i64: 8, 1>}, {transform_indices = @transform_3, window_bounds = array<i64: 8, 128>}]} {
    %cst = arith.constant 0.000000e+00 : f32
    %0 = vector.broadcast %cst : f32 to vector<8x128xf32>
    %c0 = arith.constant 0 : index
    %c0_0 = arith.constant 0 : index
    %c0_1 = arith.constant 0 : index
    %1 = vector.load %arg1[%c0, %c0_0, %c0_1] : memref<1x8x156xf32, #tpu.memory_space<vmem>>, vector<1x8x128xf32>
    %2 = vector.shape_cast %1 : vector<1x8x128xf32> to vector<8x128xf32>
    %c0_2 = arith.constant 0 : index
    %c0_3 = arith.constant 0 : index
    %c0_4 = arith.constant 0 : index
    %3 = vector.load %arg2[%c0_2, %c0_3, %c0_4] : memref<9x8x8xf32, #tpu.memory_space<vmem>>, vector<1x8x8xf32>
    %4 = vector.shape_cast %3 : vector<1x8x8xf32> to vector<8x8xf32>
    %5 = arith.truncf %2 : vector<8x128xf32> to vector<8x128xbf16>
    %6 = arith.truncf %4 : vector<8x8xf32> to vector<8x8xbf16>
    %cst_5 = arith.constant dense<0.000000e+00> : vector<8x128xf32>
    %7 = tpu.matmul %6, %5, %cst_5 {dimension_numbers = #tpu.dot_dimension_numbers<[1], [0], [0], [1], [0, 0, 1, 1], [], []>} : vector<8x8xbf16>, vector<8x128xbf16>, vector<8x128xf32> -> vector<8x128xf32>
    %8 = arith.addf %0, %7 : vector<8x128xf32>
    %c0_6 = arith.constant 0 : index
    %c0_7 = arith.constant 0 : index
    %c2 = arith.constant 2 : index
    %9 = vector.load %arg1[%c0_6, %c0_7, %c2] : memref<1x8x156xf32, #tpu.memory_space<vmem>>, vector<1x8x128xf32>
    %10 = vector.shape_cast %9 : vector<1x8x128xf32> to vector<8x128xf32>
    %c1 = arith.constant 1 : index
    %c0_8 = arith.constant 0 : index
    %c0_9 = arith.constant 0 : index
    %11 = vector.load %arg2[%c1, %c0_8, %c0_9] : memref<9x8x8xf32, #tpu.memory_space<vmem>>, vector<1x8x8xf32>
    %12 = vector.shape_cast %11 : vector<1x8x8xf32> to vector<8x8xf32>
    %13 = arith.truncf %10 : vector<8x128xf32> to vector<8x128xbf16>
    %14 = arith.truncf %12 : vector<8x8xf32> to vector<8x8xbf16>
    %cst_10 = arith.constant dense<0.000000e+00> : vector<8x128xf32>
    %15 = tpu.matmul %14, %13, %cst_10 {dimension_numbers = #tpu.dot_dimension_numbers<[1], [0], [0], [1], [0, 0, 1, 1], [], []>} : vector<8x8xbf16>, vector<8x128xbf16>, vector<8x128xf32> -> vector<8x128xf32>
    %16 = arith.addf %8, %15 : vector<8x128xf32>
    %c0_11 = arith.constant 0 : index
    %c0_12 = arith.constant 0 : index
    %c4 = arith.constant 4 : index
    %17 = vector.load %arg1[%c0_11, %c0_12, %c4] : memref<1x8x156xf32, #tpu.memory_space<vmem>>, vector<1x8x128xf32>
    %18 = vector.shape_cast %17 : vector<1x8x128xf32> to vector<8x128xf32>
    %c2_13 = arith.constant 2 : index
    %c0_14 = arith.constant 0 : index
    %c0_15 = arith.constant 0 : index
    %19 = vector.load %arg2[%c2_13, %c0_14, %c0_15] : memref<9x8x8xf32, #tpu.memory_space<vmem>>, vector<1x8x8xf32>
    %20 = vector.shape_cast %19 : vector<1x8x8xf32> to vector<8x8xf32>
    %21 = arith.truncf %18 : vector<8x128xf32> to vector<8x128xbf16>
    %22 = arith.truncf %20 : vector<8x8xf32> to vector<8x8xbf16>
    %cst_16 = arith.constant dense<0.000000e+00> : vector<8x128xf32>
    %23 = tpu.matmul %22, %21, %cst_16 {dimension_numbers = #tpu.dot_dimension_numbers<[1], [0], [0], [1], [0, 0, 1, 1], [], []>} : vector<8x8xbf16>, vector<8x128xbf16>, vector<8x128xf32> -> vector<8x128xf32>
    %24 = arith.addf %16, %23 : vector<8x128xf32>
    %c0_17 = arith.constant 0 : index
    %c0_18 = arith.constant 0 : index
    %c12 = arith.constant 12 : index
    %25 = vector.load %arg1[%c0_17, %c0_18, %c12] : memref<1x8x156xf32, #tpu.memory_space<vmem>>, vector<1x8x128xf32>
    %26 = vector.shape_cast %25 : vector<1x8x128xf32> to vector<8x128xf32>
    %c3 = arith.constant 3 : index
    %c0_19 = arith.constant 0 : index
    %c0_20 = arith.constant 0 : index
    %27 = vector.load %arg2[%c3, %c0_19, %c0_20] : memref<9x8x8xf32, #tpu.memory_space<vmem>>, vector<1x8x8xf32>
    %28 = vector.shape_cast %27 : vector<1x8x8xf32> to vector<8x8xf32>
    %29 = arith.truncf %26 : vector<8x128xf32> to vector<8x128xbf16>
    %30 = arith.truncf %28 : vector<8x8xf32> to vector<8x8xbf16>
    %cst_21 = arith.constant dense<0.000000e+00> : vector<8x128xf32>
    %31 = tpu.matmul %30, %29, %cst_21 {dimension_numbers = #tpu.dot_dimension_numbers<[1], [0], [0], [1], [0, 0, 1, 1], [], []>} : vector<8x8xbf16>, vector<8x128xbf16>, vector<8x128xf32> -> vector<8x128xf32>
    %32 = arith.addf %24, %31 : vector<8x128xf32>
    %c0_22 = arith.constant 0 : index
    %c0_23 = arith.constant 0 : index
    %c14 = arith.constant 14 : index
    %33 = vector.load %arg1[%c0_22, %c0_23, %c14] : memref<1x8x156xf32, #tpu.memory_space<vmem>>, vector<1x8x128xf32>
    %34 = vector.shape_cast %33 : vector<1x8x128xf32> to vector<8x128xf32>
    %c4_24 = arith.constant 4 : index
    %c0_25 = arith.constant 0 : index
    %c0_26 = arith.constant 0 : index
    %35 = vector.load %arg2[%c4_24, %c0_25, %c0_26] : memref<9x8x8xf32, #tpu.memory_space<vmem>>, vector<1x8x8xf32>
    %36 = vector.shape_cast %35 : vector<1x8x8xf32> to vector<8x8xf32>
    %37 = arith.truncf %34 : vector<8x128xf32> to vector<8x128xbf16>
    %38 = arith.truncf %36 : vector<8x8xf32> to vector<8x8xbf16>
    %cst_27 = arith.constant dense<0.000000e+00> : vector<8x128xf32>
    %39 = tpu.matmul %38, %37, %cst_27 {dimension_numbers = #tpu.dot_dimension_numbers<[1], [0], [0], [1], [0, 0, 1, 1], [], []>} : vector<8x8xbf16>, vector<8x128xbf16>, vector<8x128xf32> -> vector<8x128xf32>
    %40 = arith.addf %32, %39 : vector<8x128xf32>
    %c0_28 = arith.constant 0 : index
    %c0_29 = arith.constant 0 : index
    %c16 = arith.constant 16 : index
    %41 = vector.load %arg1[%c0_28, %c0_29, %c16] : memref<1x8x156xf32, #tpu.memory_space<vmem>>, vector<1x8x128xf32>
    %42 = vector.shape_cast %41 : vector<1x8x128xf32> to vector<8x128xf32>
    %c5 = arith.constant 5 : index
    %c0_30 = arith.constant 0 : index
    %c0_31 = arith.constant 0 : index
    %43 = vector.load %arg2[%c5, %c0_30, %c0_31] : memref<9x8x8xf32, #tpu.memory_space<vmem>>, vector<1x8x8xf32>
    %44 = vector.shape_cast %43 : vector<1x8x8xf32> to vector<8x8xf32>
    %45 = arith.truncf %42 : vector<8x128xf32> to vector<8x128xbf16>
    %46 = arith.truncf %44 : vector<8x8xf32> to vector<8x8xbf16>
    %cst_32 = arith.constant dense<0.000000e+00> : vector<8x128xf32>
    %47 = tpu.matmul %46, %45, %cst_32 {dimension_numbers = #tpu.dot_dimension_numbers<[1], [0], [0], [1], [0, 0, 1, 1], [], []>} : vector<8x8xbf16>, vector<8x128xbf16>, vector<8x128xf32> -> vector<8x128xf32>
    %48 = arith.addf %40, %47 : vector<8x128xf32>
    %c0_33 = arith.constant 0 : index
    %c0_34 = arith.constant 0 : index
    %c24 = arith.constant 24 : index
    %49 = vector.load %arg1[%c0_33, %c0_34, %c24] : memref<1x8x156xf32, #tpu.memory_space<vmem>>, vector<1x8x128xf32>
    %50 = vector.shape_cast %49 : vector<1x8x128xf32> to vector<8x128xf32>
    %c6 = arith.constant 6 : index
    %c0_35 = arith.constant 0 : index
    %c0_36 = arith.constant 0 : index
    %51 = vector.load %arg2[%c6, %c0_35, %c0_36] : memref<9x8x8xf32, #tpu.memory_space<vmem>>, vector<1x8x8xf32>
    %52 = vector.shape_cast %51 : vector<1x8x8xf32> to vector<8x8xf32>
    %53 = arith.truncf %50 : vector<8x128xf32> to vector<8x128xbf16>
    %54 = arith.truncf %52 : vector<8x8xf32> to vector<8x8xbf16>
    %cst_37 = arith.constant dense<0.000000e+00> : vector<8x128xf32>
    %55 = tpu.matmul %54, %53, %cst_37 {dimension_numbers = #tpu.dot_dimension_numbers<[1], [0], [0], [1], [0, 0, 1, 1], [], []>} : vector<8x8xbf16>, vector<8x128xbf16>, vector<8x128xf32> -> vector<8x128xf32>
    %56 = arith.addf %48, %55 : vector<8x128xf32>
    %c0_38 = arith.constant 0 : index
    %c0_39 = arith.constant 0 : index
    %c26 = arith.constant 26 : index
    %57 = vector.load %arg1[%c0_38, %c0_39, %c26] : memref<1x8x156xf32, #tpu.memory_space<vmem>>, vector<1x8x128xf32>
    %58 = vector.shape_cast %57 : vector<1x8x128xf32> to vector<8x128xf32>
    %c7 = arith.constant 7 : index
    %c0_40 = arith.constant 0 : index
    %c0_41 = arith.constant 0 : index
    %59 = vector.load %arg2[%c7, %c0_40, %c0_41] : memref<9x8x8xf32, #tpu.memory_space<vmem>>, vector<1x8x8xf32>
    %60 = vector.shape_cast %59 : vector<1x8x8xf32> to vector<8x8xf32>
    %61 = arith.truncf %58 : vector<8x128xf32> to vector<8x128xbf16>
    %62 = arith.truncf %60 : vector<8x8xf32> to vector<8x8xbf16>
    %cst_42 = arith.constant dense<0.000000e+00> : vector<8x128xf32>
    %63 = tpu.matmul %62, %61, %cst_42 {dimension_numbers = #tpu.dot_dimension_numbers<[1], [0], [0], [1], [0, 0, 1, 1], [], []>} : vector<8x8xbf16>, vector<8x128xbf16>, vector<8x128xf32> -> vector<8x128xf32>
    %64 = arith.addf %56, %63 : vector<8x128xf32>
    %c0_43 = arith.constant 0 : index
    %c0_44 = arith.constant 0 : index
    %c28 = arith.constant 28 : index
    %65 = vector.load %arg1[%c0_43, %c0_44, %c28] : memref<1x8x156xf32, #tpu.memory_space<vmem>>, vector<1x8x128xf32>
    %66 = vector.shape_cast %65 : vector<1x8x128xf32> to vector<8x128xf32>
    %c8 = arith.constant 8 : index
    %c0_45 = arith.constant 0 : index
    %c0_46 = arith.constant 0 : index
    %67 = vector.load %arg2[%c8, %c0_45, %c0_46] : memref<9x8x8xf32, #tpu.memory_space<vmem>>, vector<1x8x8xf32>
    %68 = vector.shape_cast %67 : vector<1x8x8xf32> to vector<8x8xf32>
    %69 = arith.truncf %66 : vector<8x128xf32> to vector<8x128xbf16>
    %70 = arith.truncf %68 : vector<8x8xf32> to vector<8x8xbf16>
    %cst_47 = arith.constant dense<0.000000e+00> : vector<8x128xf32>
    %71 = tpu.matmul %70, %69, %cst_47 {dimension_numbers = #tpu.dot_dimension_numbers<[1], [0], [0], [1], [0, 0, 1, 1], [], []>} : vector<8x8xbf16>, vector<8x128xbf16>, vector<8x128xf32> -> vector<8x128xf32>
    %72 = arith.addf %64, %71 : vector<8x128xf32>
    %c0_48 = arith.constant 0 : index
    %c0_49 = arith.constant 0 : index
    %73 = vector.load %arg3[%c0_48, %c0_49] : memref<8x1xf32, #tpu.memory_space<vmem>>, vector<8x1xf32>
    %74 = vector.broadcast %73 : vector<8x1xf32> to vector<8x128xf32>
    %75 = arith.addf %72, %74 : vector<8x128xf32>
    %c0_50 = arith.constant 0 : index
    %c0_51 = arith.constant 0 : index
    %76 = vector.load %arg4[%c0_50, %c0_51] : memref<8x128xf32, #tpu.memory_space<vmem>>, vector<8x128xf32>
    tpu.vector_store %arg4[%c0_50, %c0_51], %75 {strides = array<i32>} : memref<8x128xf32, #tpu.memory_space<vmem>>, vector<8x128xf32>,
    return
  }
  func.func @transform_0(%arg0: i32) -> (i32, i32, i32) {
    %c0_i32 = arith.constant 0 : i32
    %c0_i32_0 = arith.constant 0 : i32
    %c0_i32_1 = arith.constant 0 : i32
    %c0_i32_2 = arith.constant 0 : i32
    return %c0_i32, %c0_i32_0, %c0_i32_1 : i32, i32, i32
  }
  func.func @transform_1(%arg0: i32) -> (i32, i32, i32) {
    %c0_i32 = arith.constant 0 : i32
    %c0_i32_0 = arith.constant 0 : i32
    %c0_i32_1 = arith.constant 0 : i32
    %c0_i32_2 = arith.constant 0 : i32
    return %c0_i32, %c0_i32_0, %c0_i32_1 : i32, i32, i32
  }
  func.func @transform_2(%arg0: i32) -> (i32, i32) {
    %c0_i32 = arith.constant 0 : i32
    %c0_i32_0 = arith.constant 0 : i32
    %c0_i32_1 = arith.constant 0 : i32
    return %c0_i32, %c0_i32_0 : i32, i32
  }
  func.func @transform_3(%arg0: i32) -> (i32, i32) {
    %c0_i32 = arith.constant 0 : i32
    %c0_i32_0 = arith.constant 0 : i32
    return %c0_i32, %arg0 : i32, i32
  }
}

module attributes {stable_mosaic.version = 11 : i64} {
  func.func @kernel(%arg0: i32, %arg1: memref<1x8x138xf32, #tpu.memory_space<vmem>>, %arg2: memref<9x8x8xf32, #tpu.memory_space<vmem>>, %arg3: memref<8x1xf32, #tpu.memory_space<vmem>>, %arg4: memref<8x128xf32, #tpu.memory_space<vmem>>) attributes {dimension_semantics = [#tpu.dimension_semantics<parallel>], iteration_bounds = array<i64: 1>, scalar_prefetch = 0 : i64, scratch_operands = 0 : i64, tpu.core_type = #tpu.core_type<tc>, window_params = [{pipeline_mode = #tpu.pipeline_mode<synchronous>, transform_indices = @transform_0, window_bounds = array<i64: 1, 8, 138>}, {pipeline_mode = #tpu.pipeline_mode<synchronous>, transform_indices = @transform_1, window_bounds = array<i64: 9, 8, 8>}, {pipeline_mode = #tpu.pipeline_mode<synchronous>, transform_indices = @transform_2, window_bounds = array<i64: 8, 1>}, {transform_indices = @transform_3, window_bounds = array<i64: 8, 128>}]} {
    %cst = arith.constant 0.000000e+00 : f32
    %0 = vector.broadcast %cst : f32 to vector<8x128xf32>
    %c0 = arith.constant 0 : index
    %c0_0 = arith.constant 0 : index
    %c0_1 = arith.constant 0 : index
    %1 = vector.load %arg1[%c0, %c0_0, %c0_1] : memref<1x8x138xf32, #tpu.memory_space<vmem>>, vector<1x8x128xf32>
    %2 = vector.shape_cast %1 : vector<1x8x128xf32> to vector<8x128xf32>
    %c0_2 = arith.constant 0 : index
    %c0_3 = arith.constant 0 : index
    %c0_4 = arith.constant 0 : index
    %3 = vector.load %arg2[%c0_2, %c0_3, %c0_4] : memref<9x8x8xf32, #tpu.memory_space<vmem>>, vector<1x8x8xf32>
    %4 = vector.shape_cast %3 : vector<1x8x8xf32> to vector<8x8xf32>
    %5 = arith.truncf %2 : vector<8x128xf32> to vector<8x128xbf16>
    %6 = arith.truncf %4 : vector<8x8xf32> to vector<8x8xbf16>
    %cst_5 = arith.constant dense<0.000000e+00> : vector<8x128xf32>
    %7 = tpu.matmul %6, %5, %cst_5 {dimension_numbers = #tpu.dot_dimension_numbers<[1], [0], [0], [1], [0, 0, 1, 1], [], []>} : vector<8x8xbf16>, vector<8x128xbf16>, vector<8x128xf32> -> vector<8x128xf32>
    %8 = arith.addf %0, %7 : vector<8x128xf32>
    %c0_6 = arith.constant 0 : index
    %c0_7 = arith.constant 0 : index
    %c1 = arith.constant 1 : index
    %9 = vector.load %arg1[%c0_6, %c0_7, %c1] : memref<1x8x138xf32, #tpu.memory_space<vmem>>, vector<1x8x128xf32>
    %10 = vector.shape_cast %9 : vector<1x8x128xf32> to vector<8x128xf32>
    %c1_8 = arith.constant 1 : index
    %c0_9 = arith.constant 0 : index
    %c0_10 = arith.constant 0 : index
    %11 = vector.load %arg2[%c1_8, %c0_9, %c0_10] : memref<9x8x8xf32, #tpu.memory_space<vmem>>, vector<1x8x8xf32>
    %12 = vector.shape_cast %11 : vector<1x8x8xf32> to vector<8x8xf32>
    %13 = arith.truncf %10 : vector<8x128xf32> to vector<8x128xbf16>
    %14 = arith.truncf %12 : vector<8x8xf32> to vector<8x8xbf16>
    %cst_11 = arith.constant dense<0.000000e+00> : vector<8x128xf32>
    %15 = tpu.matmul %14, %13, %cst_11 {dimension_numbers = #tpu.dot_dimension_numbers<[1], [0], [0], [1], [0, 0, 1, 1], [], []>} : vector<8x8xbf16>, vector<8x128xbf16>, vector<8x128xf32> -> vector<8x128xf32>
    %16 = arith.addf %8, %15 : vector<8x128xf32>
    %c0_12 = arith.constant 0 : index
    %c0_13 = arith.constant 0 : index
    %c2 = arith.constant 2 : index
    %17 = vector.load %arg1[%c0_12, %c0_13, %c2] : memref<1x8x138xf32, #tpu.memory_space<vmem>>, vector<1x8x128xf32>
    %18 = vector.shape_cast %17 : vector<1x8x128xf32> to vector<8x128xf32>
    %c2_14 = arith.constant 2 : index
    %c0_15 = arith.constant 0 : index
    %c0_16 = arith.constant 0 : index
    %19 = vector.load %arg2[%c2_14, %c0_15, %c0_16] : memref<9x8x8xf32, #tpu.memory_space<vmem>>, vector<1x8x8xf32>
    %20 = vector.shape_cast %19 : vector<1x8x8xf32> to vector<8x8xf32>
    %21 = arith.truncf %18 : vector<8x128xf32> to vector<8x128xbf16>
    %22 = arith.truncf %20 : vector<8x8xf32> to vector<8x8xbf16>
    %cst_17 = arith.constant dense<0.000000e+00> : vector<8x128xf32>
    %23 = tpu.matmul %22, %21, %cst_17 {dimension_numbers = #tpu.dot_dimension_numbers<[1], [0], [0], [1], [0, 0, 1, 1], [], []>} : vector<8x8xbf16>, vector<8x128xbf16>, vector<8x128xf32> -> vector<8x128xf32>
    %24 = arith.addf %16, %23 : vector<8x128xf32>
    %c0_18 = arith.constant 0 : index
    %c0_19 = arith.constant 0 : index
    %c4 = arith.constant 4 : index
    %25 = vector.load %arg1[%c0_18, %c0_19, %c4] : memref<1x8x138xf32, #tpu.memory_space<vmem>>, vector<1x8x128xf32>
    %26 = vector.shape_cast %25 : vector<1x8x128xf32> to vector<8x128xf32>
    %c3 = arith.constant 3 : index
    %c0_20 = arith.constant 0 : index
    %c0_21 = arith.constant 0 : index
    %27 = vector.load %arg2[%c3, %c0_20, %c0_21] : memref<9x8x8xf32, #tpu.memory_space<vmem>>, vector<1x8x8xf32>
    %28 = vector.shape_cast %27 : vector<1x8x8xf32> to vector<8x8xf32>
    %29 = arith.truncf %26 : vector<8x128xf32> to vector<8x128xbf16>
    %30 = arith.truncf %28 : vector<8x8xf32> to vector<8x8xbf16>
    %cst_22 = arith.constant dense<0.000000e+00> : vector<8x128xf32>
    %31 = tpu.matmul %30, %29, %cst_22 {dimension_numbers = #tpu.dot_dimension_numbers<[1], [0], [0], [1], [0, 0, 1, 1], [], []>} : vector<8x8xbf16>, vector<8x128xbf16>, vector<8x128xf32> -> vector<8x128xf32>
    %32 = arith.addf %24, %31 : vector<8x128xf32>
    %c0_23 = arith.constant 0 : index
    %c0_24 = arith.constant 0 : index
    %c5 = arith.constant 5 : index
    %33 = vector.load %arg1[%c0_23, %c0_24, %c5] : memref<1x8x138xf32, #tpu.memory_space<vmem>>, vector<1x8x128xf32>
    %34 = vector.shape_cast %33 : vector<1x8x128xf32> to vector<8x128xf32>
    %c4_25 = arith.constant 4 : index
    %c0_26 = arith.constant 0 : index
    %c0_27 = arith.constant 0 : index
    %35 = vector.load %arg2[%c4_25, %c0_26, %c0_27] : memref<9x8x8xf32, #tpu.memory_space<vmem>>, vector<1x8x8xf32>
    %36 = vector.shape_cast %35 : vector<1x8x8xf32> to vector<8x8xf32>
    %37 = arith.truncf %34 : vector<8x128xf32> to vector<8x128xbf16>
    %38 = arith.truncf %36 : vector<8x8xf32> to vector<8x8xbf16>
    %cst_28 = arith.constant dense<0.000000e+00> : vector<8x128xf32>
    %39 = tpu.matmul %38, %37, %cst_28 {dimension_numbers = #tpu.dot_dimension_numbers<[1], [0], [0], [1], [0, 0, 1, 1], [], []>} : vector<8x8xbf16>, vector<8x128xbf16>, vector<8x128xf32> -> vector<8x128xf32>
    %40 = arith.addf %32, %39 : vector<8x128xf32>
    %c0_29 = arith.constant 0 : index
    %c0_30 = arith.constant 0 : index
    %c6 = arith.constant 6 : index
    %41 = vector.load %arg1[%c0_29, %c0_30, %c6] : memref<1x8x138xf32, #tpu.memory_space<vmem>>, vector<1x8x128xf32>
    %42 = vector.shape_cast %41 : vector<1x8x128xf32> to vector<8x128xf32>
    %c5_31 = arith.constant 5 : index
    %c0_32 = arith.constant 0 : index
    %c0_33 = arith.constant 0 : index
    %43 = vector.load %arg2[%c5_31, %c0_32, %c0_33] : memref<9x8x8xf32, #tpu.memory_space<vmem>>, vector<1x8x8xf32>
    %44 = vector.shape_cast %43 : vector<1x8x8xf32> to vector<8x8xf32>
    %45 = arith.truncf %42 : vector<8x128xf32> to vector<8x128xbf16>
    %46 = arith.truncf %44 : vector<8x8xf32> to vector<8x8xbf16>
    %cst_34 = arith.constant dense<0.000000e+00> : vector<8x128xf32>
    %47 = tpu.matmul %46, %45, %cst_34 {dimension_numbers = #tpu.dot_dimension_numbers<[1], [0], [0], [1], [0, 0, 1, 1], [], []>} : vector<8x8xbf16>, vector<8x128xbf16>, vector<8x128xf32> -> vector<8x128xf32>
    %48 = arith.addf %40, %47 : vector<8x128xf32>
    %c0_35 = arith.constant 0 : index
    %c0_36 = arith.constant 0 : index
    %c8 = arith.constant 8 : index
    %49 = vector.load %arg1[%c0_35, %c0_36, %c8] : memref<1x8x138xf32, #tpu.memory_space<vmem>>, vector<1x8x128xf32>
    %50 = vector.shape_cast %49 : vector<1x8x128xf32> to vector<8x128xf32>
    %c6_37 = arith.constant 6 : index
    %c0_38 = arith.constant 0 : index
    %c0_39 = arith.constant 0 : index
    %51 = vector.load %arg2[%c6_37, %c0_38, %c0_39] : memref<9x8x8xf32, #tpu.memory_space<vmem>>, vector<1x8x8xf32>
    %52 = vector.shape_cast %51 : vector<1x8x8xf32> to vector<8x8xf32>
    %53 = arith.truncf %50 : vector<8x128xf32> to vector<8x128xbf16>
    %54 = arith.truncf %52 : vector<8x8xf32> to vector<8x8xbf16>
    %cst_40 = arith.constant dense<0.000000e+00> : vector<8x128xf32>
    %55 = tpu.matmul %54, %53, %cst_40 {dimension_numbers = #tpu.dot_dimension_numbers<[1], [0], [0], [1], [0, 0, 1, 1], [], []>} : vector<8x8xbf16>, vector<8x128xbf16>, vector<8x128xf32> -> vector<8x128xf32>
    %56 = arith.addf %48, %55 : vector<8x128xf32>
    %c0_41 = arith.constant 0 : index
    %c0_42 = arith.constant 0 : index
    %c9 = arith.constant 9 : index
    %57 = vector.load %arg1[%c0_41, %c0_42, %c9] : memref<1x8x138xf32, #tpu.memory_space<vmem>>, vector<1x8x128xf32>
    %58 = vector.shape_cast %57 : vector<1x8x128xf32> to vector<8x128xf32>
    %c7 = arith.constant 7 : index
    %c0_43 = arith.constant 0 : index
    %c0_44 = arith.constant 0 : index
    %59 = vector.load %arg2[%c7, %c0_43, %c0_44] : memref<9x8x8xf32, #tpu.memory_space<vmem>>, vector<1x8x8xf32>
    %60 = vector.shape_cast %59 : vector<1x8x8xf32> to vector<8x8xf32>
    %61 = arith.truncf %58 : vector<8x128xf32> to vector<8x128xbf16>
    %62 = arith.truncf %60 : vector<8x8xf32> to vector<8x8xbf16>
    %cst_45 = arith.constant dense<0.000000e+00> : vector<8x128xf32>
    %63 = tpu.matmul %62, %61, %cst_45 {dimension_numbers = #tpu.dot_dimension_numbers<[1], [0], [0], [1], [0, 0, 1, 1], [], []>} : vector<8x8xbf16>, vector<8x128xbf16>, vector<8x128xf32> -> vector<8x128xf32>
    %64 = arith.addf %56, %63 : vector<8x128xf32>
    %c0_46 = arith.constant 0 : index
    %c0_47 = arith.constant 0 : index
    %c10 = arith.constant 10 : index
    %65 = vector.load %arg1[%c0_46, %c0_47, %c10] : memref<1x8x138xf32, #tpu.memory_space<vmem>>, vector<1x8x128xf32>
    %66 = vector.shape_cast %65 : vector<1x8x128xf32> to vector<8x128xf32>
    %c8_48 = arith.constant 8 : index
    %c0_49 = arith.constant 0 : index
    %c0_50 = arith.constant 0 : index
    %67 = vector.load %arg2[%c8_48, %c0_49, %c0_50] : memref<9x8x8xf32, #tpu.memory_space<vmem>>, vector<1x8x8xf32>
    %68 = vector.shape_cast %67 : vector<1x8x8xf32> to vector<8x8xf32>
    %69 = arith.truncf %66 : vector<8x128xf32> to vector<8x128xbf16>
    %70 = arith.truncf %68 : vector<8x8xf32> to vector<8x8xbf16>
    %cst_51 = arith.constant dense<0.000000e+00> : vector<8x128xf32>
    %71 = tpu.matmul %70, %69, %cst_51 {dimension_numbers = #tpu.dot_dimension_numbers<[1], [0], [0], [1], [0, 0, 1, 1], [], []>} : vector<8x8xbf16>, vector<8x128xbf16>, vector<8x128xf32> -> vector<8x128xf32>
    %72 = arith.addf %64, %71 : vector<8x128xf32>
    %c0_52 = arith.constant 0 : index
    %c0_53 = arith.constant 0 : index
    %73 = vector.load %arg3[%c0_52, %c0_53] : memref<8x1xf32, #tpu.memory_space<vmem>>, vector<8x1xf32>
    %74 = vector.broadcast %73 : vector<8x1xf32> to vector<8x128xf32>
    %75 = arith.addf %72, %74 : vector<8x128xf32>
    %c0_54 = arith.constant 0 : index
    %c0_55 = arith.constant 0 : index
    %76 = vector.load %arg4[%c0_54, %c0_55] : memref<8x128xf32, #tpu.memory_space<vmem>>, vector<8x128xf32>
    tpu.vector_store %arg4[%c0_54, %c0_55], %75 {strides = array<i32>} : memref<8x128xf32, #tpu.memory_space<vmem>>, vector<8x128xf32>,
    return
  }
  func.func @transform_0(%arg0: i32) -> (i32, i32, i32) {
    %c0_i32 = arith.constant 0 : i32
    %c0_i32_0 = arith.constant 0 : i32
    %c0_i32_1 = arith.constant 0 : i32
    %c0_i32_2 = arith.constant 0 : i32
    return %c0_i32, %c0_i32_0, %c0_i32_1 : i32, i32, i32
  }
  func.func @transform_1(%arg0: i32) -> (i32, i32, i32) {
    %c0_i32 = arith.constant 0 : i32
    %c0_i32_0 = arith.constant 0 : i32
    %c0_i32_1 = arith.constant 0 : i32
    %c0_i32_2 = arith.constant 0 : i32
    return %c0_i32, %c0_i32_0, %c0_i32_1 : i32, i32, i32
  }
  func.func @transform_2(%arg0: i32) -> (i32, i32) {
    %c0_i32 = arith.constant 0 : i32
    %c0_i32_0 = arith.constant 0 : i32
    %c0_i32_1 = arith.constant 0 : i32
    return %c0_i32, %c0_i32_0 : i32, i32
  }
  func.func @transform_3(%arg0: i32) -> (i32, i32) {
    %c0_i32 = arith.constant 0 : i32
    %c0_i32_0 = arith.constant 0 : i32
    return %c0_i32, %arg0 : i32, i32
  }
}

module attributes {stable_mosaic.version = 11 : i64} {
  func.func @kernel(%arg0: i32, %arg1: memref<1x8x142xf32, #tpu.memory_space<vmem>>, %arg2: memref<9x8x8xf32, #tpu.memory_space<vmem>>, %arg3: memref<8x1xf32, #tpu.memory_space<vmem>>, %arg4: memref<8x128xf32, #tpu.memory_space<vmem>>) attributes {dimension_semantics = [#tpu.dimension_semantics<parallel>], iteration_bounds = array<i64: 1>, scalar_prefetch = 0 : i64, scratch_operands = 0 : i64, tpu.core_type = #tpu.core_type<tc>, window_params = [{pipeline_mode = #tpu.pipeline_mode<synchronous>, transform_indices = @transform_0, window_bounds = array<i64: 1, 8, 142>}, {pipeline_mode = #tpu.pipeline_mode<synchronous>, transform_indices = @transform_1, window_bounds = array<i64: 9, 8, 8>}, {pipeline_mode = #tpu.pipeline_mode<synchronous>, transform_indices = @transform_2, window_bounds = array<i64: 8, 1>}, {transform_indices = @transform_3, window_bounds = array<i64: 8, 128>}]} {
    %cst = arith.constant 0.000000e+00 : f32
    %0 = vector.broadcast %cst : f32 to vector<8x128xf32>
    %c0 = arith.constant 0 : index
    %c0_0 = arith.constant 0 : index
    %c0_1 = arith.constant 0 : index
    %1 = vector.load %arg1[%c0, %c0_0, %c0_1] : memref<1x8x142xf32, #tpu.memory_space<vmem>>, vector<1x8x128xf32>
    %2 = vector.shape_cast %1 : vector<1x8x128xf32> to vector<8x128xf32>
    %c0_2 = arith.constant 0 : index
    %c0_3 = arith.constant 0 : index
    %c0_4 = arith.constant 0 : index
    %3 = vector.load %arg2[%c0_2, %c0_3, %c0_4] : memref<9x8x8xf32, #tpu.memory_space<vmem>>, vector<1x8x8xf32>
    %4 = vector.shape_cast %3 : vector<1x8x8xf32> to vector<8x8xf32>
    %5 = arith.truncf %2 : vector<8x128xf32> to vector<8x128xbf16>
    %6 = arith.truncf %4 : vector<8x8xf32> to vector<8x8xbf16>
    %cst_5 = arith.constant dense<0.000000e+00> : vector<8x128xf32>
    %7 = tpu.matmul %6, %5, %cst_5 {dimension_numbers = #tpu.dot_dimension_numbers<[1], [0], [0], [1], [0, 0, 1, 1], [], []>} : vector<8x8xbf16>, vector<8x128xbf16>, vector<8x128xf32> -> vector<8x128xf32>
    %8 = arith.addf %0, %7 : vector<8x128xf32>
    %c0_6 = arith.constant 0 : index
    %c0_7 = arith.constant 0 : index
    %c1 = arith.constant 1 : index
    %9 = vector.load %arg1[%c0_6, %c0_7, %c1] : memref<1x8x142xf32, #tpu.memory_space<vmem>>, vector<1x8x128xf32>
    %10 = vector.shape_cast %9 : vector<1x8x128xf32> to vector<8x128xf32>
    %c1_8 = arith.constant 1 : index
    %c0_9 = arith.constant 0 : index
    %c0_10 = arith.constant 0 : index
    %11 = vector.load %arg2[%c1_8, %c0_9, %c0_10] : memref<9x8x8xf32, #tpu.memory_space<vmem>>, vector<1x8x8xf32>
    %12 = vector.shape_cast %11 : vector<1x8x8xf32> to vector<8x8xf32>
    %13 = arith.truncf %10 : vector<8x128xf32> to vector<8x128xbf16>
    %14 = arith.truncf %12 : vector<8x8xf32> to vector<8x8xbf16>
    %cst_11 = arith.constant dense<0.000000e+00> : vector<8x128xf32>
    %15 = tpu.matmul %14, %13, %cst_11 {dimension_numbers = #tpu.dot_dimension_numbers<[1], [0], [0], [1], [0, 0, 1, 1], [], []>} : vector<8x8xbf16>, vector<8x128xbf16>, vector<8x128xf32> -> vector<8x128xf32>
    %16 = arith.addf %8, %15 : vector<8x128xf32>
    %c0_12 = arith.constant 0 : index
    %c0_13 = arith.constant 0 : index
    %c2 = arith.constant 2 : index
    %17 = vector.load %arg1[%c0_12, %c0_13, %c2] : memref<1x8x142xf32, #tpu.memory_space<vmem>>, vector<1x8x128xf32>
    %18 = vector.shape_cast %17 : vector<1x8x128xf32> to vector<8x128xf32>
    %c2_14 = arith.constant 2 : index
    %c0_15 = arith.constant 0 : index
    %c0_16 = arith.constant 0 : index
    %19 = vector.load %arg2[%c2_14, %c0_15, %c0_16] : memref<9x8x8xf32, #tpu.memory_space<vmem>>, vector<1x8x8xf32>
    %20 = vector.shape_cast %19 : vector<1x8x8xf32> to vector<8x8xf32>
    %21 = arith.truncf %18 : vector<8x128xf32> to vector<8x128xbf16>
    %22 = arith.truncf %20 : vector<8x8xf32> to vector<8x8xbf16>
    %cst_17 = arith.constant dense<0.000000e+00> : vector<8x128xf32>
    %23 = tpu.matmul %22, %21, %cst_17 {dimension_numbers = #tpu.dot_dimension_numbers<[1], [0], [0], [1], [0, 0, 1, 1], [], []>} : vector<8x8xbf16>, vector<8x128xbf16>, vector<8x128xf32> -> vector<8x128xf32>
    %24 = arith.addf %16, %23 : vector<8x128xf32>
    %c0_18 = arith.constant 0 : index
    %c0_19 = arith.constant 0 : index
    %c6 = arith.constant 6 : index
    %25 = vector.load %arg1[%c0_18, %c0_19, %c6] : memref<1x8x142xf32, #tpu.memory_space<vmem>>, vector<1x8x128xf32>
    %26 = vector.shape_cast %25 : vector<1x8x128xf32> to vector<8x128xf32>
    %c3 = arith.constant 3 : index
    %c0_20 = arith.constant 0 : index
    %c0_21 = arith.constant 0 : index
    %27 = vector.load %arg2[%c3, %c0_20, %c0_21] : memref<9x8x8xf32, #tpu.memory_space<vmem>>, vector<1x8x8xf32>
    %28 = vector.shape_cast %27 : vector<1x8x8xf32> to vector<8x8xf32>
    %29 = arith.truncf %26 : vector<8x128xf32> to vector<8x128xbf16>
    %30 = arith.truncf %28 : vector<8x8xf32> to vector<8x8xbf16>
    %cst_22 = arith.constant dense<0.000000e+00> : vector<8x128xf32>
    %31 = tpu.matmul %30, %29, %cst_22 {dimension_numbers = #tpu.dot_dimension_numbers<[1], [0], [0], [1], [0, 0, 1, 1], [], []>} : vector<8x8xbf16>, vector<8x128xbf16>, vector<8x128xf32> -> vector<8x128xf32>
    %32 = arith.addf %24, %31 : vector<8x128xf32>
    %c0_23 = arith.constant 0 : index
    %c0_24 = arith.constant 0 : index
    %c7 = arith.constant 7 : index
    %33 = vector.load %arg1[%c0_23, %c0_24, %c7] : memref<1x8x142xf32, #tpu.memory_space<vmem>>, vector<1x8x128xf32>
    %34 = vector.shape_cast %33 : vector<1x8x128xf32> to vector<8x128xf32>
    %c4 = arith.constant 4 : index
    %c0_25 = arith.constant 0 : index
    %c0_26 = arith.constant 0 : index
    %35 = vector.load %arg2[%c4, %c0_25, %c0_26] : memref<9x8x8xf32, #tpu.memory_space<vmem>>, vector<1x8x8xf32>
    %36 = vector.shape_cast %35 : vector<1x8x8xf32> to vector<8x8xf32>
    %37 = arith.truncf %34 : vector<8x128xf32> to vector<8x128xbf16>
    %38 = arith.truncf %36 : vector<8x8xf32> to vector<8x8xbf16>
    %cst_27 = arith.constant dense<0.000000e+00> : vector<8x128xf32>
    %39 = tpu.matmul %38, %37, %cst_27 {dimension_numbers = #tpu.dot_dimension_numbers<[1], [0], [0], [1], [0, 0, 1, 1], [], []>} : vector<8x8xbf16>, vector<8x128xbf16>, vector<8x128xf32> -> vector<8x128xf32>
    %40 = arith.addf %32, %39 : vector<8x128xf32>
    %c0_28 = arith.constant 0 : index
    %c0_29 = arith.constant 0 : index
    %c8 = arith.constant 8 : index
    %41 = vector.load %arg1[%c0_28, %c0_29, %c8] : memref<1x8x142xf32, #tpu.memory_space<vmem>>, vector<1x8x128xf32>
    %42 = vector.shape_cast %41 : vector<1x8x128xf32> to vector<8x128xf32>
    %c5 = arith.constant 5 : index
    %c0_30 = arith.constant 0 : index
    %c0_31 = arith.constant 0 : index
    %43 = vector.load %arg2[%c5, %c0_30, %c0_31] : memref<9x8x8xf32, #tpu.memory_space<vmem>>, vector<1x8x8xf32>
    %44 = vector.shape_cast %43 : vector<1x8x8xf32> to vector<8x8xf32>
    %45 = arith.truncf %42 : vector<8x128xf32> to vector<8x128xbf16>
    %46 = arith.truncf %44 : vector<8x8xf32> to vector<8x8xbf16>
    %cst_32 = arith.constant dense<0.000000e+00> : vector<8x128xf32>
    %47 = tpu.matmul %46, %45, %cst_32 {dimension_numbers = #tpu.dot_dimension_numbers<[1], [0], [0], [1], [0, 0, 1, 1], [], []>} : vector<8x8xbf16>, vector<8x128xbf16>, vector<8x128xf32> -> vector<8x128xf32>
    %48 = arith.addf %40, %47 : vector<8x128xf32>
    %c0_33 = arith.constant 0 : index
    %c0_34 = arith.constant 0 : index
    %c12 = arith.constant 12 : index
    %49 = vector.load %arg1[%c0_33, %c0_34, %c12] : memref<1x8x142xf32, #tpu.memory_space<vmem>>, vector<1x8x128xf32>
    %50 = vector.shape_cast %49 : vector<1x8x128xf32> to vector<8x128xf32>
    %c6_35 = arith.constant 6 : index
    %c0_36 = arith.constant 0 : index
    %c0_37 = arith.constant 0 : index
    %51 = vector.load %arg2[%c6_35, %c0_36, %c0_37] : memref<9x8x8xf32, #tpu.memory_space<vmem>>, vector<1x8x8xf32>
    %52 = vector.shape_cast %51 : vector<1x8x8xf32> to vector<8x8xf32>
    %53 = arith.truncf %50 : vector<8x128xf32> to vector<8x128xbf16>
    %54 = arith.truncf %52 : vector<8x8xf32> to vector<8x8xbf16>
    %cst_38 = arith.constant dense<0.000000e+00> : vector<8x128xf32>
    %55 = tpu.matmul %54, %53, %cst_38 {dimension_numbers = #tpu.dot_dimension_numbers<[1], [0], [0], [1], [0, 0, 1, 1], [], []>} : vector<8x8xbf16>, vector<8x128xbf16>, vector<8x128xf32> -> vector<8x128xf32>
    %56 = arith.addf %48, %55 : vector<8x128xf32>
    %c0_39 = arith.constant 0 : index
    %c0_40 = arith.constant 0 : index
    %c13 = arith.constant 13 : index
    %57 = vector.load %arg1[%c0_39, %c0_40, %c13] : memref<1x8x142xf32, #tpu.memory_space<vmem>>, vector<1x8x128xf32>
    %58 = vector.shape_cast %57 : vector<1x8x128xf32> to vector<8x128xf32>
    %c7_41 = arith.constant 7 : index
    %c0_42 = arith.constant 0 : index
    %c0_43 = arith.constant 0 : index
    %59 = vector.load %arg2[%c7_41, %c0_42, %c0_43] : memref<9x8x8xf32, #tpu.memory_space<vmem>>, vector<1x8x8xf32>
    %60 = vector.shape_cast %59 : vector<1x8x8xf32> to vector<8x8xf32>
    %61 = arith.truncf %58 : vector<8x128xf32> to vector<8x128xbf16>
    %62 = arith.truncf %60 : vector<8x8xf32> to vector<8x8xbf16>
    %cst_44 = arith.constant dense<0.000000e+00> : vector<8x128xf32>
    %63 = tpu.matmul %62, %61, %cst_44 {dimension_numbers = #tpu.dot_dimension_numbers<[1], [0], [0], [1], [0, 0, 1, 1], [], []>} : vector<8x8xbf16>, vector<8x128xbf16>, vector<8x128xf32> -> vector<8x128xf32>
    %64 = arith.addf %56, %63 : vector<8x128xf32>
    %c0_45 = arith.constant 0 : index
    %c0_46 = arith.constant 0 : index
    %c14 = arith.constant 14 : index
    %65 = vector.load %arg1[%c0_45, %c0_46, %c14] : memref<1x8x142xf32, #tpu.memory_space<vmem>>, vector<1x8x128xf32>
    %66 = vector.shape_cast %65 : vector<1x8x128xf32> to vector<8x128xf32>
    %c8_47 = arith.constant 8 : index
    %c0_48 = arith.constant 0 : index
    %c0_49 = arith.constant 0 : index
    %67 = vector.load %arg2[%c8_47, %c0_48, %c0_49] : memref<9x8x8xf32, #tpu.memory_space<vmem>>, vector<1x8x8xf32>
    %68 = vector.shape_cast %67 : vector<1x8x8xf32> to vector<8x8xf32>
    %69 = arith.truncf %66 : vector<8x128xf32> to vector<8x128xbf16>
    %70 = arith.truncf %68 : vector<8x8xf32> to vector<8x8xbf16>
    %cst_50 = arith.constant dense<0.000000e+00> : vector<8x128xf32>
    %71 = tpu.matmul %70, %69, %cst_50 {dimension_numbers = #tpu.dot_dimension_numbers<[1], [0], [0], [1], [0, 0, 1, 1], [], []>} : vector<8x8xbf16>, vector<8x128xbf16>, vector<8x128xf32> -> vector<8x128xf32>
    %72 = arith.addf %64, %71 : vector<8x128xf32>
    %c0_51 = arith.constant 0 : index
    %c0_52 = arith.constant 0 : index
    %73 = vector.load %arg3[%c0_51, %c0_52] : memref<8x1xf32, #tpu.memory_space<vmem>>, vector<8x1xf32>
    %74 = vector.broadcast %73 : vector<8x1xf32> to vector<8x128xf32>
    %75 = arith.addf %72, %74 : vector<8x128xf32>
    %c0_53 = arith.constant 0 : index
    %c0_54 = arith.constant 0 : index
    %76 = vector.load %arg4[%c0_53, %c0_54] : memref<8x128xf32, #tpu.memory_space<vmem>>, vector<8x128xf32>
    tpu.vector_store %arg4[%c0_53, %c0_54], %75 {strides = array<i32>} : memref<8x128xf32, #tpu.memory_space<vmem>>, vector<8x128xf32>,
    return
  }
  func.func @transform_0(%arg0: i32) -> (i32, i32, i32) {
    %c0_i32 = arith.constant 0 : i32
    %c0_i32_0 = arith.constant 0 : i32
    %c0_i32_1 = arith.constant 0 : i32
    %c0_i32_2 = arith.constant 0 : i32
    return %c0_i32, %c0_i32_0, %c0_i32_1 : i32, i32, i32
  }
  func.func @transform_1(%arg0: i32) -> (i32, i32, i32) {
    %c0_i32 = arith.constant 0 : i32
    %c0_i32_0 = arith.constant 0 : i32
    %c0_i32_1 = arith.constant 0 : i32
    %c0_i32_2 = arith.constant 0 : i32
    return %c0_i32, %c0_i32_0, %c0_i32_1 : i32, i32, i32
  }
  func.func @transform_2(%arg0: i32) -> (i32, i32) {
    %c0_i32 = arith.constant 0 : i32
    %c0_i32_0 = arith.constant 0 : i32
    %c0_i32_1 = arith.constant 0 : i32
    return %c0_i32, %c0_i32_0 : i32, i32
  }
  func.func @transform_3(%arg0: i32) -> (i32, i32) {
    %c0_i32 = arith.constant 0 : i32
    %c0_i32_0 = arith.constant 0 : i32
    return %c0_i32, %arg0 : i32, i32
  }
}

module attributes {stable_mosaic.version = 11 : i64} {
  func.func @kernel(%arg0: i32, %arg1: memref<1x8x278xf32, #tpu.memory_space<vmem>>, %arg2: memref<9x8x8xf32, #tpu.memory_space<vmem>>, %arg3: memref<8x1xf32, #tpu.memory_space<vmem>>, %arg4: memref<8x256xf32, #tpu.memory_space<vmem>>) attributes {dimension_semantics = [#tpu.dimension_semantics<parallel>], iteration_bounds = array<i64: 1>, scalar_prefetch = 0 : i64, scratch_operands = 0 : i64, tpu.core_type = #tpu.core_type<tc>, window_params = [{pipeline_mode = #tpu.pipeline_mode<synchronous>, transform_indices = @transform_0, window_bounds = array<i64: 1, 8, 278>}, {pipeline_mode = #tpu.pipeline_mode<synchronous>, transform_indices = @transform_1, window_bounds = array<i64: 9, 8, 8>}, {pipeline_mode = #tpu.pipeline_mode<synchronous>, transform_indices = @transform_2, window_bounds = array<i64: 8, 1>}, {transform_indices = @transform_3, window_bounds = array<i64: 8, 256>}]} {
    %cst = arith.constant 0.000000e+00 : f32
    %0 = vector.broadcast %cst : f32 to vector<8x256xf32>
    %c0 = arith.constant 0 : index
    %c0_0 = arith.constant 0 : index
    %c0_1 = arith.constant 0 : index
    %1 = vector.load %arg1[%c0, %c0_0, %c0_1] : memref<1x8x278xf32, #tpu.memory_space<vmem>>, vector<1x8x256xf32>
    %2 = vector.shape_cast %1 : vector<1x8x256xf32> to vector<8x256xf32>
    %c0_2 = arith.constant 0 : index
    %c0_3 = arith.constant 0 : index
    %c0_4 = arith.constant 0 : index
    %3 = vector.load %arg2[%c0_2, %c0_3, %c0_4] : memref<9x8x8xf32, #tpu.memory_space<vmem>>, vector<1x8x8xf32>
    %4 = vector.shape_cast %3 : vector<1x8x8xf32> to vector<8x8xf32>
    %5 = arith.truncf %2 : vector<8x256xf32> to vector<8x256xbf16>
    %6 = arith.truncf %4 : vector<8x8xf32> to vector<8x8xbf16>
    %cst_5 = arith.constant dense<0.000000e+00> : vector<8x256xf32>
    %7 = tpu.matmul %6, %5, %cst_5 {dimension_numbers = #tpu.dot_dimension_numbers<[1], [0], [0], [1], [0, 0, 1, 1], [], []>} : vector<8x8xbf16>, vector<8x256xbf16>, vector<8x256xf32> -> vector<8x256xf32>
    %8 = arith.addf %0, %7 : vector<8x256xf32>
    %c0_6 = arith.constant 0 : index
    %c0_7 = arith.constant 0 : index
    %c1 = arith.constant 1 : index
    %9 = vector.load %arg1[%c0_6, %c0_7, %c1] : memref<1x8x278xf32, #tpu.memory_space<vmem>>, vector<1x8x256xf32>
    %10 = vector.shape_cast %9 : vector<1x8x256xf32> to vector<8x256xf32>
    %c1_8 = arith.constant 1 : index
    %c0_9 = arith.constant 0 : index
    %c0_10 = arith.constant 0 : index
    %11 = vector.load %arg2[%c1_8, %c0_9, %c0_10] : memref<9x8x8xf32, #tpu.memory_space<vmem>>, vector<1x8x8xf32>
    %12 = vector.shape_cast %11 : vector<1x8x8xf32> to vector<8x8xf32>
    %13 = arith.truncf %10 : vector<8x256xf32> to vector<8x256xbf16>
    %14 = arith.truncf %12 : vector<8x8xf32> to vector<8x8xbf16>
    %cst_11 = arith.constant dense<0.000000e+00> : vector<8x256xf32>
    %15 = tpu.matmul %14, %13, %cst_11 {dimension_numbers = #tpu.dot_dimension_numbers<[1], [0], [0], [1], [0, 0, 1, 1], [], []>} : vector<8x8xbf16>, vector<8x256xbf16>, vector<8x256xf32> -> vector<8x256xf32>
    %16 = arith.addf %8, %15 : vector<8x256xf32>
    %c0_12 = arith.constant 0 : index
    %c0_13 = arith.constant 0 : index
    %c2 = arith.constant 2 : index
    %17 = vector.load %arg1[%c0_12, %c0_13, %c2] : memref<1x8x278xf32, #tpu.memory_space<vmem>>, vector<1x8x256xf32>
    %18 = vector.shape_cast %17 : vector<1x8x256xf32> to vector<8x256xf32>
    %c2_14 = arith.constant 2 : index
    %c0_15 = arith.constant 0 : index
    %c0_16 = arith.constant 0 : index
    %19 = vector.load %arg2[%c2_14, %c0_15, %c0_16] : memref<9x8x8xf32, #tpu.memory_space<vmem>>, vector<1x8x8xf32>
    %20 = vector.shape_cast %19 : vector<1x8x8xf32> to vector<8x8xf32>
    %21 = arith.truncf %18 : vector<8x256xf32> to vector<8x256xbf16>
    %22 = arith.truncf %20 : vector<8x8xf32> to vector<8x8xbf16>
    %cst_17 = arith.constant dense<0.000000e+00> : vector<8x256xf32>
    %23 = tpu.matmul %22, %21, %cst_17 {dimension_numbers = #tpu.dot_dimension_numbers<[1], [0], [0], [1], [0, 0, 1, 1], [], []>} : vector<8x8xbf16>, vector<8x256xbf16>, vector<8x256xf32> -> vector<8x256xf32>
    %24 = arith.addf %16, %23 : vector<8x256xf32>
    %c0_18 = arith.constant 0 : index
    %c0_19 = arith.constant 0 : index
    %c10 = arith.constant 10 : index
    %25 = vector.load %arg1[%c0_18, %c0_19, %c10] : memref<1x8x278xf32, #tpu.memory_space<vmem>>, vector<1x8x256xf32>
    %26 = vector.shape_cast %25 : vector<1x8x256xf32> to vector<8x256xf32>
    %c3 = arith.constant 3 : index
    %c0_20 = arith.constant 0 : index
    %c0_21 = arith.constant 0 : index
    %27 = vector.load %arg2[%c3, %c0_20, %c0_21] : memref<9x8x8xf32, #tpu.memory_space<vmem>>, vector<1x8x8xf32>
    %28 = vector.shape_cast %27 : vector<1x8x8xf32> to vector<8x8xf32>
    %29 = arith.truncf %26 : vector<8x256xf32> to vector<8x256xbf16>
    %30 = arith.truncf %28 : vector<8x8xf32> to vector<8x8xbf16>
    %cst_22 = arith.constant dense<0.000000e+00> : vector<8x256xf32>
    %31 = tpu.matmul %30, %29, %cst_22 {dimension_numbers = #tpu.dot_dimension_numbers<[1], [0], [0], [1], [0, 0, 1, 1], [], []>} : vector<8x8xbf16>, vector<8x256xbf16>, vector<8x256xf32> -> vector<8x256xf32>
    %32 = arith.addf %24, %31 : vector<8x256xf32>
    %c0_23 = arith.constant 0 : index
    %c0_24 = arith.constant 0 : index
    %c11 = arith.constant 11 : index
    %33 = vector.load %arg1[%c0_23, %c0_24, %c11] : memref<1x8x278xf32, #tpu.memory_space<vmem>>, vector<1x8x256xf32>
    %34 = vector.shape_cast %33 : vector<1x8x256xf32> to vector<8x256xf32>
    %c4 = arith.constant 4 : index
    %c0_25 = arith.constant 0 : index
    %c0_26 = arith.constant 0 : index
    %35 = vector.load %arg2[%c4, %c0_25, %c0_26] : memref<9x8x8xf32, #tpu.memory_space<vmem>>, vector<1x8x8xf32>
    %36 = vector.shape_cast %35 : vector<1x8x8xf32> to vector<8x8xf32>
    %37 = arith.truncf %34 : vector<8x256xf32> to vector<8x256xbf16>
    %38 = arith.truncf %36 : vector<8x8xf32> to vector<8x8xbf16>
    %cst_27 = arith.constant dense<0.000000e+00> : vector<8x256xf32>
    %39 = tpu.matmul %38, %37, %cst_27 {dimension_numbers = #tpu.dot_dimension_numbers<[1], [0], [0], [1], [0, 0, 1, 1], [], []>} : vector<8x8xbf16>, vector<8x256xbf16>, vector<8x256xf32> -> vector<8x256xf32>
    %40 = arith.addf %32, %39 : vector<8x256xf32>
    %c0_28 = arith.constant 0 : index
    %c0_29 = arith.constant 0 : index
    %c12 = arith.constant 12 : index
    %41 = vector.load %arg1[%c0_28, %c0_29, %c12] : memref<1x8x278xf32, #tpu.memory_space<vmem>>, vector<1x8x256xf32>
    %42 = vector.shape_cast %41 : vector<1x8x256xf32> to vector<8x256xf32>
    %c5 = arith.constant 5 : index
    %c0_30 = arith.constant 0 : index
    %c0_31 = arith.constant 0 : index
    %43 = vector.load %arg2[%c5, %c0_30, %c0_31] : memref<9x8x8xf32, #tpu.memory_space<vmem>>, vector<1x8x8xf32>
    %44 = vector.shape_cast %43 : vector<1x8x8xf32> to vector<8x8xf32>
    %45 = arith.truncf %42 : vector<8x256xf32> to vector<8x256xbf16>
    %46 = arith.truncf %44 : vector<8x8xf32> to vector<8x8xbf16>
    %cst_32 = arith.constant dense<0.000000e+00> : vector<8x256xf32>
    %47 = tpu.matmul %46, %45, %cst_32 {dimension_numbers = #tpu.dot_dimension_numbers<[1], [0], [0], [1], [0, 0, 1, 1], [], []>} : vector<8x8xbf16>, vector<8x256xbf16>, vector<8x256xf32> -> vector<8x256xf32>
    %48 = arith.addf %40, %47 : vector<8x256xf32>
    %c0_33 = arith.constant 0 : index
    %c0_34 = arith.constant 0 : index
    %c20 = arith.constant 20 : index
    %49 = vector.load %arg1[%c0_33, %c0_34, %c20] : memref<1x8x278xf32, #tpu.memory_space<vmem>>, vector<1x8x256xf32>
    %50 = vector.shape_cast %49 : vector<1x8x256xf32> to vector<8x256xf32>
    %c6 = arith.constant 6 : index
    %c0_35 = arith.constant 0 : index
    %c0_36 = arith.constant 0 : index
    %51 = vector.load %arg2[%c6, %c0_35, %c0_36] : memref<9x8x8xf32, #tpu.memory_space<vmem>>, vector<1x8x8xf32>
    %52 = vector.shape_cast %51 : vector<1x8x8xf32> to vector<8x8xf32>
    %53 = arith.truncf %50 : vector<8x256xf32> to vector<8x256xbf16>
    %54 = arith.truncf %52 : vector<8x8xf32> to vector<8x8xbf16>
    %cst_37 = arith.constant dense<0.000000e+00> : vector<8x256xf32>
    %55 = tpu.matmul %54, %53, %cst_37 {dimension_numbers = #tpu.dot_dimension_numbers<[1], [0], [0], [1], [0, 0, 1, 1], [], []>} : vector<8x8xbf16>, vector<8x256xbf16>, vector<8x256xf32> -> vector<8x256xf32>
    %56 = arith.addf %48, %55 : vector<8x256xf32>
    %c0_38 = arith.constant 0 : index
    %c0_39 = arith.constant 0 : index
    %c21 = arith.constant 21 : index
    %57 = vector.load %arg1[%c0_38, %c0_39, %c21] : memref<1x8x278xf32, #tpu.memory_space<vmem>>, vector<1x8x256xf32>
    %58 = vector.shape_cast %57 : vector<1x8x256xf32> to vector<8x256xf32>
    %c7 = arith.constant 7 : index
    %c0_40 = arith.constant 0 : index
    %c0_41 = arith.constant 0 : index
    %59 = vector.load %arg2[%c7, %c0_40, %c0_41] : memref<9x8x8xf32, #tpu.memory_space<vmem>>, vector<1x8x8xf32>
    %60 = vector.shape_cast %59 : vector<1x8x8xf32> to vector<8x8xf32>
    %61 = arith.truncf %58 : vector<8x256xf32> to vector<8x256xbf16>
    %62 = arith.truncf %60 : vector<8x8xf32> to vector<8x8xbf16>
    %cst_42 = arith.constant dense<0.000000e+00> : vector<8x256xf32>
    %63 = tpu.matmul %62, %61, %cst_42 {dimension_numbers = #tpu.dot_dimension_numbers<[1], [0], [0], [1], [0, 0, 1, 1], [], []>} : vector<8x8xbf16>, vector<8x256xbf16>, vector<8x256xf32> -> vector<8x256xf32>
    %64 = arith.addf %56, %63 : vector<8x256xf32>
    %c0_43 = arith.constant 0 : index
    %c0_44 = arith.constant 0 : index
    %c22 = arith.constant 22 : index
    %65 = vector.load %arg1[%c0_43, %c0_44, %c22] : memref<1x8x278xf32, #tpu.memory_space<vmem>>, vector<1x8x256xf32>
    %66 = vector.shape_cast %65 : vector<1x8x256xf32> to vector<8x256xf32>
    %c8 = arith.constant 8 : index
    %c0_45 = arith.constant 0 : index
    %c0_46 = arith.constant 0 : index
    %67 = vector.load %arg2[%c8, %c0_45, %c0_46] : memref<9x8x8xf32, #tpu.memory_space<vmem>>, vector<1x8x8xf32>
    %68 = vector.shape_cast %67 : vector<1x8x8xf32> to vector<8x8xf32>
    %69 = arith.truncf %66 : vector<8x256xf32> to vector<8x256xbf16>
    %70 = arith.truncf %68 : vector<8x8xf32> to vector<8x8xbf16>
    %cst_47 = arith.constant dense<0.000000e+00> : vector<8x256xf32>
    %71 = tpu.matmul %70, %69, %cst_47 {dimension_numbers = #tpu.dot_dimension_numbers<[1], [0], [0], [1], [0, 0, 1, 1], [], []>} : vector<8x8xbf16>, vector<8x256xbf16>, vector<8x256xf32> -> vector<8x256xf32>
    %72 = arith.addf %64, %71 : vector<8x256xf32>
    %c0_48 = arith.constant 0 : index
    %c0_49 = arith.constant 0 : index
    %73 = vector.load %arg3[%c0_48, %c0_49] : memref<8x1xf32, #tpu.memory_space<vmem>>, vector<8x1xf32>
    %74 = vector.broadcast %73 : vector<8x1xf32> to vector<8x256xf32>
    %75 = arith.addf %72, %74 : vector<8x256xf32>
    %c0_50 = arith.constant 0 : index
    %c0_51 = arith.constant 0 : index
    %76 = vector.load %arg4[%c0_50, %c0_51] : memref<8x256xf32, #tpu.memory_space<vmem>>, vector<8x256xf32>
    tpu.vector_store %arg4[%c0_50, %c0_51], %75 {strides = array<i32>} : memref<8x256xf32, #tpu.memory_space<vmem>>, vector<8x256xf32>,
    return
  }
  func.func @transform_0(%arg0: i32) -> (i32, i32, i32) {
    %c0_i32 = arith.constant 0 : i32
    %c0_i32_0 = arith.constant 0 : i32
    %c0_i32_1 = arith.constant 0 : i32
    %c0_i32_2 = arith.constant 0 : i32
    return %c0_i32, %c0_i32_0, %c0_i32_1 : i32, i32, i32
  }
  func.func @transform_1(%arg0: i32) -> (i32, i32, i32) {
    %c0_i32 = arith.constant 0 : i32
    %c0_i32_0 = arith.constant 0 : i32
    %c0_i32_1 = arith.constant 0 : i32
    %c0_i32_2 = arith.constant 0 : i32
    return %c0_i32, %c0_i32_0, %c0_i32_1 : i32, i32, i32
  }
  func.func @transform_2(%arg0: i32) -> (i32, i32) {
    %c0_i32 = arith.constant 0 : i32
    %c0_i32_0 = arith.constant 0 : i32
    %c0_i32_1 = arith.constant 0 : i32
    return %c0_i32, %c0_i32_0 : i32, i32
  }
  func.func @transform_3(%arg0: i32) -> (i32, i32) {
    %c0_i32 = arith.constant 0 : i32
    %c0_i32_0 = arith.constant 0 : i32
    return %c0_i32, %arg0 : i32, i32
  }
}

module attributes {stable_mosaic.version = 11 : i64} {
  func.func @kernel(%arg0: i32, %arg1: memref<1x8x678xf32, #tpu.memory_space<vmem>>, %arg2: memref<9x8x8xf32, #tpu.memory_space<vmem>>, %arg3: memref<8x1xf32, #tpu.memory_space<vmem>>, %arg4: memref<8x640xf32, #tpu.memory_space<vmem>>) attributes {dimension_semantics = [#tpu.dimension_semantics<parallel>], iteration_bounds = array<i64: 1>, scalar_prefetch = 0 : i64, scratch_operands = 0 : i64, tpu.core_type = #tpu.core_type<tc>, window_params = [{pipeline_mode = #tpu.pipeline_mode<synchronous>, transform_indices = @transform_0, window_bounds = array<i64: 1, 8, 678>}, {pipeline_mode = #tpu.pipeline_mode<synchronous>, transform_indices = @transform_1, window_bounds = array<i64: 9, 8, 8>}, {pipeline_mode = #tpu.pipeline_mode<synchronous>, transform_indices = @transform_2, window_bounds = array<i64: 8, 1>}, {transform_indices = @transform_3, window_bounds = array<i64: 8, 640>}]} {
    %cst = arith.constant 0.000000e+00 : f32
    %0 = vector.broadcast %cst : f32 to vector<8x640xf32>
    %c0 = arith.constant 0 : index
    %c0_0 = arith.constant 0 : index
    %c0_1 = arith.constant 0 : index
    %1 = vector.load %arg1[%c0, %c0_0, %c0_1] : memref<1x8x678xf32, #tpu.memory_space<vmem>>, vector<1x8x640xf32>
    %2 = vector.shape_cast %1 : vector<1x8x640xf32> to vector<8x640xf32>
    %c0_2 = arith.constant 0 : index
    %c0_3 = arith.constant 0 : index
    %c0_4 = arith.constant 0 : index
    %3 = vector.load %arg2[%c0_2, %c0_3, %c0_4] : memref<9x8x8xf32, #tpu.memory_space<vmem>>, vector<1x8x8xf32>
    %4 = vector.shape_cast %3 : vector<1x8x8xf32> to vector<8x8xf32>
    %5 = arith.truncf %2 : vector<8x640xf32> to vector<8x640xbf16>
    %6 = arith.truncf %4 : vector<8x8xf32> to vector<8x8xbf16>
    %cst_5 = arith.constant dense<0.000000e+00> : vector<8x640xf32>
    %7 = tpu.matmul %6, %5, %cst_5 {dimension_numbers = #tpu.dot_dimension_numbers<[1], [0], [0], [1], [0, 0, 1, 1], [], []>} : vector<8x8xbf16>, vector<8x640xbf16>, vector<8x640xf32> -> vector<8x640xf32>
    %8 = arith.addf %0, %7 : vector<8x640xf32>
    %c0_6 = arith.constant 0 : index
    %c0_7 = arith.constant 0 : index
    %c1 = arith.constant 1 : index
    %9 = vector.load %arg1[%c0_6, %c0_7, %c1] : memref<1x8x678xf32, #tpu.memory_space<vmem>>, vector<1x8x640xf32>
    %10 = vector.shape_cast %9 : vector<1x8x640xf32> to vector<8x640xf32>
    %c1_8 = arith.constant 1 : index
    %c0_9 = arith.constant 0 : index
    %c0_10 = arith.constant 0 : index
    %11 = vector.load %arg2[%c1_8, %c0_9, %c0_10] : memref<9x8x8xf32, #tpu.memory_space<vmem>>, vector<1x8x8xf32>
    %12 = vector.shape_cast %11 : vector<1x8x8xf32> to vector<8x8xf32>
    %13 = arith.truncf %10 : vector<8x640xf32> to vector<8x640xbf16>
    %14 = arith.truncf %12 : vector<8x8xf32> to vector<8x8xbf16>
    %cst_11 = arith.constant dense<0.000000e+00> : vector<8x640xf32>
    %15 = tpu.matmul %14, %13, %cst_11 {dimension_numbers = #tpu.dot_dimension_numbers<[1], [0], [0], [1], [0, 0, 1, 1], [], []>} : vector<8x8xbf16>, vector<8x640xbf16>, vector<8x640xf32> -> vector<8x640xf32>
    %16 = arith.addf %8, %15 : vector<8x640xf32>
    %c0_12 = arith.constant 0 : index
    %c0_13 = arith.constant 0 : index
    %c2 = arith.constant 2 : index
    %17 = vector.load %arg1[%c0_12, %c0_13, %c2] : memref<1x8x678xf32, #tpu.memory_space<vmem>>, vector<1x8x640xf32>
    %18 = vector.shape_cast %17 : vector<1x8x640xf32> to vector<8x640xf32>
    %c2_14 = arith.constant 2 : index
    %c0_15 = arith.constant 0 : index
    %c0_16 = arith.constant 0 : index
    %19 = vector.load %arg2[%c2_14, %c0_15, %c0_16] : memref<9x8x8xf32, #tpu.memory_space<vmem>>, vector<1x8x8xf32>
    %20 = vector.shape_cast %19 : vector<1x8x8xf32> to vector<8x8xf32>
    %21 = arith.truncf %18 : vector<8x640xf32> to vector<8x640xbf16>
    %22 = arith.truncf %20 : vector<8x8xf32> to vector<8x8xbf16>
    %cst_17 = arith.constant dense<0.000000e+00> : vector<8x640xf32>
    %23 = tpu.matmul %22, %21, %cst_17 {dimension_numbers = #tpu.dot_dimension_numbers<[1], [0], [0], [1], [0, 0, 1, 1], [], []>} : vector<8x8xbf16>, vector<8x640xbf16>, vector<8x640xf32> -> vector<8x640xf32>
    %24 = arith.addf %16, %23 : vector<8x640xf32>
    %c0_18 = arith.constant 0 : index
    %c0_19 = arith.constant 0 : index
    %c18 = arith.constant 18 : index
    %25 = vector.load %arg1[%c0_18, %c0_19, %c18] : memref<1x8x678xf32, #tpu.memory_space<vmem>>, vector<1x8x640xf32>
    %26 = vector.shape_cast %25 : vector<1x8x640xf32> to vector<8x640xf32>
    %c3 = arith.constant 3 : index
    %c0_20 = arith.constant 0 : index
    %c0_21 = arith.constant 0 : index
    %27 = vector.load %arg2[%c3, %c0_20, %c0_21] : memref<9x8x8xf32, #tpu.memory_space<vmem>>, vector<1x8x8xf32>
    %28 = vector.shape_cast %27 : vector<1x8x8xf32> to vector<8x8xf32>
    %29 = arith.truncf %26 : vector<8x640xf32> to vector<8x640xbf16>
    %30 = arith.truncf %28 : vector<8x8xf32> to vector<8x8xbf16>
    %cst_22 = arith.constant dense<0.000000e+00> : vector<8x640xf32>
    %31 = tpu.matmul %30, %29, %cst_22 {dimension_numbers = #tpu.dot_dimension_numbers<[1], [0], [0], [1], [0, 0, 1, 1], [], []>} : vector<8x8xbf16>, vector<8x640xbf16>, vector<8x640xf32> -> vector<8x640xf32>
    %32 = arith.addf %24, %31 : vector<8x640xf32>
    %c0_23 = arith.constant 0 : index
    %c0_24 = arith.constant 0 : index
    %c19 = arith.constant 19 : index
    %33 = vector.load %arg1[%c0_23, %c0_24, %c19] : memref<1x8x678xf32, #tpu.memory_space<vmem>>, vector<1x8x640xf32>
    %34 = vector.shape_cast %33 : vector<1x8x640xf32> to vector<8x640xf32>
    %c4 = arith.constant 4 : index
    %c0_25 = arith.constant 0 : index
    %c0_26 = arith.constant 0 : index
    %35 = vector.load %arg2[%c4, %c0_25, %c0_26] : memref<9x8x8xf32, #tpu.memory_space<vmem>>, vector<1x8x8xf32>
    %36 = vector.shape_cast %35 : vector<1x8x8xf32> to vector<8x8xf32>
    %37 = arith.truncf %34 : vector<8x640xf32> to vector<8x640xbf16>
    %38 = arith.truncf %36 : vector<8x8xf32> to vector<8x8xbf16>
    %cst_27 = arith.constant dense<0.000000e+00> : vector<8x640xf32>
    %39 = tpu.matmul %38, %37, %cst_27 {dimension_numbers = #tpu.dot_dimension_numbers<[1], [0], [0], [1], [0, 0, 1, 1], [], []>} : vector<8x8xbf16>, vector<8x640xbf16>, vector<8x640xf32> -> vector<8x640xf32>
    %40 = arith.addf %32, %39 : vector<8x640xf32>
    %c0_28 = arith.constant 0 : index
    %c0_29 = arith.constant 0 : index
    %c20 = arith.constant 20 : index
    %41 = vector.load %arg1[%c0_28, %c0_29, %c20] : memref<1x8x678xf32, #tpu.memory_space<vmem>>, vector<1x8x640xf32>
    %42 = vector.shape_cast %41 : vector<1x8x640xf32> to vector<8x640xf32>
    %c5 = arith.constant 5 : index
    %c0_30 = arith.constant 0 : index
    %c0_31 = arith.constant 0 : index
    %43 = vector.load %arg2[%c5, %c0_30, %c0_31] : memref<9x8x8xf32, #tpu.memory_space<vmem>>, vector<1x8x8xf32>
    %44 = vector.shape_cast %43 : vector<1x8x8xf32> to vector<8x8xf32>
    %45 = arith.truncf %42 : vector<8x640xf32> to vector<8x640xbf16>
    %46 = arith.truncf %44 : vector<8x8xf32> to vector<8x8xbf16>
    %cst_32 = arith.constant dense<0.000000e+00> : vector<8x640xf32>
    %47 = tpu.matmul %46, %45, %cst_32 {dimension_numbers = #tpu.dot_dimension_numbers<[1], [0], [0], [1], [0, 0, 1, 1], [], []>} : vector<8x8xbf16>, vector<8x640xbf16>, vector<8x640xf32> -> vector<8x640xf32>
    %48 = arith.addf %40, %47 : vector<8x640xf32>
    %c0_33 = arith.constant 0 : index
    %c0_34 = arith.constant 0 : index
    %c36 = arith.constant 36 : index
    %49 = vector.load %arg1[%c0_33, %c0_34, %c36] : memref<1x8x678xf32, #tpu.memory_space<vmem>>, vector<1x8x640xf32>
    %50 = vector.shape_cast %49 : vector<1x8x640xf32> to vector<8x640xf32>
    %c6 = arith.constant 6 : index
    %c0_35 = arith.constant 0 : index
    %c0_36 = arith.constant 0 : index
    %51 = vector.load %arg2[%c6, %c0_35, %c0_36] : memref<9x8x8xf32, #tpu.memory_space<vmem>>, vector<1x8x8xf32>
    %52 = vector.shape_cast %51 : vector<1x8x8xf32> to vector<8x8xf32>
    %53 = arith.truncf %50 : vector<8x640xf32> to vector<8x640xbf16>
    %54 = arith.truncf %52 : vector<8x8xf32> to vector<8x8xbf16>
    %cst_37 = arith.constant dense<0.000000e+00> : vector<8x640xf32>
    %55 = tpu.matmul %54, %53, %cst_37 {dimension_numbers = #tpu.dot_dimension_numbers<[1], [0], [0], [1], [0, 0, 1, 1], [], []>} : vector<8x8xbf16>, vector<8x640xbf16>, vector<8x640xf32> -> vector<8x640xf32>
    %56 = arith.addf %48, %55 : vector<8x640xf32>
    %c0_38 = arith.constant 0 : index
    %c0_39 = arith.constant 0 : index
    %c37 = arith.constant 37 : index
    %57 = vector.load %arg1[%c0_38, %c0_39, %c37] : memref<1x8x678xf32, #tpu.memory_space<vmem>>, vector<1x8x640xf32>
    %58 = vector.shape_cast %57 : vector<1x8x640xf32> to vector<8x640xf32>
    %c7 = arith.constant 7 : index
    %c0_40 = arith.constant 0 : index
    %c0_41 = arith.constant 0 : index
    %59 = vector.load %arg2[%c7, %c0_40, %c0_41] : memref<9x8x8xf32, #tpu.memory_space<vmem>>, vector<1x8x8xf32>
    %60 = vector.shape_cast %59 : vector<1x8x8xf32> to vector<8x8xf32>
    %61 = arith.truncf %58 : vector<8x640xf32> to vector<8x640xbf16>
    %62 = arith.truncf %60 : vector<8x8xf32> to vector<8x8xbf16>
    %cst_42 = arith.constant dense<0.000000e+00> : vector<8x640xf32>
    %63 = tpu.matmul %62, %61, %cst_42 {dimension_numbers = #tpu.dot_dimension_numbers<[1], [0], [0], [1], [0, 0, 1, 1], [], []>} : vector<8x8xbf16>, vector<8x640xbf16>, vector<8x640xf32> -> vector<8x640xf32>
    %64 = arith.addf %56, %63 : vector<8x640xf32>
    %c0_43 = arith.constant 0 : index
    %c0_44 = arith.constant 0 : index
    %c38 = arith.constant 38 : index
    %65 = vector.load %arg1[%c0_43, %c0_44, %c38] : memref<1x8x678xf32, #tpu.memory_space<vmem>>, vector<1x8x640xf32>
    %66 = vector.shape_cast %65 : vector<1x8x640xf32> to vector<8x640xf32>
    %c8 = arith.constant 8 : index
    %c0_45 = arith.constant 0 : index
    %c0_46 = arith.constant 0 : index
    %67 = vector.load %arg2[%c8, %c0_45, %c0_46] : memref<9x8x8xf32, #tpu.memory_space<vmem>>, vector<1x8x8xf32>
    %68 = vector.shape_cast %67 : vector<1x8x8xf32> to vector<8x8xf32>
    %69 = arith.truncf %66 : vector<8x640xf32> to vector<8x640xbf16>
    %70 = arith.truncf %68 : vector<8x8xf32> to vector<8x8xbf16>
    %cst_47 = arith.constant dense<0.000000e+00> : vector<8x640xf32>
    %71 = tpu.matmul %70, %69, %cst_47 {dimension_numbers = #tpu.dot_dimension_numbers<[1], [0], [0], [1], [0, 0, 1, 1], [], []>} : vector<8x8xbf16>, vector<8x640xbf16>, vector<8x640xf32> -> vector<8x640xf32>
    %72 = arith.addf %64, %71 : vector<8x640xf32>
    %c0_48 = arith.constant 0 : index
    %c0_49 = arith.constant 0 : index
    %73 = vector.load %arg3[%c0_48, %c0_49] : memref<8x1xf32, #tpu.memory_space<vmem>>, vector<8x1xf32>
    %74 = vector.broadcast %73 : vector<8x1xf32> to vector<8x640xf32>
    %75 = arith.addf %72, %74 : vector<8x640xf32>
    %c0_50 = arith.constant 0 : index
    %c0_51 = arith.constant 0 : index
    %76 = vector.load %arg4[%c0_50, %c0_51] : memref<8x640xf32, #tpu.memory_space<vmem>>, vector<8x640xf32>
    tpu.vector_store %arg4[%c0_50, %c0_51], %75 {strides = array<i32>} : memref<8x640xf32, #tpu.memory_space<vmem>>, vector<8x640xf32>,
    return
  }
  func.func @transform_0(%arg0: i32) -> (i32, i32, i32) {
    %c0_i32 = arith.constant 0 : i32
    %c0_i32_0 = arith.constant 0 : i32
    %c0_i32_1 = arith.constant 0 : i32
    %c0_i32_2 = arith.constant 0 : i32
    return %c0_i32, %c0_i32_0, %c0_i32_1 : i32, i32, i32
  }
  func.func @transform_1(%arg0: i32) -> (i32, i32, i32) {
    %c0_i32 = arith.constant 0 : i32
    %c0_i32_0 = arith.constant 0 : i32
    %c0_i32_1 = arith.constant 0 : i32
    %c0_i32_2 = arith.constant 0 : i32
    return %c0_i32, %c0_i32_0, %c0_i32_1 : i32, i32, i32
  }
  func.func @transform_2(%arg0: i32) -> (i32, i32) {
    %c0_i32 = arith.constant 0 : i32
    %c0_i32_0 = arith.constant 0 : i32
    %c0_i32_1 = arith.constant 0 : i32
    return %c0_i32, %c0_i32_0 : i32, i32
  }
  func.func @transform_3(%arg0: i32) -> (i32, i32) {
    %c0_i32 = arith.constant 0 : i32
    %c0_i32_0 = arith.constant 0 : i32
    return %c0_i32, %arg0 : i32, i32
  }
}

</mosaic_0001>

<bundles_post_ra>
// kernel: usrm5_2_forward.13
= control target key start
LH: loop header
LB: loop body
LE: loop exit
PB: predicated region body
PF: predicated region fallthrough
CT: control target
= control target key end

     0   :  { %v661_v3 = vmov 0   ;;  %vm36_vm0 = vcmask 1043456   ;;  %s662_s29 = smov 127   ;;  %vm32_vm1 = vcmask 64512   ;;  %s663_s12 = smov 119   ;;  %vm152_vm2 = vcmask 1039360   ;;  %s817_s0 = inlined_call_operand.vmem [shape: f32[4,8,266], index: 0, kind: input, shape index: {}]   ;;  %s818_s1 = inlined_call_operand.vmem [shape: f32[9,8,8], index: 1, kind: input, shape index: {}]   ;;  %s819_s2 = inlined_call_operand.vmem [shape: f32[8,1], index: 2, kind: input, shape index: {}]   ;;  %s820_s3 = inlined_call_operand.vmem [shape: f32[8,256], index: 3, kind: input, shape index: {}]   ;;  %s821_s4 = inlined_call_operand.vmem [shape: f32[8,256], index: 4, kind: output, shape index: {}]  }
   0x1   :  { %v136_v0 = vld [vmem:[%s817_s0 + $0x10] sm:$0xff]  ;;  %v134_v1 = vld [vmem:[%s817_s0] sm:$0xff]  ;;  %75 = vmatprep.mubr.bf16.mxu0 %v661_v3  ;;  %125 = vmatprep.mubr.bf16.mxu1 %v661_v3  ;;  %v135_v6 = vld [vmem:[%s817_s0 + $0x8] sm:$0xff]  ;;  %s664_s15 = smov 118   ;;  %vm408_vm3 = vcmask 973824   ;;  %vm544_vm4 = vcmask 965632  }
   0x2   :  { %v637_v2 = vld [vmem:[%s817_s0 + $0x30] sm:$0xff]  ;;  %v141_v4 = vpack.c.bf16 %v136_v0, %v136_v0  ;;  %v139_v5 = vpack.c.bf16 %v134_v1, %v134_v1  ;;  %v638_v7 = vld [vmem:[%s817_s0 + $0x38] sm:$0xff]  ;;  %659 = vset.pattern.permute.xlu1 %v661_v3  ;;  %660 = vset.pattern.permute.xlu0 %v661_v3  ;;  %v140_v8 = vpack.c.bf16 %v135_v6, %v135_v6  ;;  %v647_v10 = vld [vmem:[%s817_s0 + $0x20] sm:$0xff] }
   0x3   :  { %v646_v9 = vld [vmem:[%s817_s0 + $0x18] sm:$0xff]  ;;  %v332_v11 = vpack.c.bf16 %v637_v2, %v637_v2  ;;  %v469_v13 = vpack.c.bf16 %v647_v10, %v647_v10  ;;  %v619_v15 = vld [vmem:[%s818_s1 + $0x8] sm:$0xff]  ;;  %v20_v16 = vld [vmem:[%s818_s1] sm:$0xff]  ;;  %v333_v18 = vpack.c.bf16 %v638_v7, %v638_v7 }
   0x4   :  { %150 = vrot.lane.b32.xlu1 %v141_v4, %s662_s29  ;;  %146 = vrot.lane.b32.xlu0 %v139_v5, %s662_s29  ;;  %v468_v12 = vpack.c.bf16 %v646_v9, %v646_v9  ;;  %v88_v14 = vsel %vm36_vm0, %v139_v5, 0  ;;  %v639_v17 = vld [vmem:[%s817_s0 + $0x40] sm:$0xff]  ;;  %v23_v19 = vpack.c.bf16 %v20_v16, %v20_v16  ;;  %v31_v21 = vpack.c.bf16 %v619_v15, %v619_v15  ;;  %v629_v24 = vld [vmem:[%s818_s1 + $0x18] sm:$0xff] }
   0x5   :  { %622 = vmatprep.subr.msk.bf16.mxu1 %vm36_vm0, %v140_v8  ;;  %620 = vmatprep.subr.msk.bf16.mxu0 %vm36_vm0, %v469_v13  ;;  %v219_v22 = vsel %vm36_vm0, %v332_v11, 0  ;;  %v334_v23 = vpack.c.bf16 %v639_v17, %v639_v17  ;;  %v214_v25 = vpack.c.bf16 %v629_v24, %v629_v24  ;;  %v648_v26 = vld [vmem:[%s817_s0 + $0x28] sm:$0xff]  ;;  %v599_v28 = vld [vmem:[%s819_s2] sm:$0xff]  ;;  %v633_v31 = vld [vmem:[%s817_s0 + $0x50] sm:$0xff] }
   0x6   :  { %v38_v20 = vsel %vm36_vm0, %v468_v12, 0  ;;  %94 = vmatpush1.bf16.msra.mxu1 %v88_v14  ;;  %v470_v27 = vpack.c.bf16 %v648_v26, %v648_v26  ;;  %v632_v32 = vld [vmem:[%s817_s0 + $0x48] sm:$0xff]  ;;  %v624_v33 = vld [vmem:[%s818_s1 + $0x10] sm:$0xff]  ;;  %v273_v36 = vpack.c.bf16 %v633_v31, %v633_v31  ;;  %v634_v50 = vld [vmem:[%s818_s1 + $0x20] sm:$0xff] }
   0x7   :  { %44 = vmatpush1.bf16.msra.mxu0 %v38_v20  ;;  %630 = vmatprep.subr.msk.bf16.mxu1 %vm36_vm0, %v333_v18  ;;  %v272_v37 = vpack.c.bf16 %v632_v32, %v632_v32  ;;  %v142_v41 = vpack.c.bf16 %v624_v33, %v624_v33  ;;  %v640_v42 = vld [vmem:[%s818_s1 + $0x28] sm:$0xff]  ;;  %v274_v53 = vpack.c.bf16 %v634_v50, %v634_v50  ;;  %v643_v59 = vld [vmem:[%s818_s1 + $0x30] sm:$0xff]  ;;  %v649_v60 = vld [vmem:[%s818_s1 + $0x38] sm:$0xff] }
   0x8   :  { %339 = vrot.lane.b32.xlu1 %v332_v11, %s662_s29  ;;  %148 = vrot.lane.b32.xlu0 %v140_v8, %s662_s29  ;;  %v335_v49 = vpack.c.bf16 %v640_v42, %v640_v42  ;;  %v401_v2 = vpack.c.bf16 %v643_v59, %v643_v59 }
   0x9   :  { %623 = vmatmul.mubr.msk.bf16.vlgmr.msra.gmra.mrb[0].mxu1 %vm32_vm1, %v23_v19  ;;  %v279_v45 = vsel %vm36_vm0, %v272_v37, 0 }
   0xa   :  { %621 = vmatmul.mubr.msk.bf16.vlgmr.msra.gmra.mrb[0].mxu0 %vm32_vm1, %v31_v21  ;;  %225 = vmatpush1.bf16.msra.mxu1 %v219_v22 }
   0xb   :  { %196 = vmatprep.mubr.bf16.mxu0 %v661_v3  ;;  %256 = vmatprep.mubr.bf16.mxu1 %v661_v3 }
   0xc   :  { %343 = vrot.lane.b32.xlu1 %v334_v23, %s662_s29  ;;  %341 = vrot.lane.b32.xlu0 %v333_v18, %s662_s29 }
  0x10   :  { %404 = vrot.lane.b32.xlu1 %v140_v8, %s663_s12  ;;  %402 = vrot.lane.b32.xlu0 %v139_v5, %s663_s12 }
  0x11   :  { %631 = vmatmul.mubr.msk.bf16.vlgmr.msra.gmra.mrb[4].mxu1 %vm32_vm1, %v214_v25 }
  0x12   :  { %388 = vmatprep.mubr.bf16.mxu1 %v661_v3 }
  0x14   :  { %475 = vrot.lane.b32.xlu1 %v468_v12, %s663_s12  ;;  %406 = vrot.lane.b32.xlu0 %v141_v4, %s663_s12 }
  0x18   :  { %479 = vrot.lane.b32.xlu1 %v470_v27, %s663_s12  ;;  %477 = vrot.lane.b32.xlu0 %v469_v13, %s663_s12 }
  0x1c   :  { %540 = vrot.lane.b32.xlu1 %v140_v8, %s664_s15  ;;  %538 = vrot.lane.b32.xlu0 %v139_v5, %s664_s15  ;;  %v652_v8 = vld [vmem:[%s818_s1 + $0x40] sm:$0xff] }
  0x1d   :  { %v537_v12 = vpack.c.bf16 %v652_v8, %v652_v8 }
  0x20   :  { %542 = vrot.lane.b32.xlu0 %v141_v4, %s664_s15  ;;  %602 = vperm.xlu1 %659, %v599_v28   ;;  %v471_v4 = vpack.c.bf16 %v649_v60, %v649_v60 }
  0x76   :  { %v151_v29 = vpop.permute.xlu1 %150  ;;  %v147_v30 = vpop.permute.xlu0 %146 }
  0x7a   :  { %v340_v34 = vpop.permute.xlu1 %339  ;;  %v149_v35 = vpop.permute.xlu0 %148 }
  0x7b   :  { %v153_v38 = vsel %vm152_vm2, %v147_v30, %v149_v35  ;;  %v154_v39 = vsel %vm152_vm2, %v149_v35, %v151_v29 }
  0x7c   :  { %v159_v40 = vsel %vm36_vm0, %v153_v38, 0  ;;  %625 = vmatprep.subr.msk.bf16.mxu0 %vm36_vm0, %v154_v39 }
  0x7d   :  { %165 = vmatpush1.bf16.msra.mxu0 %v159_v40 }
  0x7e   :  { %v344_v43 = vpop.permute.xlu1 %343  ;;  %v342_v44 = vpop.permute.xlu0 %341  ;;  %635 = vmatprep.subr.msk.bf16.mxu0 %vm36_vm0, %v273_v36 }
  0x7f   :  { %v345_v46 = vsel %vm152_vm2, %v340_v34, %v342_v44  ;;  %v346_v47 = vsel %vm152_vm2, %v342_v44, %v344_v43 }
  0x80   :  { %v351_v48 = vsel %vm36_vm0, %v345_v46, 0  ;;  %626 = vmatmul.mubr.msk.bf16.vlgmr.msra.gmra.mrb[4].mxu0 %vm32_vm1, %v142_v41  ;;  %641 = vmatprep.subr.msk.bf16.mxu1 %vm36_vm0, %v346_v47 }
  0x81   :  { %357 = vmatpush1.bf16.msra.mxu1 %v351_v48  ;;  %285 = vmatpush1.bf16.msra.mxu0 %v279_v45 }
  0x82   :  { %v405_v51 = vpop.permute.xlu1 %404  ;;  %v403_v52 = vpop.permute.xlu0 %402  ;;  %316 = vmatprep.mubr.bf16.mxu0 %v661_v3 }
  0x83   :  { %v409_v54 = vsel %vm408_vm3, %v403_v52, %v405_v51 }
  0x84   :  { %642 = vmatmul.mubr.msk.bf16.vlgmr.msra.gmra.mrb[8].mxu1 %vm32_vm1, %v335_v49  ;;  %v415_v58 = vsel %vm36_vm0, %v409_v54, 0 }
  0x85   :  { %524 = vmatprep.mubr.bf16.mxu1 %v661_v3 }
  0x86   :  { %v476_v55 = vpop.permute.xlu1 %475  ;;  %v407_v56 = vpop.permute.xlu0 %406 }
  0x87   :  { %v410_v57 = vsel %vm408_vm3, %v405_v51, %v407_v56 }
  0x88   :  { %636 = vmatmul.mubr.msk.bf16.vlgmr.msra.gmra.mrb[8].mxu0 %vm32_vm1, %v274_v53  ;;  %644 = vmatprep.subr.msk.bf16.mxu0 %vm36_vm0, %v410_v57 }
  0x89   :  { %421 = vmatpush1.bf16.msra.mxu0 %v415_v58  ;;  %452 = vmatprep.mubr.bf16.mxu0 %v661_v3 }
  0x8a   :  { %v480_v61 = vpop.permute.xlu1 %479  ;;  %v478_v62 = vpop.permute.xlu0 %477 }
  0x8b   :  { %v481_v63 = vsel %vm408_vm3, %v476_v55, %v478_v62  ;;  %v482_v0 = vsel %vm408_vm3, %v478_v62, %v480_v61 }
  0x8c   :  { %v487_v1 = vsel %vm36_vm0, %v481_v63, 0  ;;  %650 = vmatprep.subr.msk.bf16.mxu1 %vm36_vm0, %v482_v0  ;;  %v607_v63 = vld [vmem:[%s820_s3] sm:$0xff] }
  0x8d   :  { %493 = vmatpush1.bf16.msra.mxu1 %v487_v1  ;;  %v608_v1 = vld [vmem:[%s820_s3 + $0x8] sm:$0xff] }
  0x8e   :  { %v541_v5 = vpop.permute.xlu1 %540  ;;  %v539_v6 = vpop.permute.xlu0 %538 }
  0x8f   :  { %v545_v7 = vsel %vm544_vm4, %v539_v6, %v541_v5 }
  0x90   :  { %645 = vmatmul.mubr.msk.bf16.vlgmr.msra.gmra.mrb[12].mxu0 %vm32_vm1, %v401_v2  ;;  %651 = vmatmul.mubr.msk.bf16.vlgmr.msra.gmra.mrb[12].mxu1 %vm32_vm1, %v471_v4  ;;  %v551_v11 = vsel %vm36_vm0, %v545_v7, 0 }
  0x91   :  { %588 = vmatprep.mubr.bf16.mxu0 %v661_v3 }
  0x92   :  { %v543_v9 = vpop.permute.xlu0 %542 }
  0x93   :  { %v546_v10 = vsel %vm544_vm4, %v541_v5, %v543_v9 }
  0x94   :  { %653 = vmatprep.subr.msk.bf16.mxu0 %vm36_vm0, %v546_v10 }
  0x95   :  { %557 = vmatpush1.bf16.msra.mxu0 %v551_v11 }
  0x98   :  { %654 = vmatmul.mubr.msk.bf16.vlgmr.msra.gmra.mrb[16].mxu0 %vm32_vm1, %v537_v12 }
  0x9f   :  { %v603_v59 = vpop.permute.xlu1 %602 }
  0xdc   :  { %v127_v13 = vpop.f32.mrb[0].mxu1 }
  0xdd   :  { %v77_v14 = vpop.f32.mrb[0].mxu0  ;;  %v129_v15 = vpop.f32.mrb[1].mxu1 }
  0xde   :  { %v79_v16 = vpop.f32.mrb[1].mxu0  ;;  %v128_v17 = vadd.f32 %v127_v13, %v77_v14  ;;  %v131_v3 = vpop.f32.mrb[2].mxu1 }
  0xdf   :  { %v81_v18 = vpop.f32.mrb[2].mxu0  ;;  %v130_v19 = vadd.f32 %v129_v15, %v79_v16  ;;  %v132_v20 = vpop.f32.mrb[3].mxu1 }
  0xe0   :  { %v82_v21 = vpop.f32.mrb[3].mxu0 }
  0xe4   :  { %v258_v22 = vpop.f32.mrb[4].mxu1 }
  0xe5   :  { %v260_v23 = vpop.f32.mrb[5].mxu1 }
  0xe6   :  { %v262_v24 = vpop.f32.mrb[6].mxu1 }
  0xe7   :  { %v263_v25 = vpop.f32.mrb[7].mxu1 }
 0x153   :  { %v198_v26 = vpop.f32.mrb[4].mxu0 }
 0x154   :  { %v205_v27 = vadd.f32 %v198_v26, %v128_v17  ;;  %v200_v28 = vpop.f32.mrb[5].mxu0 }
 0x155   :  { %v206_v29 = vadd.f32 %v200_v28, %v130_v19  ;;  %v202_v30 = vpop.f32.mrb[6].mxu0 }
 0x156   :  { %v265_v31 = vadd.f32 %v258_v22, %v205_v27  ;;  %v203_v32 = vpop.f32.mrb[7].mxu0 }
 0x157   :  { %v266_v33 = vadd.f32 %v260_v23, %v206_v29  ;;  %v390_v34 = vpop.f32.mrb[8].mxu1 }
 0x158   :  { %v392_v35 = vpop.f32.mrb[9].mxu1 }
 0x159   :  { %v394_v36 = vpop.f32.mrb[10].mxu1 }
 0x15a   :  { %v395_v37 = vpop.f32.mrb[11].mxu1 }
 0x15b   :  { %v318_v38 = vpop.f32.mrb[8].mxu0 }
 0x15c   :  { %v325_v39 = vadd.f32 %v318_v38, %v265_v31  ;;  %v320_v40 = vpop.f32.mrb[9].mxu0 }
 0x15d   :  { %v326_v41 = vadd.f32 %v320_v40, %v266_v33  ;;  %v322_v42 = vpop.f32.mrb[10].mxu0 }
 0x15e   :  { %v397_v43 = vadd.f32 %v390_v34, %v325_v39  ;;  %v323_v44 = vpop.f32.mrb[11].mxu0 }
 0x15f   :  { %v398_v45 = vadd.f32 %v392_v35, %v326_v41 }
 0x163   :  { %v454_v46 = vpop.f32.mrb[12].mxu0  ;;  %v526_v47 = vpop.f32.mrb[12].mxu1 }
 0x164   :  { %v461_v48 = vadd.f32 %v454_v46, %v397_v43  ;;  %v456_v49 = vpop.f32.mrb[13].mxu0  ;;  %v528_v50 = vpop.f32.mrb[13].mxu1 }
 0x165   :  { %v462_v51 = vadd.f32 %v456_v49, %v398_v45  ;;  %v458_v52 = vpop.f32.mrb[14].mxu0  ;;  %v530_v53 = vpop.f32.mrb[14].mxu1 }
 0x166   :  { %v533_v54 = vadd.f32 %v526_v47, %v461_v48  ;;  %v459_v55 = vpop.f32.mrb[15].mxu0  ;;  %v531_v56 = vpop.f32.mrb[15].mxu1 }
 0x167   :  { %v534_v57 = vadd.f32 %v528_v50, %v462_v51 }
 0x16b   :  { %v590_v58 = vpop.f32.mrb[16].mxu0 }
 0x16c   :  { %v597_v60 = vadd.f32 %v590_v58, %v533_v54  ;;  %v592_v61 = vpop.f32.mrb[17].mxu0 }
 0x16d   :  { %v598_v62 = vadd.f32 %v592_v61, %v534_v57  ;;  %v594_v0 = vpop.f32.mrb[18].mxu0 }
 0x16e   :  { %v605_v2 = vadd.f32 %v603_v59, %v597_v60  ;;  %v595_v4 = vpop.f32.mrb[19].mxu0 }
 0x16f   :  { %v606_v5 = vadd.f32 %v603_v59, %v598_v62 }
 0x170   :  { %v609_v6 = vadd.f32 %v607_v63, %v605_v2 }
 0x171   :  { %v610_v7 = vadd.f32 %v608_v1, %v606_v5 }
 0x172   :  { %611 = vst [vmem:[%s821_s4] sm:$0xff] %v609_v6 }
 0x173   :  { %612 = vst [vmem:[%s821_s4 + $0x8] sm:$0xff] %v610_v7 }

// kernel: usrm5_2_forward.14
= control target key start
LH: loop header
LB: loop body
LE: loop exit
PB: predicated region body
PF: predicated region fallthrough
CT: control target
= control target key end

     0   :  { %v641_v3 = vmov 0.0   ;;  %vm32_vm0 = vcmask 1043456   ;;  %vm642_vm1 = vmmov 0   ;;  %s643_s29 = smov 127   ;;  %vm28_vm2 = vcmask 64512   ;;  %s644_s8 = smov 123   ;;  %s774_s0 = inlined_call_operand.vmem [shape: f32[4,8,134], index: 0, kind: input, shape index: {}]   ;;  %s775_s1 = inlined_call_operand.vmem [shape: f32[9,8,8], index: 1, kind: input, shape index: {}]   ;;  %s776_s2 = inlined_call_operand.vmem [shape: f32[8,1], index: 2, kind: input, shape index: {}]   ;;  %s777_s3 = inlined_call_operand.vmem [shape: f32[8,128], index: 3, kind: input, shape index: {}]   ;;  %s778_s4 = inlined_call_operand.vmem [shape: f32[8,128], index: 4, kind: output, shape index: {}]  }
   0x1   :  { %v122_v0 = vld [vmem:[%s774_s0] sm:$0xff]  ;;  %v123_v1 = vld [vmem:[%s774_s0 + $0x8] sm:$0xff]  ;;  %580 = vmatprep.subr.bf16.mxu0 %v641_v3  ;;  %586 = vmatprep.subr.bf16.mxu1 %v641_v3  ;;  %v556_v7 = vld [vmem:[%s774_s0 + $0x10] sm:$0xff]  ;;  %s645_s9 = smov 122   ;;  %v646_v22 = vmov 0   ;;  %vm135_vm3 = vcmask 1039360  }
   0x2   :  { %v550_v2 = vld [vmem:[%s774_s0 + $0x20] sm:$0xff]  ;;  %v126_v4 = vpack.c.bf16 %v122_v0, %v122_v0  ;;  %v551_v6 = vld [vmem:[%s774_s0 + $0x28] sm:$0xff]  ;;  %582 = vmatprep.mubr.msk.bf16.mxu0 %vm642_vm1, %v641_v3  ;;  %588 = vmatprep.mubr.msk.bf16.mxu1 %vm642_vm1, %v641_v3  ;;  %v411_v8 = vpack.c.bf16 %v556_v7, %v556_v7  ;;  %v127_v11 = vpack.c.bf16 %v123_v1, %v123_v1  ;;  %v557_v18 = vld [vmem:[%s774_s0 + $0x18] sm:$0xff]  ;;  %vm358_vm4 = vcmask 1006592  }
   0x3   :  { %v294_v5 = vpack.c.bf16 %v550_v2, %v550_v2  ;;  %v539_v9 = vld [vmem:[%s775_s1 + $0x8] sm:$0xff]  ;;  %v19_v10 = vld [vmem:[%s775_s1] sm:$0xff]  ;;  %v295_v12 = vpack.c.bf16 %v551_v6, %v551_v6  ;;  %v545_v19 = vld [vmem:[%s775_s1 + $0x18] sm:$0xff]  ;;  %v412_v20 = vpack.c.bf16 %v557_v18, %v557_v18  ;;  %640 = vset.pattern.permute.xlu0 %v646_v22  ;;  %vm475_vm5 = vcmask 998400  }
   0x4   :  { %131 = vrot.lane.b32.xlu0 %v126_v4, %s643_s29  ;;  %v80_v13 = vsel %vm32_vm0, %v126_v4, 0  ;;  %v34_v14 = vsel %vm32_vm0, %v411_v8, 0  ;;  %v27_v15 = vpack.c.bf16 %v539_v9, %v539_v9  ;;  %v21_v16 = vpack.c.bf16 %v19_v10, %v19_v10  ;;  %v524_v23 = vld [vmem:[%s776_s2] sm:$0xff]  ;;  %v547_v26 = vld [vmem:[%s774_s0 + $0x30] sm:$0xff]  ;;  %v552_v28 = vld [vmem:[%s775_s1 + $0x28] sm:$0xff] }
   0x5   :  { %299 = vrot.lane.b32.xlu1 %v294_v5, %s643_s29  ;;  %587 = vmatpush3.bf16.msra.mxu1 %v80_v13  ;;  %v194_v17 = vsel %vm32_vm0, %v294_v5, 0  ;;  %v189_v21 = vpack.c.bf16 %v545_v19, %v545_v19  ;;  %v542_v27 = vld [vmem:[%s775_s1 + $0x10] sm:$0xff]  ;;  %v241_v31 = vpack.c.bf16 %v547_v26, %v547_v26  ;;  %v296_v37 = vpack.c.bf16 %v552_v28, %v552_v28  ;;  %v548_v41 = vld [vmem:[%s775_s1 + $0x20] sm:$0xff]  ;;  %v558_v42 = vld [vmem:[%s775_s1 + $0x38] sm:$0xff] }
   0x6   :  { %581 = vmatpush3.bf16.msra.mxu0 %v34_v14  ;;  %598 = vmatprep.subr.bf16.mxu1 %v641_v3  ;;  %v128_v35 = vpack.c.bf16 %v542_v27, %v542_v27  ;;  %v242_v47 = vpack.c.bf16 %v548_v41, %v548_v41  ;;  %v413_v49 = vpack.c.bf16 %v558_v42, %v558_v42  ;;  %v554_v53 = vld [vmem:[%s775_s1 + $0x30] sm:$0xff]  ;;  %v560_v57 = vld [vmem:[%s775_s1 + $0x40] sm:$0xff] }
   0x7   :  { %592 = vmatprep.subr.bf16.mxu0 %v641_v3  ;;  %v247_v38 = vsel %vm32_vm0, %v241_v31, 0  ;;  %v353_v55 = vpack.c.bf16 %v554_v53, %v554_v53  ;;  %v470_v58 = vpack.c.bf16 %v560_v57, %v560_v57 }
   0x8   :  { %133 = vrot.lane.b32.xlu0 %v127_v11, %s643_s29  ;;  %589 = vmatmul.mubr.msk.bf16.vlgmr.msra.gmra.mrb[0].mxu1 %vm28_vm2, %v21_v16 }
   0x9   :  { %301 = vrot.lane.b32.xlu1 %v295_v12, %s643_s29  ;;  %583 = vmatmul.mubr.msk.bf16.vlgmr.msra.gmra.mrb[0].mxu0 %vm28_vm2, %v27_v15 }
   0xa   :  { %594 = vmatprep.mubr.msk.bf16.mxu0 %vm642_vm1, %v641_v3  ;;  %599 = vmatpush3.bf16.msra.mxu1 %v194_v17 }
   0xb   :  { %600 = vmatprep.mubr.msk.bf16.mxu1 %vm642_vm1, %v641_v3  ;;  %610 = vmatprep.subr.bf16.mxu1 %v641_v3 }
   0xc   :  { %354 = vrot.lane.b32.xlu0 %v126_v4, %s644_s8 }
   0xd   :  { %356 = vrot.lane.b32.xlu1 %v127_v11, %s644_s8 }
  0x10   :  { %416 = vrot.lane.b32.xlu0 %v411_v8, %s644_s8  ;;  %601 = vmatmul.mubr.msk.bf16.vlgmr.msra.gmra.mrb[4].mxu1 %vm28_vm2, %v189_v21 }
  0x11   :  { %418 = vrot.lane.b32.xlu1 %v412_v20, %s644_s8  ;;  %612 = vmatprep.mubr.msk.bf16.mxu1 %vm642_vm1, %v641_v3 }
  0x14   :  { %471 = vrot.lane.b32.xlu0 %v126_v4, %s645_s9 }
  0x15   :  { %473 = vrot.lane.b32.xlu1 %v127_v11, %s645_s9 }
  0x18   :  { %527 = vperm.xlu0 %640, %v524_v23  }
  0x76   :  { %v132_v24 = vpop.permute.xlu0 %131 }
  0x77   :  { %v300_v25 = vpop.permute.xlu1 %299 }
  0x7a   :  { %v134_v29 = vpop.permute.xlu0 %133 }
  0x7b   :  { %v302_v30 = vpop.permute.xlu1 %301  ;;  %v136_v32 = vsel %vm135_vm3, %v132_v24, %v134_v29 }
  0x7c   :  { %v303_v33 = vsel %vm135_vm3, %v300_v25, %v302_v30  ;;  %v141_v34 = vsel %vm32_vm0, %v136_v32, 0 }
  0x7d   :  { %v308_v36 = vsel %vm32_vm0, %v303_v33, 0  ;;  %593 = vmatpush3.bf16.msra.mxu0 %v141_v34 }
  0x7e   :  { %611 = vmatpush3.bf16.msra.mxu1 %v308_v36  ;;  %604 = vmatprep.subr.bf16.mxu0 %v641_v3  ;;  %v355_v40 = vpop.permute.xlu0 %354 }
  0x7f   :  { %v357_v39 = vpop.permute.xlu1 %356  ;;  %622 = vmatprep.subr.bf16.mxu1 %v641_v3 }
  0x80   :  { %595 = vmatmul.mubr.msk.bf16.vlgmr.msra.gmra.mrb[4].mxu0 %vm28_vm2, %v128_v35  ;;  %v359_v45 = vsel %vm358_vm4, %v355_v40, %v357_v39 }
  0x81   :  { %613 = vmatmul.mubr.msk.bf16.vlgmr.msra.gmra.mrb[8].mxu1 %vm28_vm2, %v296_v37  ;;  %605 = vmatpush3.bf16.msra.mxu0 %v247_v38  ;;  %v364_v50 = vsel %vm32_vm0, %v359_v45, 0  ;;  %v531_v38 = vld [vmem:[%s777_s3] sm:$0xff] }
  0x82   :  { %606 = vmatprep.mubr.msk.bf16.mxu0 %vm642_vm1, %v641_v3  ;;  %v417_v44 = vpop.permute.xlu0 %416  ;;  %616 = vmatprep.subr.bf16.mxu0 %v641_v3 }
  0x83   :  { %v419_v43 = vpop.permute.xlu1 %418  ;;  %624 = vmatprep.mubr.msk.bf16.mxu1 %vm642_vm1, %v641_v3 }
  0x84   :  { %v420_v46 = vsel %vm358_vm4, %v417_v44, %v419_v43 }
  0x85   :  { %v425_v48 = vsel %vm32_vm0, %v420_v46, 0 }
  0x86   :  { %623 = vmatpush3.bf16.msra.mxu1 %v425_v48  ;;  %v472_v52 = vpop.permute.xlu0 %471 }
  0x87   :  { %v474_v51 = vpop.permute.xlu1 %473 }
  0x88   :  { %607 = vmatmul.mubr.msk.bf16.vlgmr.msra.gmra.mrb[8].mxu0 %vm28_vm2, %v242_v47  ;;  %v476_v54 = vsel %vm475_vm5, %v472_v52, %v474_v51 }
  0x89   :  { %625 = vmatmul.mubr.msk.bf16.vlgmr.msra.gmra.mrb[12].mxu1 %vm28_vm2, %v413_v49  ;;  %617 = vmatpush3.bf16.msra.mxu0 %v364_v50  ;;  %v481_v56 = vsel %vm32_vm0, %v476_v54, 0 }
  0x8a   :  { %618 = vmatprep.mubr.msk.bf16.mxu0 %vm642_vm1, %v641_v3  ;;  %628 = vmatprep.subr.bf16.mxu0 %v641_v3 }
  0x90   :  { %619 = vmatmul.mubr.msk.bf16.vlgmr.msra.gmra.mrb[12].mxu0 %vm28_vm2, %v353_v55 }
  0x91   :  { %629 = vmatpush3.bf16.msra.mxu0 %v481_v56  ;;  %630 = vmatprep.mubr.msk.bf16.mxu0 %vm642_vm1, %v641_v3 }
  0x97   :  { %v528_v35 = vpop.permute.xlu0 %527 }
  0x98   :  { %631 = vmatmul.mubr.msk.bf16.vlgmr.msra.gmra.mrb[16].mxu0 %vm28_vm2, %v470_v58 }
  0xdb   :  { %v116_v60 = vpop.f32.mrb[0].mxu1 }
  0xdc   :  { %v70_v59 = vpop.f32.mrb[0].mxu0  ;;  %v590_v63 = vpop.f32.mrb[1].mxu1 }
  0xdd   :  { %v584_v61 = vpop.f32.mrb[1].mxu0  ;;  %v117_v62 = vadd.f32 %v116_v60, %v70_v59  ;;  %v119_v1 = vpop.f32.mrb[2].mxu1 }
  0xde   :  { %v73_v0 = vpop.f32.mrb[2].mxu0  ;;  %v591_v4 = vpop.f32.mrb[3].mxu1 }
  0xdf   :  { %v585_v2 = vpop.f32.mrb[3].mxu0 }
  0xe3   :  { %v230_v5 = vpop.f32.mrb[4].mxu1 }
  0xe4   :  { %v602_v6 = vpop.f32.mrb[5].mxu1 }
  0xe5   :  { %v233_v7 = vpop.f32.mrb[6].mxu1 }
  0xe6   :  { %v603_v3 = vpop.f32.mrb[7].mxu1 }
 0x153   :  { %v177_v8 = vpop.f32.mrb[4].mxu0 }
 0x154   :  { %v344_v9 = vpop.f32.mrb[8].mxu1  ;;  %v183_v10 = vadd.f32 %v177_v8, %v117_v62  ;;  %v596_v11 = vpop.f32.mrb[5].mxu0 }
 0x155   :  { %v614_v12 = vpop.f32.mrb[9].mxu1  ;;  %v180_v13 = vpop.f32.mrb[6].mxu0 }
 0x156   :  { %v347_v14 = vpop.f32.mrb[10].mxu1  ;;  %v236_v15 = vadd.f32 %v230_v5, %v183_v10  ;;  %v597_v16 = vpop.f32.mrb[7].mxu0 }
 0x157   :  { %v615_v17 = vpop.f32.mrb[11].mxu1 }
 0x15b   :  { %v283_v18 = vpop.f32.mrb[8].mxu0 }
 0x15c   :  { %v461_v19 = vpop.f32.mrb[12].mxu1  ;;  %v289_v20 = vadd.f32 %v283_v18, %v236_v15  ;;  %v608_v21 = vpop.f32.mrb[9].mxu0 }
 0x15d   :  { %v626_v22 = vpop.f32.mrb[13].mxu1  ;;  %v286_v23 = vpop.f32.mrb[10].mxu0 }
 0x15e   :  { %v464_v24 = vpop.f32.mrb[14].mxu1  ;;  %v350_v25 = vadd.f32 %v344_v9, %v289_v20  ;;  %v609_v26 = vpop.f32.mrb[11].mxu0 }
 0x15f   :  { %v627_v27 = vpop.f32.mrb[15].mxu1 }
 0x163   :  { %v400_v28 = vpop.f32.mrb[12].mxu0 }
 0x164   :  { %v406_v29 = vadd.f32 %v400_v28, %v350_v25  ;;  %v620_v30 = vpop.f32.mrb[13].mxu0 }
 0x165   :  { %v403_v31 = vpop.f32.mrb[14].mxu0 }
 0x166   :  { %v467_v32 = vadd.f32 %v461_v19, %v406_v29  ;;  %v621_v33 = vpop.f32.mrb[15].mxu0 }
 0x16b   :  { %v517_v34 = vpop.f32.mrb[16].mxu0 }
 0x16c   :  { %v523_v36 = vadd.f32 %v517_v34, %v467_v32  ;;  %v632_v37 = vpop.f32.mrb[17].mxu0 }
 0x16d   :  { %v520_v39 = vpop.f32.mrb[18].mxu0 }
 0x16e   :  { %v530_v40 = vadd.f32 %v528_v35, %v523_v36  ;;  %v633_v41 = vpop.f32.mrb[19].mxu0 }
 0x170   :  { %v532_v42 = vadd.f32 %v531_v38, %v530_v40 }
 0x172   :  { %533 = vst [vmem:[%s778_s4] sm:$0xff] %v532_v42 }

// kernel: usrm5_2_forward.16
= control target key start
LH: loop header
LB: loop body
LE: loop exit
PB: predicated region body
PF: predicated region fallthrough
CT: control target
= control target key end

     0   :  { %v636_v3 = vmov 0.0   ;;  %vm29_vm0 = vcmask 1043456   ;;  %vm637_vm1 = vmmov 0   ;;  %s638_s26 = smov 127   ;;  %vm25_vm2 = vcmask 64512   ;;  %s639_s4 = smov 125   ;;  %s761_s0 = inlined_call_operand.vmem [shape: f32[4,8,132], index: 0, kind: input, shape index: {}]   ;;  %s762_s1 = inlined_call_operand.vmem [shape: f32[9,8,8], index: 1, kind: input, shape index: {}]   ;;  %s763_s2 = inlined_call_operand.vmem [shape: f32[8,1], index: 2, kind: input, shape index: {}]   ;;  %s764_s3 = inlined_call_operand.vmem [shape: f32[8,128], index: 3, kind: output, shape index: {}]  }
   0x1   :  { %v119_v0 = vld [vmem:[%s761_s0] sm:$0xff]  ;;  %v120_v1 = vld [vmem:[%s761_s0 + $0x8] sm:$0xff]  ;;  %575 = vmatprep.subr.bf16.mxu0 %v636_v3  ;;  %581 = vmatprep.subr.bf16.mxu1 %v636_v3  ;;  %v551_v7 = vld [vmem:[%s761_s0 + $0x10] sm:$0xff]  ;;  %s640_s5 = smov 124   ;;  %v641_v22 = vmov 0   ;;  %vm132_vm3 = vcmask 1039360  }
   0x2   :  { %v545_v2 = vld [vmem:[%s761_s0 + $0x20] sm:$0xff]  ;;  %v123_v4 = vpack.c.bf16 %v119_v0, %v119_v0  ;;  %v546_v6 = vld [vmem:[%s761_s0 + $0x28] sm:$0xff]  ;;  %577 = vmatprep.mubr.msk.bf16.mxu0 %vm637_vm1, %v636_v3  ;;  %583 = vmatprep.mubr.msk.bf16.mxu1 %vm637_vm1, %v636_v3  ;;  %v408_v8 = vpack.c.bf16 %v551_v7, %v551_v7  ;;  %v124_v11 = vpack.c.bf16 %v120_v1, %v120_v1  ;;  %v552_v18 = vld [vmem:[%s761_s0 + $0x18] sm:$0xff]  ;;  %vm355_vm4 = vcmask 1022976  }
   0x3   :  { %v291_v5 = vpack.c.bf16 %v545_v2, %v545_v2  ;;  %v534_v9 = vld [vmem:[%s762_s1 + $0x8] sm:$0xff]  ;;  %v16_v10 = vld [vmem:[%s762_s1] sm:$0xff]  ;;  %v292_v12 = vpack.c.bf16 %v546_v6, %v546_v6  ;;  %v540_v19 = vld [vmem:[%s762_s1 + $0x18] sm:$0xff]  ;;  %v409_v20 = vpack.c.bf16 %v552_v18, %v552_v18  ;;  %635 = vset.pattern.permute.xlu0 %v641_v22  ;;  %vm472_vm5 = vcmask 1014784  }
   0x4   :  { %128 = vrot.lane.b32.xlu0 %v123_v4, %s638_s26  ;;  %v77_v13 = vsel %vm29_vm0, %v123_v4, 0  ;;  %v31_v14 = vsel %vm29_vm0, %v408_v8, 0  ;;  %v24_v15 = vpack.c.bf16 %v534_v9, %v534_v9  ;;  %v18_v16 = vpack.c.bf16 %v16_v10, %v16_v10  ;;  %v521_v23 = vld [vmem:[%s763_s2] sm:$0xff]  ;;  %v542_v26 = vld [vmem:[%s761_s0 + $0x30] sm:$0xff]  ;;  %v547_v28 = vld [vmem:[%s762_s1 + $0x28] sm:$0xff] }
   0x5   :  { %296 = vrot.lane.b32.xlu1 %v291_v5, %s638_s26  ;;  %582 = vmatpush3.bf16.msra.mxu1 %v77_v13  ;;  %v191_v17 = vsel %vm29_vm0, %v291_v5, 0  ;;  %v186_v21 = vpack.c.bf16 %v540_v19, %v540_v19  ;;  %v537_v27 = vld [vmem:[%s762_s1 + $0x10] sm:$0xff]  ;;  %v238_v31 = vpack.c.bf16 %v542_v26, %v542_v26  ;;  %v293_v37 = vpack.c.bf16 %v547_v28, %v547_v28  ;;  %v543_v41 = vld [vmem:[%s762_s1 + $0x20] sm:$0xff]  ;;  %v553_v42 = vld [vmem:[%s762_s1 + $0x38] sm:$0xff] }
   0x6   :  { %576 = vmatpush3.bf16.msra.mxu0 %v31_v14  ;;  %593 = vmatprep.subr.bf16.mxu1 %v636_v3  ;;  %v125_v35 = vpack.c.bf16 %v537_v27, %v537_v27  ;;  %v239_v47 = vpack.c.bf16 %v543_v41, %v543_v41  ;;  %v410_v49 = vpack.c.bf16 %v553_v42, %v553_v42  ;;  %v549_v53 = vld [vmem:[%s762_s1 + $0x30] sm:$0xff]  ;;  %v555_v57 = vld [vmem:[%s762_s1 + $0x40] sm:$0xff] }
   0x7   :  { %587 = vmatprep.subr.bf16.mxu0 %v636_v3  ;;  %v244_v38 = vsel %vm29_vm0, %v238_v31, 0  ;;  %v350_v55 = vpack.c.bf16 %v549_v53, %v549_v53  ;;  %v467_v58 = vpack.c.bf16 %v555_v57, %v555_v57 }
   0x8   :  { %130 = vrot.lane.b32.xlu0 %v124_v11, %s638_s26  ;;  %584 = vmatmul.mubr.msk.bf16.vlgmr.msra.gmra.mrb[0].mxu1 %vm25_vm2, %v18_v16 }
   0x9   :  { %298 = vrot.lane.b32.xlu1 %v292_v12, %s638_s26  ;;  %578 = vmatmul.mubr.msk.bf16.vlgmr.msra.gmra.mrb[0].mxu0 %vm25_vm2, %v24_v15 }
   0xa   :  { %589 = vmatprep.mubr.msk.bf16.mxu0 %vm637_vm1, %v636_v3  ;;  %594 = vmatpush3.bf16.msra.mxu1 %v191_v17 }
   0xb   :  { %595 = vmatprep.mubr.msk.bf16.mxu1 %vm637_vm1, %v636_v3  ;;  %605 = vmatprep.subr.bf16.mxu1 %v636_v3 }
   0xc   :  { %351 = vrot.lane.b32.xlu0 %v123_v4, %s639_s4 }
   0xd   :  { %353 = vrot.lane.b32.xlu1 %v124_v11, %s639_s4 }
  0x10   :  { %413 = vrot.lane.b32.xlu0 %v408_v8, %s639_s4  ;;  %596 = vmatmul.mubr.msk.bf16.vlgmr.msra.gmra.mrb[4].mxu1 %vm25_vm2, %v186_v21 }
  0x11   :  { %415 = vrot.lane.b32.xlu1 %v409_v20, %s639_s4  ;;  %607 = vmatprep.mubr.msk.bf16.mxu1 %vm637_vm1, %v636_v3 }
  0x14   :  { %468 = vrot.lane.b32.xlu0 %v123_v4, %s640_s5 }
  0x15   :  { %470 = vrot.lane.b32.xlu1 %v124_v11, %s640_s5 }
  0x18   :  { %524 = vperm.xlu0 %635, %v521_v23  }
  0x76   :  { %v129_v24 = vpop.permute.xlu0 %128 }
  0x77   :  { %v297_v25 = vpop.permute.xlu1 %296 }
  0x7a   :  { %v131_v29 = vpop.permute.xlu0 %130 }
  0x7b   :  { %v299_v30 = vpop.permute.xlu1 %298  ;;  %v133_v32 = vsel %vm132_vm3, %v129_v24, %v131_v29 }
  0x7c   :  { %v300_v33 = vsel %vm132_vm3, %v297_v25, %v299_v30  ;;  %v138_v34 = vsel %vm29_vm0, %v133_v32, 0 }
  0x7d   :  { %v305_v36 = vsel %vm29_vm0, %v300_v33, 0  ;;  %588 = vmatpush3.bf16.msra.mxu0 %v138_v34 }
  0x7e   :  { %606 = vmatpush3.bf16.msra.mxu1 %v305_v36  ;;  %599 = vmatprep.subr.bf16.mxu0 %v636_v3  ;;  %v352_v40 = vpop.permute.xlu0 %351 }
  0x7f   :  { %v354_v39 = vpop.permute.xlu1 %353  ;;  %617 = vmatprep.subr.bf16.mxu1 %v636_v3 }
  0x80   :  { %590 = vmatmul.mubr.msk.bf16.vlgmr.msra.gmra.mrb[4].mxu0 %vm25_vm2, %v125_v35  ;;  %v356_v45 = vsel %vm355_vm4, %v352_v40, %v354_v39 }
  0x81   :  { %608 = vmatmul.mubr.msk.bf16.vlgmr.msra.gmra.mrb[8].mxu1 %vm25_vm2, %v293_v37  ;;  %600 = vmatpush3.bf16.msra.mxu0 %v244_v38  ;;  %v361_v50 = vsel %vm29_vm0, %v356_v45, 0 }
  0x82   :  { %601 = vmatprep.mubr.msk.bf16.mxu0 %vm637_vm1, %v636_v3  ;;  %v414_v44 = vpop.permute.xlu0 %413  ;;  %611 = vmatprep.subr.bf16.mxu0 %v636_v3 }
  0x83   :  { %v416_v43 = vpop.permute.xlu1 %415  ;;  %619 = vmatprep.mubr.msk.bf16.mxu1 %vm637_vm1, %v636_v3 }
  0x84   :  { %v417_v46 = vsel %vm355_vm4, %v414_v44, %v416_v43 }
  0x85   :  { %v422_v48 = vsel %vm29_vm0, %v417_v46, 0 }
  0x86   :  { %618 = vmatpush3.bf16.msra.mxu1 %v422_v48  ;;  %v469_v52 = vpop.permute.xlu0 %468 }
  0x87   :  { %v471_v51 = vpop.permute.xlu1 %470 }
  0x88   :  { %602 = vmatmul.mubr.msk.bf16.vlgmr.msra.gmra.mrb[8].mxu0 %vm25_vm2, %v239_v47  ;;  %v473_v54 = vsel %vm472_vm5, %v469_v52, %v471_v51 }
  0x89   :  { %620 = vmatmul.mubr.msk.bf16.vlgmr.msra.gmra.mrb[12].mxu1 %vm25_vm2, %v410_v49  ;;  %612 = vmatpush3.bf16.msra.mxu0 %v361_v50  ;;  %v478_v56 = vsel %vm29_vm0, %v473_v54, 0 }
  0x8a   :  { %613 = vmatprep.mubr.msk.bf16.mxu0 %vm637_vm1, %v636_v3  ;;  %623 = vmatprep.subr.bf16.mxu0 %v636_v3 }
  0x90   :  { %614 = vmatmul.mubr.msk.bf16.vlgmr.msra.gmra.mrb[12].mxu0 %vm25_vm2, %v350_v55 }
  0x91   :  { %624 = vmatpush3.bf16.msra.mxu0 %v478_v56  ;;  %625 = vmatprep.mubr.msk.bf16.mxu0 %vm637_vm1, %v636_v3 }
  0x97   :  { %v525_v35 = vpop.permute.xlu0 %524 }
  0x98   :  { %626 = vmatmul.mubr.msk.bf16.vlgmr.msra.gmra.mrb[16].mxu0 %vm25_vm2, %v467_v58 }
  0xdb   :  { %v113_v60 = vpop.f32.mrb[0].mxu1 }
  0xdc   :  { %v67_v59 = vpop.f32.mrb[0].mxu0  ;;  %v585_v63 = vpop.f32.mrb[1].mxu1 }
  0xdd   :  { %v579_v61 = vpop.f32.mrb[1].mxu0  ;;  %v114_v62 = vadd.f32 %v113_v60, %v67_v59  ;;  %v116_v1 = vpop.f32.mrb[2].mxu1 }
  0xde   :  { %v70_v0 = vpop.f32.mrb[2].mxu0  ;;  %v586_v4 = vpop.f32.mrb[3].mxu1 }
  0xdf   :  { %v580_v2 = vpop.f32.mrb[3].mxu0 }
  0xe3   :  { %v227_v5 = vpop.f32.mrb[4].mxu1 }
  0xe4   :  { %v597_v6 = vpop.f32.mrb[5].mxu1 }
  0xe5   :  { %v230_v7 = vpop.f32.mrb[6].mxu1 }
  0xe6   :  { %v598_v3 = vpop.f32.mrb[7].mxu1 }
 0x153   :  { %v174_v8 = vpop.f32.mrb[4].mxu0 }
 0x154   :  { %v341_v9 = vpop.f32.mrb[8].mxu1  ;;  %v180_v10 = vadd.f32 %v174_v8, %v114_v62  ;;  %v591_v11 = vpop.f32.mrb[5].mxu0 }
 0x155   :  { %v609_v12 = vpop.f32.mrb[9].mxu1  ;;  %v177_v13 = vpop.f32.mrb[6].mxu0 }
 0x156   :  { %v344_v14 = vpop.f32.mrb[10].mxu1  ;;  %v233_v15 = vadd.f32 %v227_v5, %v180_v10  ;;  %v592_v16 = vpop.f32.mrb[7].mxu0 }
 0x157   :  { %v610_v17 = vpop.f32.mrb[11].mxu1 }
 0x15b   :  { %v280_v18 = vpop.f32.mrb[8].mxu0 }
 0x15c   :  { %v458_v19 = vpop.f32.mrb[12].mxu1  ;;  %v286_v20 = vadd.f32 %v280_v18, %v233_v15  ;;  %v603_v21 = vpop.f32.mrb[9].mxu0 }
 0x15d   :  { %v621_v22 = vpop.f32.mrb[13].mxu1  ;;  %v283_v23 = vpop.f32.mrb[10].mxu0 }
 0x15e   :  { %v461_v24 = vpop.f32.mrb[14].mxu1  ;;  %v347_v25 = vadd.f32 %v341_v9, %v286_v20  ;;  %v604_v26 = vpop.f32.mrb[11].mxu0 }
 0x15f   :  { %v622_v27 = vpop.f32.mrb[15].mxu1 }
 0x163   :  { %v397_v28 = vpop.f32.mrb[12].mxu0 }
 0x164   :  { %v403_v29 = vadd.f32 %v397_v28, %v347_v25  ;;  %v615_v30 = vpop.f32.mrb[13].mxu0 }
 0x165   :  { %v400_v31 = vpop.f32.mrb[14].mxu0 }
 0x166   :  { %v464_v32 = vadd.f32 %v458_v19, %v403_v29  ;;  %v616_v33 = vpop.f32.mrb[15].mxu0 }
 0x16b   :  { %v514_v34 = vpop.f32.mrb[16].mxu0 }
 0x16c   :  { %v520_v36 = vadd.f32 %v514_v34, %v464_v32  ;;  %v627_v37 = vpop.f32.mrb[17].mxu0 }
 0x16d   :  { %v517_v38 = vpop.f32.mrb[18].mxu0 }
 0x16e   :  { %v527_v39 = vadd.f32 %v525_v35, %v520_v36  ;;  %v628_v40 = vpop.f32.mrb[19].mxu0 }
 0x170   :  { %528 = vst [vmem:[%s764_s3] sm:$0xff] %v527_v39 }

// kernel: usrm5_2_forward.15
= control target key start
LH: loop header
LB: loop body
LE: loop exit
PB: predicated region body
PF: predicated region fallthrough
CT: control target
= control target key end

     0   :  { %vm39_vm0 = vcmask 1043456   ;;  %v636_v2 = vmov 0.0   ;;  %vm637_vm1 = vmmov 0   ;;  %s638_s21 = smov 124   ;;  %vm35_vm2 = vcmask 64512   ;;  %s640_s22 = smov 112   ;;  %s759_s0 = inlined_call_operand.vmem [shape: f32[1,8,164], index: 0, kind: input, shape index: {}]   ;;  %s760_s1 = inlined_call_operand.vmem [shape: f32[9,8,8], index: 1, kind: input, shape index: {}]   ;;  %s761_s2 = inlined_call_operand.vmem [shape: f32[8,1], index: 2, kind: input, shape index: {}]   ;;  %s762_s3 = inlined_call_operand.vmem [shape: f32[8,128], index: 3, kind: input, shape index: {}]   ;;  %s763_s4 = inlined_call_operand.vmem [shape: f32[8,128], index: 4, kind: output, shape index: {}]  }
   0x1   :  { %v18_v0 = vld [vmem:[%s759_s0] sm:$0xff]  ;;  %v22_v1 = vld [vmem:[%s759_s0 + $0x8] sm:$0xff]  ;;  %570 = vmatprep.subr.bf16.mxu0 %v636_v2  ;;  %576 = vmatprep.subr.bf16.mxu1 %v636_v2  ;;  %s639_s0 = smov 126   ;;  %s641_s23 = smov 110   ;;  %v646_v8 = vmov 0   ;;  %vm136_vm3 = vcmask 1014784  }
   0x2   :  { %v20_v3 = vpack.c.bf16 %v18_v0, %v18_v0  ;;  %572 = vmatprep.mubr.msk.bf16.mxu0 %vm637_vm1, %v636_v2  ;;  %578 = vmatprep.mubr.msk.bf16.mxu1 %vm637_vm1, %v636_v2  ;;  %v19_v4 = vld [vmem:[%s760_s1] sm:$0xff]  ;;  %v25_v5 = vpack.c.bf16 %v22_v1, %v22_v1  ;;  %s642_s24 = smov 108   ;;  %s643_s25 = smov 96   ;;  %vm33_vm4 = vcmask 1031168   ;;  %v535_v12 = vld [vmem:[%s760_s1 + $0x8] sm:$0xff]  ;;  %vm192_vm5 = vcmask 916480  }
   0x3   :  { %v21_v7 = vpack.c.bf16 %v19_v4, %v19_v4  ;;  %s644_s26 = smov 94   ;;  %s645_s27 = smov 92   ;;  %635 = vset.pattern.permute.xlu0 %v646_v8  ;;  %v521_v9 = vld [vmem:[%s761_s2] sm:$0xff]  ;;  %v26_v18 = vpack.c.bf16 %v535_v12, %v535_v12  ;;  %v540_v19 = vld [vmem:[%s760_s1 + $0x18] sm:$0xff]  ;;  %vm248_vm6 = vcmask 900096   ;;  %v538_v26 = vld [vmem:[%s760_s1 + $0x10] sm:$0xff] }
   0x4   :  { %132 = vrot.lane.b32.xlu1 %v20_v3, %s638_s21  ;;  %29 = vrot.lane.b32.xlu0 %v20_v3, %s639_s0  ;;  %v87_v6 = vsel %vm39_vm0, %v20_v3, 0  ;;  %v187_v25 = vpack.c.bf16 %v540_v19, %v540_v19  ;;  %v131_v30 = vpack.c.bf16 %v538_v26, %v538_v26  ;;  %vm304_vm7 = vcmask 883712   ;;  %v544_v31 = vld [vmem:[%s760_s1 + $0x28] sm:$0xff]  ;;  %v542_v38 = vld [vmem:[%s760_s1 + $0x20] sm:$0xff] }
   0x5   :  { %577 = vmatpush3.bf16.msra.mxu1 %v87_v6  ;;  %vm360_vm8 = vcmask 785408   ;;  %v299_v37 = vpack.c.bf16 %v544_v31, %v544_v31  ;;  %v243_v42 = vpack.c.bf16 %v542_v38, %v542_v38  ;;  %vm416_vm9 = vcmask 769024   ;;  %v548_v43 = vld [vmem:[%s760_s1 + $0x38] sm:$0xff]  ;;  %v546_v50 = vld [vmem:[%s760_s1 + $0x30] sm:$0xff]  ;;  %v550_v56 = vld [vmem:[%s760_s1 + $0x40] sm:$0xff] }
   0x6   :  { %588 = vmatprep.subr.bf16.mxu1 %v636_v2  ;;  %vm472_vm10 = vcmask 752640   ;;  %v411_v49 = vpack.c.bf16 %v548_v43, %v548_v43  ;;  %v355_v54 = vpack.c.bf16 %v546_v50, %v546_v50  ;;  %v467_v57 = vpack.c.bf16 %v550_v56, %v550_v56  ;;  %v528_v38 = vld [vmem:[%s762_s3] sm:$0xff] }
   0x8   :  { %134 = vrot.lane.b32.xlu1 %v25_v5, %s638_s21  ;;  %31 = vrot.lane.b32.xlu0 %v25_v5, %s639_s0 }
   0x9   :  { %579 = vmatmul.mubr.msk.bf16.vlgmr.msra.gmra.mrb[0].mxu1 %vm35_vm2, %v21_v7 }
   0xa   :  { %590 = vmatprep.mubr.msk.bf16.mxu1 %vm637_vm1, %v636_v2 }
   0xc   :  { %190 = vrot.lane.b32.xlu1 %v25_v5, %s640_s22  ;;  %188 = vrot.lane.b32.xlu0 %v20_v3, %s640_s22 }
  0x10   :  { %246 = vrot.lane.b32.xlu1 %v25_v5, %s641_s23  ;;  %244 = vrot.lane.b32.xlu0 %v20_v3, %s641_s23 }
  0x14   :  { %302 = vrot.lane.b32.xlu1 %v25_v5, %s642_s24  ;;  %300 = vrot.lane.b32.xlu0 %v20_v3, %s642_s24 }
  0x18   :  { %358 = vrot.lane.b32.xlu1 %v25_v5, %s643_s25  ;;  %356 = vrot.lane.b32.xlu0 %v20_v3, %s643_s25 }
  0x1c   :  { %414 = vrot.lane.b32.xlu1 %v25_v5, %s644_s26  ;;  %412 = vrot.lane.b32.xlu0 %v20_v3, %s644_s26 }
  0x20   :  { %470 = vrot.lane.b32.xlu1 %v25_v5, %s645_s27  ;;  %468 = vrot.lane.b32.xlu0 %v20_v3, %s645_s27 }
  0x24   :  { %524 = vperm.xlu0 %635, %v521_v9  }
  0x76   :  { %v133_v10 = vpop.permute.xlu1 %132  ;;  %v30_v11 = vpop.permute.xlu0 %29 }
  0x7a   :  { %v135_v13 = vpop.permute.xlu1 %134  ;;  %v32_v14 = vpop.permute.xlu0 %31 }
  0x7b   :  { %v137_v15 = vsel %vm136_vm3, %v133_v10, %v135_v13  ;;  %v34_v16 = vsel %vm33_vm4, %v30_v11, %v32_v14 }
  0x7c   :  { %v41_v17 = vsel %vm39_vm0, %v34_v16, 0  ;;  %v142_v20 = vsel %vm39_vm0, %v137_v15, 0 }
  0x7d   :  { %571 = vmatpush3.bf16.msra.mxu0 %v41_v17 }
  0x7e   :  { %582 = vmatprep.subr.bf16.mxu0 %v636_v2  ;;  %v191_v21 = vpop.permute.xlu1 %190  ;;  %v189_v22 = vpop.permute.xlu0 %188 }
  0x7f   :  { %v193_v23 = vsel %vm192_vm5, %v189_v22, %v191_v21 }
  0x80   :  { %573 = vmatmul.mubr.msk.bf16.vlgmr.msra.gmra.mrb[0].mxu0 %vm35_vm2, %v26_v18  ;;  %v198_v24 = vsel %vm39_vm0, %v193_v23, 0 }
  0x81   :  { %583 = vmatpush3.bf16.msra.mxu0 %v142_v20  ;;  %589 = vmatpush3.bf16.msra.mxu1 %v198_v24 }
  0x82   :  { %v247_v27 = vpop.permute.xlu1 %246  ;;  %v245_v28 = vpop.permute.xlu0 %244  ;;  %584 = vmatprep.mubr.msk.bf16.mxu0 %vm637_vm1, %v636_v2  ;;  %594 = vmatprep.subr.bf16.mxu0 %v636_v2 }
  0x83   :  { %v249_v29 = vsel %vm248_vm6, %v245_v28, %v247_v27  ;;  %600 = vmatprep.subr.bf16.mxu1 %v636_v2 }
  0x84   :  { %591 = vmatmul.mubr.msk.bf16.vlgmr.msra.gmra.mrb[4].mxu1 %vm35_vm2, %v187_v25  ;;  %v254_v32 = vsel %vm39_vm0, %v249_v29, 0 }
  0x85   :  { %602 = vmatprep.mubr.msk.bf16.mxu1 %vm637_vm1, %v636_v2 }
  0x86   :  { %v303_v33 = vpop.permute.xlu1 %302  ;;  %v301_v34 = vpop.permute.xlu0 %300 }
  0x87   :  { %v305_v35 = vsel %vm304_vm7, %v301_v34, %v303_v33 }
  0x88   :  { %585 = vmatmul.mubr.msk.bf16.vlgmr.msra.gmra.mrb[4].mxu0 %vm35_vm2, %v131_v30  ;;  %v310_v36 = vsel %vm39_vm0, %v305_v35, 0 }
  0x89   :  { %595 = vmatpush3.bf16.msra.mxu0 %v254_v32  ;;  %601 = vmatpush3.bf16.msra.mxu1 %v310_v36 }
  0x8a   :  { %v359_v39 = vpop.permute.xlu1 %358  ;;  %v357_v40 = vpop.permute.xlu0 %356  ;;  %596 = vmatprep.mubr.msk.bf16.mxu0 %vm637_vm1, %v636_v2  ;;  %606 = vmatprep.subr.bf16.mxu0 %v636_v2 }
  0x8b   :  { %v361_v41 = vsel %vm360_vm8, %v357_v40, %v359_v39  ;;  %612 = vmatprep.subr.bf16.mxu1 %v636_v2 }
  0x8c   :  { %603 = vmatmul.mubr.msk.bf16.vlgmr.msra.gmra.mrb[8].mxu1 %vm35_vm2, %v299_v37  ;;  %v366_v44 = vsel %vm39_vm0, %v361_v41, 0 }
  0x8d   :  { %614 = vmatprep.mubr.msk.bf16.mxu1 %vm637_vm1, %v636_v2 }
  0x8e   :  { %v415_v45 = vpop.permute.xlu1 %414  ;;  %v413_v46 = vpop.permute.xlu0 %412 }
  0x8f   :  { %v417_v47 = vsel %vm416_vm9, %v413_v46, %v415_v45 }
  0x90   :  { %597 = vmatmul.mubr.msk.bf16.vlgmr.msra.gmra.mrb[8].mxu0 %vm35_vm2, %v243_v42  ;;  %v422_v48 = vsel %vm39_vm0, %v417_v47, 0 }
  0x91   :  { %607 = vmatpush3.bf16.msra.mxu0 %v366_v44  ;;  %613 = vmatpush3.bf16.msra.mxu1 %v422_v48 }
  0x92   :  { %v471_v51 = vpop.permute.xlu1 %470  ;;  %v469_v52 = vpop.permute.xlu0 %468  ;;  %608 = vmatprep.mubr.msk.bf16.mxu0 %vm637_vm1, %v636_v2  ;;  %618 = vmatprep.subr.bf16.mxu0 %v636_v2 }
  0x93   :  { %v473_v53 = vsel %vm472_vm10, %v469_v52, %v471_v51 }
  0x94   :  { %615 = vmatmul.mubr.msk.bf16.vlgmr.msra.gmra.mrb[12].mxu1 %vm35_vm2, %v411_v49  ;;  %v478_v55 = vsel %vm39_vm0, %v473_v53, 0 }
  0x98   :  { %609 = vmatmul.mubr.msk.bf16.vlgmr.msra.gmra.mrb[12].mxu0 %vm35_vm2, %v355_v54 }
  0x99   :  { %619 = vmatpush3.bf16.msra.mxu0 %v478_v55  ;;  %620 = vmatprep.mubr.msk.bf16.mxu0 %vm637_vm1, %v636_v2 }
  0xa0   :  { %621 = vmatmul.mubr.msk.bf16.vlgmr.msra.gmra.mrb[16].mxu0 %vm35_vm2, %v467_v57 }
  0xa3   :  { %v525_v34 = vpop.permute.xlu0 %524 }
  0xdc   :  { %v123_v58 = vpop.f32.mrb[0].mxu1 }
  0xdd   :  { %v580_v59 = vpop.f32.mrb[1].mxu1 }
  0xde   :  { %v126_v60 = vpop.f32.mrb[2].mxu1 }
  0xdf   :  { %v581_v61 = vpop.f32.mrb[3].mxu1 }
 0x153   :  { %v77_v62 = vpop.f32.mrb[0].mxu0 }
 0x154   :  { %v574_v63 = vpop.f32.mrb[1].mxu0  ;;  %v124_v0 = vadd.f32 %v123_v58, %v77_v62 }
 0x155   :  { %v80_v1 = vpop.f32.mrb[2].mxu0 }
 0x156   :  { %v575_v3 = vpop.f32.mrb[3].mxu0 }
 0x157   :  { %v234_v4 = vpop.f32.mrb[4].mxu1 }
 0x158   :  { %v592_v5 = vpop.f32.mrb[5].mxu1 }
 0x159   :  { %v237_v6 = vpop.f32.mrb[6].mxu1 }
 0x15a   :  { %v593_v2 = vpop.f32.mrb[7].mxu1 }
 0x15b   :  { %v178_v7 = vpop.f32.mrb[4].mxu0 }
 0x15c   :  { %v184_v8 = vadd.f32 %v178_v7, %v124_v0  ;;  %v586_v9 = vpop.f32.mrb[5].mxu0 }
 0x15d   :  { %v181_v10 = vpop.f32.mrb[6].mxu0 }
 0x15e   :  { %v240_v11 = vadd.f32 %v234_v4, %v184_v8  ;;  %v587_v12 = vpop.f32.mrb[7].mxu0 }
 0x15f   :  { %v346_v13 = vpop.f32.mrb[8].mxu1 }
 0x160   :  { %v604_v14 = vpop.f32.mrb[9].mxu1 }
 0x161   :  { %v349_v15 = vpop.f32.mrb[10].mxu1 }
 0x162   :  { %v605_v16 = vpop.f32.mrb[11].mxu1 }
 0x163   :  { %v290_v17 = vpop.f32.mrb[8].mxu0 }
 0x164   :  { %v296_v18 = vadd.f32 %v290_v17, %v240_v11  ;;  %v598_v19 = vpop.f32.mrb[9].mxu0 }
 0x165   :  { %v293_v20 = vpop.f32.mrb[10].mxu0 }
 0x166   :  { %v352_v21 = vadd.f32 %v346_v13, %v296_v18  ;;  %v599_v22 = vpop.f32.mrb[11].mxu0 }
 0x167   :  { %v458_v23 = vpop.f32.mrb[12].mxu1 }
 0x168   :  { %v616_v24 = vpop.f32.mrb[13].mxu1 }
 0x169   :  { %v461_v25 = vpop.f32.mrb[14].mxu1 }
 0x16a   :  { %v617_v26 = vpop.f32.mrb[15].mxu1 }
 0x16b   :  { %v402_v27 = vpop.f32.mrb[12].mxu0 }
 0x16c   :  { %v408_v28 = vadd.f32 %v402_v27, %v352_v21  ;;  %v610_v29 = vpop.f32.mrb[13].mxu0 }
 0x16d   :  { %v405_v30 = vpop.f32.mrb[14].mxu0 }
 0x16e   :  { %v464_v31 = vadd.f32 %v458_v23, %v408_v28  ;;  %v611_v32 = vpop.f32.mrb[15].mxu0 }
 0x173   :  { %v514_v33 = vpop.f32.mrb[16].mxu0 }
 0x174   :  { %v520_v35 = vadd.f32 %v514_v33, %v464_v31  ;;  %v622_v36 = vpop.f32.mrb[17].mxu0 }
 0x175   :  { %v517_v37 = vpop.f32.mrb[18].mxu0 }
 0x176   :  { %v527_v39 = vadd.f32 %v525_v34, %v520_v35  ;;  %v623_v40 = vpop.f32.mrb[19].mxu0 }
 0x178   :  { %v529_v41 = vadd.f32 %v528_v38, %v527_v39 }
 0x17a   :  { %530 = vst [vmem:[%s763_s4] sm:$0xff] %v529_v41 }

// kernel: usrm5_2_forward.17
= control target key start
LH: loop header
LB: loop body
LE: loop exit
PB: predicated region body
PF: predicated region fallthrough
CT: control target
= control target key end

     0   :  { %vm36_vm0 = vcmask 1043456   ;;  %v631_v2 = vmov 0.0   ;;  %vm632_vm1 = vmmov 0   ;;  %s633_s18 = smov 124   ;;  %vm32_vm2 = vcmask 64512   ;;  %s635_s19 = smov 116   ;;  %s746_s0 = inlined_call_operand.vmem [shape: f32[1,8,156], index: 0, kind: input, shape index: {}]   ;;  %s747_s1 = inlined_call_operand.vmem [shape: f32[9,8,8], index: 1, kind: input, shape index: {}]   ;;  %s748_s2 = inlined_call_operand.vmem [shape: f32[8,1], index: 2, kind: input, shape index: {}]   ;;  %s749_s3 = inlined_call_operand.vmem [shape: f32[8,128], index: 3, kind: output, shape index: {}]  }
   0x1   :  { %v15_v0 = vld [vmem:[%s746_s0] sm:$0xff]  ;;  %v19_v1 = vld [vmem:[%s746_s0 + $0x8] sm:$0xff]  ;;  %565 = vmatprep.subr.bf16.mxu0 %v631_v2  ;;  %571 = vmatprep.subr.bf16.mxu1 %v631_v2  ;;  %s634_s0 = smov 126   ;;  %s636_s20 = smov 114   ;;  %v641_v8 = vmov 0   ;;  %vm133_vm3 = vcmask 1014784  }
   0x2   :  { %v17_v3 = vpack.c.bf16 %v15_v0, %v15_v0  ;;  %567 = vmatprep.mubr.msk.bf16.mxu0 %vm632_vm1, %v631_v2  ;;  %573 = vmatprep.mubr.msk.bf16.mxu1 %vm632_vm1, %v631_v2  ;;  %v16_v4 = vld [vmem:[%s747_s1] sm:$0xff]  ;;  %v22_v5 = vpack.c.bf16 %v19_v1, %v19_v1  ;;  %s637_s21 = smov 112   ;;  %s638_s22 = smov 104   ;;  %vm30_vm4 = vcmask 1031168   ;;  %v530_v12 = vld [vmem:[%s747_s1 + $0x8] sm:$0xff]  ;;  %vm189_vm5 = vcmask 949248  }
   0x3   :  { %v18_v7 = vpack.c.bf16 %v16_v4, %v16_v4  ;;  %s639_s23 = smov 102   ;;  %s640_s24 = smov 100   ;;  %630 = vset.pattern.permute.xlu0 %v641_v8  ;;  %v518_v9 = vld [vmem:[%s748_s2] sm:$0xff]  ;;  %v23_v18 = vpack.c.bf16 %v530_v12, %v530_v12  ;;  %v535_v19 = vld [vmem:[%s747_s1 + $0x18] sm:$0xff]  ;;  %vm245_vm6 = vcmask 932864   ;;  %v533_v26 = vld [vmem:[%s747_s1 + $0x10] sm:$0xff] }
   0x4   :  { %129 = vrot.lane.b32.xlu1 %v17_v3, %s633_s18  ;;  %26 = vrot.lane.b32.xlu0 %v17_v3, %s634_s0  ;;  %v84_v6 = vsel %vm36_vm0, %v17_v3, 0  ;;  %v184_v25 = vpack.c.bf16 %v535_v19, %v535_v19  ;;  %v128_v30 = vpack.c.bf16 %v533_v26, %v533_v26  ;;  %vm301_vm7 = vcmask 916480   ;;  %v539_v31 = vld [vmem:[%s747_s1 + $0x28] sm:$0xff]  ;;  %v537_v38 = vld [vmem:[%s747_s1 + $0x20] sm:$0xff] }
   0x5   :  { %572 = vmatpush3.bf16.msra.mxu1 %v84_v6  ;;  %vm357_vm8 = vcmask 850944   ;;  %v296_v37 = vpack.c.bf16 %v539_v31, %v539_v31  ;;  %v240_v42 = vpack.c.bf16 %v537_v38, %v537_v38  ;;  %vm413_vm9 = vcmask 834560   ;;  %v543_v43 = vld [vmem:[%s747_s1 + $0x38] sm:$0xff]  ;;  %v541_v50 = vld [vmem:[%s747_s1 + $0x30] sm:$0xff]  ;;  %v545_v56 = vld [vmem:[%s747_s1 + $0x40] sm:$0xff] }
   0x6   :  { %583 = vmatprep.subr.bf16.mxu1 %v631_v2  ;;  %vm469_vm10 = vcmask 818176   ;;  %v408_v49 = vpack.c.bf16 %v543_v43, %v543_v43  ;;  %v352_v54 = vpack.c.bf16 %v541_v50, %v541_v50  ;;  %v464_v57 = vpack.c.bf16 %v545_v56, %v545_v56 }
   0x8   :  { %131 = vrot.lane.b32.xlu1 %v22_v5, %s633_s18  ;;  %28 = vrot.lane.b32.xlu0 %v22_v5, %s634_s0 }
   0x9   :  { %574 = vmatmul.mubr.msk.bf16.vlgmr.msra.gmra.mrb[0].mxu1 %vm32_vm2, %v18_v7 }
   0xa   :  { %585 = vmatprep.mubr.msk.bf16.mxu1 %vm632_vm1, %v631_v2 }
   0xc   :  { %187 = vrot.lane.b32.xlu1 %v22_v5, %s635_s19  ;;  %185 = vrot.lane.b32.xlu0 %v17_v3, %s635_s19 }
  0x10   :  { %243 = vrot.lane.b32.xlu1 %v22_v5, %s636_s20  ;;  %241 = vrot.lane.b32.xlu0 %v17_v3, %s636_s20 }
  0x14   :  { %299 = vrot.lane.b32.xlu1 %v22_v5, %s637_s21  ;;  %297 = vrot.lane.b32.xlu0 %v17_v3, %s637_s21 }
  0x18   :  { %355 = vrot.lane.b32.xlu1 %v22_v5, %s638_s22  ;;  %353 = vrot.lane.b32.xlu0 %v17_v3, %s638_s22 }
  0x1c   :  { %411 = vrot.lane.b32.xlu1 %v22_v5, %s639_s23  ;;  %409 = vrot.lane.b32.xlu0 %v17_v3, %s639_s23 }
  0x20   :  { %467 = vrot.lane.b32.xlu1 %v22_v5, %s640_s24  ;;  %465 = vrot.lane.b32.xlu0 %v17_v3, %s640_s24 }
  0x24   :  { %521 = vperm.xlu0 %630, %v518_v9  }
  0x76   :  { %v130_v10 = vpop.permute.xlu1 %129  ;;  %v27_v11 = vpop.permute.xlu0 %26 }
  0x7a   :  { %v132_v13 = vpop.permute.xlu1 %131  ;;  %v29_v14 = vpop.permute.xlu0 %28 }
  0x7b   :  { %v134_v15 = vsel %vm133_vm3, %v130_v10, %v132_v13  ;;  %v31_v16 = vsel %vm30_vm4, %v27_v11, %v29_v14 }
  0x7c   :  { %v38_v17 = vsel %vm36_vm0, %v31_v16, 0  ;;  %v139_v20 = vsel %vm36_vm0, %v134_v15, 0 }
  0x7d   :  { %566 = vmatpush3.bf16.msra.mxu0 %v38_v17 }
  0x7e   :  { %577 = vmatprep.subr.bf16.mxu0 %v631_v2  ;;  %v188_v21 = vpop.permute.xlu1 %187  ;;  %v186_v22 = vpop.permute.xlu0 %185 }
  0x7f   :  { %v190_v23 = vsel %vm189_vm5, %v186_v22, %v188_v21 }
  0x80   :  { %568 = vmatmul.mubr.msk.bf16.vlgmr.msra.gmra.mrb[0].mxu0 %vm32_vm2, %v23_v18  ;;  %v195_v24 = vsel %vm36_vm0, %v190_v23, 0 }
  0x81   :  { %578 = vmatpush3.bf16.msra.mxu0 %v139_v20  ;;  %584 = vmatpush3.bf16.msra.mxu1 %v195_v24 }
  0x82   :  { %v244_v27 = vpop.permute.xlu1 %243  ;;  %v242_v28 = vpop.permute.xlu0 %241  ;;  %579 = vmatprep.mubr.msk.bf16.mxu0 %vm632_vm1, %v631_v2  ;;  %589 = vmatprep.subr.bf16.mxu0 %v631_v2 }
  0x83   :  { %v246_v29 = vsel %vm245_vm6, %v242_v28, %v244_v27  ;;  %595 = vmatprep.subr.bf16.mxu1 %v631_v2 }
  0x84   :  { %586 = vmatmul.mubr.msk.bf16.vlgmr.msra.gmra.mrb[4].mxu1 %vm32_vm2, %v184_v25  ;;  %v251_v32 = vsel %vm36_vm0, %v246_v29, 0 }
  0x85   :  { %597 = vmatprep.mubr.msk.bf16.mxu1 %vm632_vm1, %v631_v2 }
  0x86   :  { %v300_v33 = vpop.permute.xlu1 %299  ;;  %v298_v34 = vpop.permute.xlu0 %297 }
  0x87   :  { %v302_v35 = vsel %vm301_vm7, %v298_v34, %v300_v33 }
  0x88   :  { %580 = vmatmul.mubr.msk.bf16.vlgmr.msra.gmra.mrb[4].mxu0 %vm32_vm2, %v128_v30  ;;  %v307_v36 = vsel %vm36_vm0, %v302_v35, 0 }
  0x89   :  { %590 = vmatpush3.bf16.msra.mxu0 %v251_v32  ;;  %596 = vmatpush3.bf16.msra.mxu1 %v307_v36 }
  0x8a   :  { %v356_v39 = vpop.permute.xlu1 %355  ;;  %v354_v40 = vpop.permute.xlu0 %353  ;;  %591 = vmatprep.mubr.msk.bf16.mxu0 %vm632_vm1, %v631_v2  ;;  %601 = vmatprep.subr.bf16.mxu0 %v631_v2 }
  0x8b   :  { %v358_v41 = vsel %vm357_vm8, %v354_v40, %v356_v39  ;;  %607 = vmatprep.subr.bf16.mxu1 %v631_v2 }
  0x8c   :  { %598 = vmatmul.mubr.msk.bf16.vlgmr.msra.gmra.mrb[8].mxu1 %vm32_vm2, %v296_v37  ;;  %v363_v44 = vsel %vm36_vm0, %v358_v41, 0 }
  0x8d   :  { %609 = vmatprep.mubr.msk.bf16.mxu1 %vm632_vm1, %v631_v2 }
  0x8e   :  { %v412_v45 = vpop.permute.xlu1 %411  ;;  %v410_v46 = vpop.permute.xlu0 %409 }
  0x8f   :  { %v414_v47 = vsel %vm413_vm9, %v410_v46, %v412_v45 }
  0x90   :  { %592 = vmatmul.mubr.msk.bf16.vlgmr.msra.gmra.mrb[8].mxu0 %vm32_vm2, %v240_v42  ;;  %v419_v48 = vsel %vm36_vm0, %v414_v47, 0 }
  0x91   :  { %602 = vmatpush3.bf16.msra.mxu0 %v363_v44  ;;  %608 = vmatpush3.bf16.msra.mxu1 %v419_v48 }
  0x92   :  { %v468_v51 = vpop.permute.xlu1 %467  ;;  %v466_v52 = vpop.permute.xlu0 %465  ;;  %603 = vmatprep.mubr.msk.bf16.mxu0 %vm632_vm1, %v631_v2  ;;  %613 = vmatprep.subr.bf16.mxu0 %v631_v2 }
  0x93   :  { %v470_v53 = vsel %vm469_vm10, %v466_v52, %v468_v51 }
  0x94   :  { %610 = vmatmul.mubr.msk.bf16.vlgmr.msra.gmra.mrb[12].mxu1 %vm32_vm2, %v408_v49  ;;  %v475_v55 = vsel %vm36_vm0, %v470_v53, 0 }
  0x98   :  { %604 = vmatmul.mubr.msk.bf16.vlgmr.msra.gmra.mrb[12].mxu0 %vm32_vm2, %v352_v54 }
  0x99   :  { %614 = vmatpush3.bf16.msra.mxu0 %v475_v55  ;;  %615 = vmatprep.mubr.msk.bf16.mxu0 %vm632_vm1, %v631_v2 }
  0xa0   :  { %616 = vmatmul.mubr.msk.bf16.vlgmr.msra.gmra.mrb[16].mxu0 %vm32_vm2, %v464_v57 }
  0xa3   :  { %v522_v34 = vpop.permute.xlu0 %521 }
  0xdc   :  { %v120_v58 = vpop.f32.mrb[0].mxu1 }
  0xdd   :  { %v575_v59 = vpop.f32.mrb[1].mxu1 }
  0xde   :  { %v123_v60 = vpop.f32.mrb[2].mxu1 }
  0xdf   :  { %v576_v61 = vpop.f32.mrb[3].mxu1 }
 0x153   :  { %v74_v62 = vpop.f32.mrb[0].mxu0 }
 0x154   :  { %v569_v63 = vpop.f32.mrb[1].mxu0  ;;  %v121_v0 = vadd.f32 %v120_v58, %v74_v62 }
 0x155   :  { %v77_v1 = vpop.f32.mrb[2].mxu0 }
 0x156   :  { %v570_v3 = vpop.f32.mrb[3].mxu0 }
 0x157   :  { %v231_v4 = vpop.f32.mrb[4].mxu1 }
 0x158   :  { %v587_v5 = vpop.f32.mrb[5].mxu1 }
 0x159   :  { %v234_v6 = vpop.f32.mrb[6].mxu1 }
 0x15a   :  { %v588_v2 = vpop.f32.mrb[7].mxu1 }
 0x15b   :  { %v175_v7 = vpop.f32.mrb[4].mxu0 }
 0x15c   :  { %v181_v8 = vadd.f32 %v175_v7, %v121_v0  ;;  %v581_v9 = vpop.f32.mrb[5].mxu0 }
 0x15d   :  { %v178_v10 = vpop.f32.mrb[6].mxu0 }
 0x15e   :  { %v237_v11 = vadd.f32 %v231_v4, %v181_v8  ;;  %v582_v12 = vpop.f32.mrb[7].mxu0 }
 0x15f   :  { %v343_v13 = vpop.f32.mrb[8].mxu1 }
 0x160   :  { %v599_v14 = vpop.f32.mrb[9].mxu1 }
 0x161   :  { %v346_v15 = vpop.f32.mrb[10].mxu1 }
 0x162   :  { %v600_v16 = vpop.f32.mrb[11].mxu1 }
 0x163   :  { %v287_v17 = vpop.f32.mrb[8].mxu0 }
 0x164   :  { %v293_v18 = vadd.f32 %v287_v17, %v237_v11  ;;  %v593_v19 = vpop.f32.mrb[9].mxu0 }
 0x165   :  { %v290_v20 = vpop.f32.mrb[10].mxu0 }
 0x166   :  { %v349_v21 = vadd.f32 %v343_v13, %v293_v18  ;;  %v594_v22 = vpop.f32.mrb[11].mxu0 }
 0x167   :  { %v455_v23 = vpop.f32.mrb[12].mxu1 }
 0x168   :  { %v611_v24 = vpop.f32.mrb[13].mxu1 }
 0x169   :  { %v458_v25 = vpop.f32.mrb[14].mxu1 }
 0x16a   :  { %v612_v26 = vpop.f32.mrb[15].mxu1 }
 0x16b   :  { %v399_v27 = vpop.f32.mrb[12].mxu0 }
 0x16c   :  { %v405_v28 = vadd.f32 %v399_v27, %v349_v21  ;;  %v605_v29 = vpop.f32.mrb[13].mxu0 }
 0x16d   :  { %v402_v30 = vpop.f32.mrb[14].mxu0 }
 0x16e   :  { %v461_v31 = vadd.f32 %v455_v23, %v405_v28  ;;  %v606_v32 = vpop.f32.mrb[15].mxu0 }
 0x173   :  { %v511_v33 = vpop.f32.mrb[16].mxu0 }
 0x174   :  { %v517_v35 = vadd.f32 %v511_v33, %v461_v31  ;;  %v617_v36 = vpop.f32.mrb[17].mxu0 }
 0x175   :  { %v514_v37 = vpop.f32.mrb[18].mxu0 }
 0x176   :  { %v524_v38 = vadd.f32 %v522_v34, %v517_v35  ;;  %v618_v39 = vpop.f32.mrb[19].mxu0 }
 0x178   :  { %525 = vst [vmem:[%s749_s3] sm:$0xff] %v524_v38 }

// kernel: usrm5_2_forward.18
= control target key start
LH: loop header
LB: loop body
LE: loop exit
PB: predicated region body
PF: predicated region fallthrough
CT: control target
= control target key end

     0   :  { %vm36_vm0 = vcmask 1043456   ;;  %v631_v2 = vmov 0.0   ;;  %vm632_vm1 = vmmov 0   ;;  %s633_s18 = smov 126   ;;  %vm32_vm2 = vcmask 64512   ;;  %s635_s19 = smov 124   ;;  %s746_s0 = inlined_call_operand.vmem [shape: f32[1,8,138], index: 0, kind: input, shape index: {}]   ;;  %s747_s1 = inlined_call_operand.vmem [shape: f32[9,8,8], index: 1, kind: input, shape index: {}]   ;;  %s748_s2 = inlined_call_operand.vmem [shape: f32[8,1], index: 2, kind: input, shape index: {}]   ;;  %s749_s3 = inlined_call_operand.vmem [shape: f32[8,128], index: 3, kind: output, shape index: {}]  }
   0x1   :  { %v15_v0 = vld [vmem:[%s746_s0] sm:$0xff]  ;;  %v19_v1 = vld [vmem:[%s746_s0 + $0x8] sm:$0xff]  ;;  %565 = vmatprep.subr.bf16.mxu0 %v631_v2  ;;  %571 = vmatprep.subr.bf16.mxu1 %v631_v2  ;;  %s634_s0 = smov 127   ;;  %s636_s20 = smov 123   ;;  %v641_v8 = vmov 0   ;;  %vm133_vm3 = vcmask 1031168  }
   0x2   :  { %v17_v3 = vpack.c.bf16 %v15_v0, %v15_v0  ;;  %567 = vmatprep.mubr.msk.bf16.mxu0 %vm632_vm1, %v631_v2  ;;  %573 = vmatprep.mubr.msk.bf16.mxu1 %vm632_vm1, %v631_v2  ;;  %v16_v4 = vld [vmem:[%s747_s1] sm:$0xff]  ;;  %v22_v5 = vpack.c.bf16 %v19_v1, %v19_v1  ;;  %s637_s21 = smov 122   ;;  %s638_s22 = smov 120   ;;  %vm30_vm4 = vcmask 1039360   ;;  %v530_v12 = vld [vmem:[%s747_s1 + $0x8] sm:$0xff]  ;;  %vm189_vm5 = vcmask 1014784  }
   0x3   :  { %v18_v7 = vpack.c.bf16 %v16_v4, %v16_v4  ;;  %s639_s23 = smov 119   ;;  %s640_s24 = smov 118   ;;  %630 = vset.pattern.permute.xlu0 %v641_v8  ;;  %v518_v9 = vld [vmem:[%s748_s2] sm:$0xff]  ;;  %v23_v18 = vpack.c.bf16 %v530_v12, %v530_v12  ;;  %v535_v19 = vld [vmem:[%s747_s1 + $0x18] sm:$0xff]  ;;  %vm245_vm6 = vcmask 1006592   ;;  %v533_v26 = vld [vmem:[%s747_s1 + $0x10] sm:$0xff] }
   0x4   :  { %129 = vrot.lane.b32.xlu1 %v17_v3, %s633_s18  ;;  %26 = vrot.lane.b32.xlu0 %v17_v3, %s634_s0  ;;  %v84_v6 = vsel %vm36_vm0, %v17_v3, 0  ;;  %v184_v25 = vpack.c.bf16 %v535_v19, %v535_v19  ;;  %v128_v30 = vpack.c.bf16 %v533_v26, %v533_v26  ;;  %vm301_vm7 = vcmask 998400   ;;  %v539_v31 = vld [vmem:[%s747_s1 + $0x28] sm:$0xff]  ;;  %v537_v38 = vld [vmem:[%s747_s1 + $0x20] sm:$0xff] }
   0x5   :  { %572 = vmatpush3.bf16.msra.mxu1 %v84_v6  ;;  %vm357_vm8 = vcmask 982016   ;;  %v296_v37 = vpack.c.bf16 %v539_v31, %v539_v31  ;;  %v240_v42 = vpack.c.bf16 %v537_v38, %v537_v38  ;;  %vm413_vm9 = vcmask 973824   ;;  %v543_v43 = vld [vmem:[%s747_s1 + $0x38] sm:$0xff]  ;;  %v541_v50 = vld [vmem:[%s747_s1 + $0x30] sm:$0xff]  ;;  %v545_v56 = vld [vmem:[%s747_s1 + $0x40] sm:$0xff] }
   0x6   :  { %583 = vmatprep.subr.bf16.mxu1 %v631_v2  ;;  %vm469_vm10 = vcmask 965632   ;;  %v408_v49 = vpack.c.bf16 %v543_v43, %v543_v43  ;;  %v352_v54 = vpack.c.bf16 %v541_v50, %v541_v50  ;;  %v464_v57 = vpack.c.bf16 %v545_v56, %v545_v56 }
   0x8   :  { %131 = vrot.lane.b32.xlu1 %v22_v5, %s633_s18  ;;  %28 = vrot.lane.b32.xlu0 %v22_v5, %s634_s0 }
   0x9   :  { %574 = vmatmul.mubr.msk.bf16.vlgmr.msra.gmra.mrb[0].mxu1 %vm32_vm2, %v18_v7 }
   0xa   :  { %585 = vmatprep.mubr.msk.bf16.mxu1 %vm632_vm1, %v631_v2 }
   0xc   :  { %187 = vrot.lane.b32.xlu1 %v22_v5, %s635_s19  ;;  %185 = vrot.lane.b32.xlu0 %v17_v3, %s635_s19 }
  0x10   :  { %243 = vrot.lane.b32.xlu1 %v22_v5, %s636_s20  ;;  %241 = vrot.lane.b32.xlu0 %v17_v3, %s636_s20 }
  0x14   :  { %299 = vrot.lane.b32.xlu1 %v22_v5, %s637_s21  ;;  %297 = vrot.lane.b32.xlu0 %v17_v3, %s637_s21 }
  0x18   :  { %355 = vrot.lane.b32.xlu1 %v22_v5, %s638_s22  ;;  %353 = vrot.lane.b32.xlu0 %v17_v3, %s638_s22 }
  0x1c   :  { %411 = vrot.lane.b32.xlu1 %v22_v5, %s639_s23  ;;  %409 = vrot.lane.b32.xlu0 %v17_v3, %s639_s23 }
  0x20   :  { %467 = vrot.lane.b32.xlu1 %v22_v5, %s640_s24  ;;  %465 = vrot.lane.b32.xlu0 %v17_v3, %s640_s24 }
  0x24   :  { %521 = vperm.xlu0 %630, %v518_v9  }
  0x76   :  { %v130_v10 = vpop.permute.xlu1 %129  ;;  %v27_v11 = vpop.permute.xlu0 %26 }
  0x7a   :  { %v132_v13 = vpop.permute.xlu1 %131  ;;  %v29_v14 = vpop.permute.xlu0 %28 }
  0x7b   :  { %v134_v15 = vsel %vm133_vm3, %v130_v10, %v132_v13  ;;  %v31_v16 = vsel %vm30_vm4, %v27_v11, %v29_v14 }
  0x7c   :  { %v38_v17 = vsel %vm36_vm0, %v31_v16, 0  ;;  %v139_v20 = vsel %vm36_vm0, %v134_v15, 0 }
  0x7d   :  { %566 = vmatpush3.bf16.msra.mxu0 %v38_v17 }
  0x7e   :  { %577 = vmatprep.subr.bf16.mxu0 %v631_v2  ;;  %v188_v21 = vpop.permute.xlu1 %187  ;;  %v186_v22 = vpop.permute.xlu0 %185 }
  0x7f   :  { %v190_v23 = vsel %vm189_vm5, %v186_v22, %v188_v21 }
  0x80   :  { %568 = vmatmul.mubr.msk.bf16.vlgmr.msra.gmra.mrb[0].mxu0 %vm32_vm2, %v23_v18  ;;  %v195_v24 = vsel %vm36_vm0, %v190_v23, 0 }
  0x81   :  { %578 = vmatpush3.bf16.msra.mxu0 %v139_v20  ;;  %584 = vmatpush3.bf16.msra.mxu1 %v195_v24 }
  0x82   :  { %v244_v27 = vpop.permute.xlu1 %243  ;;  %v242_v28 = vpop.permute.xlu0 %241  ;;  %579 = vmatprep.mubr.msk.bf16.mxu0 %vm632_vm1, %v631_v2  ;;  %589 = vmatprep.subr.bf16.mxu0 %v631_v2 }
  0x83   :  { %v246_v29 = vsel %vm245_vm6, %v242_v28, %v244_v27  ;;  %595 = vmatprep.subr.bf16.mxu1 %v631_v2 }
  0x84   :  { %586 = vmatmul.mubr.msk.bf16.vlgmr.msra.gmra.mrb[4].mxu1 %vm32_vm2, %v184_v25  ;;  %v251_v32 = vsel %vm36_vm0, %v246_v29, 0 }
  0x85   :  { %597 = vmatprep.mubr.msk.bf16.mxu1 %vm632_vm1, %v631_v2 }
  0x86   :  { %v300_v33 = vpop.permute.xlu1 %299  ;;  %v298_v34 = vpop.permute.xlu0 %297 }
  0x87   :  { %v302_v35 = vsel %vm301_vm7, %v298_v34, %v300_v33 }
  0x88   :  { %580 = vmatmul.mubr.msk.bf16.vlgmr.msra.gmra.mrb[4].mxu0 %vm32_vm2, %v128_v30  ;;  %v307_v36 = vsel %vm36_vm0, %v302_v35, 0 }
  0x89   :  { %590 = vmatpush3.bf16.msra.mxu0 %v251_v32  ;;  %596 = vmatpush3.bf16.msra.mxu1 %v307_v36 }
  0x8a   :  { %v356_v39 = vpop.permute.xlu1 %355  ;;  %v354_v40 = vpop.permute.xlu0 %353  ;;  %591 = vmatprep.mubr.msk.bf16.mxu0 %vm632_vm1, %v631_v2  ;;  %601 = vmatprep.subr.bf16.mxu0 %v631_v2 }
  0x8b   :  { %v358_v41 = vsel %vm357_vm8, %v354_v40, %v356_v39  ;;  %607 = vmatprep.subr.bf16.mxu1 %v631_v2 }
  0x8c   :  { %598 = vmatmul.mubr.msk.bf16.vlgmr.msra.gmra.mrb[8].mxu1 %vm32_vm2, %v296_v37  ;;  %v363_v44 = vsel %vm36_vm0, %v358_v41, 0 }
  0x8d   :  { %609 = vmatprep.mubr.msk.bf16.mxu1 %vm632_vm1, %v631_v2 }
  0x8e   :  { %v412_v45 = vpop.permute.xlu1 %411  ;;  %v410_v46 = vpop.permute.xlu0 %409 }
  0x8f   :  { %v414_v47 = vsel %vm413_vm9, %v410_v46, %v412_v45 }
  0x90   :  { %592 = vmatmul.mubr.msk.bf16.vlgmr.msra.gmra.mrb[8].mxu0 %vm32_vm2, %v240_v42  ;;  %v419_v48 = vsel %vm36_vm0, %v414_v47, 0 }
  0x91   :  { %602 = vmatpush3.bf16.msra.mxu0 %v363_v44  ;;  %608 = vmatpush3.bf16.msra.mxu1 %v419_v48 }
  0x92   :  { %v468_v51 = vpop.permute.xlu1 %467  ;;  %v466_v52 = vpop.permute.xlu0 %465  ;;  %603 = vmatprep.mubr.msk.bf16.mxu0 %vm632_vm1, %v631_v2  ;;  %613 = vmatprep.subr.bf16.mxu0 %v631_v2 }
  0x93   :  { %v470_v53 = vsel %vm469_vm10, %v466_v52, %v468_v51 }
  0x94   :  { %610 = vmatmul.mubr.msk.bf16.vlgmr.msra.gmra.mrb[12].mxu1 %vm32_vm2, %v408_v49  ;;  %v475_v55 = vsel %vm36_vm0, %v470_v53, 0 }
  0x98   :  { %604 = vmatmul.mubr.msk.bf16.vlgmr.msra.gmra.mrb[12].mxu0 %vm32_vm2, %v352_v54 }
  0x99   :  { %614 = vmatpush3.bf16.msra.mxu0 %v475_v55  ;;  %615 = vmatprep.mubr.msk.bf16.mxu0 %vm632_vm1, %v631_v2 }
  0xa0   :  { %616 = vmatmul.mubr.msk.bf16.vlgmr.msra.gmra.mrb[16].mxu0 %vm32_vm2, %v464_v57 }
  0xa3   :  { %v522_v34 = vpop.permute.xlu0 %521 }
  0xdc   :  { %v120_v58 = vpop.f32.mrb[0].mxu1 }
  0xdd   :  { %v575_v59 = vpop.f32.mrb[1].mxu1 }
  0xde   :  { %v123_v60 = vpop.f32.mrb[2].mxu1 }
  0xdf   :  { %v576_v61 = vpop.f32.mrb[3].mxu1 }
 0x153   :  { %v74_v62 = vpop.f32.mrb[0].mxu0 }
 0x154   :  { %v569_v63 = vpop.f32.mrb[1].mxu0  ;;  %v121_v0 = vadd.f32 %v120_v58, %v74_v62 }
 0x155   :  { %v77_v1 = vpop.f32.mrb[2].mxu0 }
 0x156   :  { %v570_v3 = vpop.f32.mrb[3].mxu0 }
 0x157   :  { %v231_v4 = vpop.f32.mrb[4].mxu1 }
 0x158   :  { %v587_v5 = vpop.f32.mrb[5].mxu1 }
 0x159   :  { %v234_v6 = vpop.f32.mrb[6].mxu1 }
 0x15a   :  { %v588_v2 = vpop.f32.mrb[7].mxu1 }
 0x15b   :  { %v175_v7 = vpop.f32.mrb[4].mxu0 }
 0x15c   :  { %v181_v8 = vadd.f32 %v175_v7, %v121_v0  ;;  %v581_v9 = vpop.f32.mrb[5].mxu0 }
 0x15d   :  { %v178_v10 = vpop.f32.mrb[6].mxu0 }
 0x15e   :  { %v237_v11 = vadd.f32 %v231_v4, %v181_v8  ;;  %v582_v12 = vpop.f32.mrb[7].mxu0 }
 0x15f   :  { %v343_v13 = vpop.f32.mrb[8].mxu1 }
 0x160   :  { %v599_v14 = vpop.f32.mrb[9].mxu1 }
 0x161   :  { %v346_v15 = vpop.f32.mrb[10].mxu1 }
 0x162   :  { %v600_v16 = vpop.f32.mrb[11].mxu1 }
 0x163   :  { %v287_v17 = vpop.f32.mrb[8].mxu0 }
 0x164   :  { %v293_v18 = vadd.f32 %v287_v17, %v237_v11  ;;  %v593_v19 = vpop.f32.mrb[9].mxu0 }
 0x165   :  { %v290_v20 = vpop.f32.mrb[10].mxu0 }
 0x166   :  { %v349_v21 = vadd.f32 %v343_v13, %v293_v18  ;;  %v594_v22 = vpop.f32.mrb[11].mxu0 }
 0x167   :  { %v455_v23 = vpop.f32.mrb[12].mxu1 }
 0x168   :  { %v611_v24 = vpop.f32.mrb[13].mxu1 }
 0x169   :  { %v458_v25 = vpop.f32.mrb[14].mxu1 }
 0x16a   :  { %v612_v26 = vpop.f32.mrb[15].mxu1 }
 0x16b   :  { %v399_v27 = vpop.f32.mrb[12].mxu0 }
 0x16c   :  { %v405_v28 = vadd.f32 %v399_v27, %v349_v21  ;;  %v605_v29 = vpop.f32.mrb[13].mxu0 }
 0x16d   :  { %v402_v30 = vpop.f32.mrb[14].mxu0 }
 0x16e   :  { %v461_v31 = vadd.f32 %v455_v23, %v405_v28  ;;  %v606_v32 = vpop.f32.mrb[15].mxu0 }
 0x173   :  { %v511_v33 = vpop.f32.mrb[16].mxu0 }
 0x174   :  { %v517_v35 = vadd.f32 %v511_v33, %v461_v31  ;;  %v617_v36 = vpop.f32.mrb[17].mxu0 }
 0x175   :  { %v514_v37 = vpop.f32.mrb[18].mxu0 }
 0x176   :  { %v524_v38 = vadd.f32 %v522_v34, %v517_v35  ;;  %v618_v39 = vpop.f32.mrb[19].mxu0 }
 0x178   :  { %525 = vst [vmem:[%s749_s3] sm:$0xff] %v524_v38 }

// kernel: usrm5_2_forward.19
= control target key start
LH: loop header
LB: loop body
LE: loop exit
PB: predicated region body
PF: predicated region fallthrough
CT: control target
= control target key end

     0   :  { %vm36_vm0 = vcmask 1043456   ;;  %v631_v2 = vmov 0.0   ;;  %vm632_vm1 = vmmov 0   ;;  %s633_s18 = smov 126   ;;  %vm32_vm2 = vcmask 64512   ;;  %s635_s19 = smov 122   ;;  %s746_s0 = inlined_call_operand.vmem [shape: f32[1,8,142], index: 0, kind: input, shape index: {}]   ;;  %s747_s1 = inlined_call_operand.vmem [shape: f32[9,8,8], index: 1, kind: input, shape index: {}]   ;;  %s748_s2 = inlined_call_operand.vmem [shape: f32[8,1], index: 2, kind: input, shape index: {}]   ;;  %s749_s3 = inlined_call_operand.vmem [shape: f32[8,128], index: 3, kind: output, shape index: {}]  }
   0x1   :  { %v15_v0 = vld [vmem:[%s746_s0] sm:$0xff]  ;;  %v19_v1 = vld [vmem:[%s746_s0 + $0x8] sm:$0xff]  ;;  %565 = vmatprep.subr.bf16.mxu0 %v631_v2  ;;  %571 = vmatprep.subr.bf16.mxu1 %v631_v2  ;;  %s634_s0 = smov 127   ;;  %s636_s20 = smov 121   ;;  %v641_v8 = vmov 0   ;;  %vm133_vm3 = vcmask 1031168  }
   0x2   :  { %v17_v3 = vpack.c.bf16 %v15_v0, %v15_v0  ;;  %567 = vmatprep.mubr.msk.bf16.mxu0 %vm632_vm1, %v631_v2  ;;  %573 = vmatprep.mubr.msk.bf16.mxu1 %vm632_vm1, %v631_v2  ;;  %v16_v4 = vld [vmem:[%s747_s1] sm:$0xff]  ;;  %v22_v5 = vpack.c.bf16 %v19_v1, %v19_v1  ;;  %s637_s21 = smov 120   ;;  %s638_s22 = smov 116   ;;  %vm30_vm4 = vcmask 1039360   ;;  %v530_v12 = vld [vmem:[%s747_s1 + $0x8] sm:$0xff]  ;;  %vm189_vm5 = vcmask 998400  }
   0x3   :  { %v18_v7 = vpack.c.bf16 %v16_v4, %v16_v4  ;;  %s639_s23 = smov 115   ;;  %s640_s24 = smov 114   ;;  %630 = vset.pattern.permute.xlu0 %v641_v8  ;;  %v518_v9 = vld [vmem:[%s748_s2] sm:$0xff]  ;;  %v23_v18 = vpack.c.bf16 %v530_v12, %v530_v12  ;;  %v535_v19 = vld [vmem:[%s747_s1 + $0x18] sm:$0xff]  ;;  %vm245_vm6 = vcmask 990208   ;;  %v533_v26 = vld [vmem:[%s747_s1 + $0x10] sm:$0xff] }
   0x4   :  { %129 = vrot.lane.b32.xlu1 %v17_v3, %s633_s18  ;;  %26 = vrot.lane.b32.xlu0 %v17_v3, %s634_s0  ;;  %v84_v6 = vsel %vm36_vm0, %v17_v3, 0  ;;  %v184_v25 = vpack.c.bf16 %v535_v19, %v535_v19  ;;  %v128_v30 = vpack.c.bf16 %v533_v26, %v533_v26  ;;  %vm301_vm7 = vcmask 982016   ;;  %v539_v31 = vld [vmem:[%s747_s1 + $0x28] sm:$0xff]  ;;  %v537_v38 = vld [vmem:[%s747_s1 + $0x20] sm:$0xff] }
   0x5   :  { %572 = vmatpush3.bf16.msra.mxu1 %v84_v6  ;;  %vm357_vm8 = vcmask 949248   ;;  %v296_v37 = vpack.c.bf16 %v539_v31, %v539_v31  ;;  %v240_v42 = vpack.c.bf16 %v537_v38, %v537_v38  ;;  %vm413_vm9 = vcmask 941056   ;;  %v543_v43 = vld [vmem:[%s747_s1 + $0x38] sm:$0xff]  ;;  %v541_v50 = vld [vmem:[%s747_s1 + $0x30] sm:$0xff]  ;;  %v545_v56 = vld [vmem:[%s747_s1 + $0x40] sm:$0xff] }
   0x6   :  { %583 = vmatprep.subr.bf16.mxu1 %v631_v2  ;;  %vm469_vm10 = vcmask 932864   ;;  %v408_v49 = vpack.c.bf16 %v543_v43, %v543_v43  ;;  %v352_v54 = vpack.c.bf16 %v541_v50, %v541_v50  ;;  %v464_v57 = vpack.c.bf16 %v545_v56, %v545_v56 }
   0x8   :  { %131 = vrot.lane.b32.xlu1 %v22_v5, %s633_s18  ;;  %28 = vrot.lane.b32.xlu0 %v22_v5, %s634_s0 }
   0x9   :  { %574 = vmatmul.mubr.msk.bf16.vlgmr.msra.gmra.mrb[0].mxu1 %vm32_vm2, %v18_v7 }
   0xa   :  { %585 = vmatprep.mubr.msk.bf16.mxu1 %vm632_vm1, %v631_v2 }
   0xc   :  { %187 = vrot.lane.b32.xlu1 %v22_v5, %s635_s19  ;;  %185 = vrot.lane.b32.xlu0 %v17_v3, %s635_s19 }
  0x10   :  { %243 = vrot.lane.b32.xlu1 %v22_v5, %s636_s20  ;;  %241 = vrot.lane.b32.xlu0 %v17_v3, %s636_s20 }
  0x14   :  { %299 = vrot.lane.b32.xlu1 %v22_v5, %s637_s21  ;;  %297 = vrot.lane.b32.xlu0 %v17_v3, %s637_s21 }
  0x18   :  { %355 = vrot.lane.b32.xlu1 %v22_v5, %s638_s22  ;;  %353 = vrot.lane.b32.xlu0 %v17_v3, %s638_s22 }
  0x1c   :  { %411 = vrot.lane.b32.xlu1 %v22_v5, %s639_s23  ;;  %409 = vrot.lane.b32.xlu0 %v17_v3, %s639_s23 }
  0x20   :  { %467 = vrot.lane.b32.xlu1 %v22_v5, %s640_s24  ;;  %465 = vrot.lane.b32.xlu0 %v17_v3, %s640_s24 }
  0x24   :  { %521 = vperm.xlu0 %630, %v518_v9  }
  0x76   :  { %v130_v10 = vpop.permute.xlu1 %129  ;;  %v27_v11 = vpop.permute.xlu0 %26 }
  0x7a   :  { %v132_v13 = vpop.permute.xlu1 %131  ;;  %v29_v14 = vpop.permute.xlu0 %28 }
  0x7b   :  { %v134_v15 = vsel %vm133_vm3, %v130_v10, %v132_v13  ;;  %v31_v16 = vsel %vm30_vm4, %v27_v11, %v29_v14 }
  0x7c   :  { %v38_v17 = vsel %vm36_vm0, %v31_v16, 0  ;;  %v139_v20 = vsel %vm36_vm0, %v134_v15, 0 }
  0x7d   :  { %566 = vmatpush3.bf16.msra.mxu0 %v38_v17 }
  0x7e   :  { %577 = vmatprep.subr.bf16.mxu0 %v631_v2  ;;  %v188_v21 = vpop.permute.xlu1 %187  ;;  %v186_v22 = vpop.permute.xlu0 %185 }
  0x7f   :  { %v190_v23 = vsel %vm189_vm5, %v186_v22, %v188_v21 }
  0x80   :  { %568 = vmatmul.mubr.msk.bf16.vlgmr.msra.gmra.mrb[0].mxu0 %vm32_vm2, %v23_v18  ;;  %v195_v24 = vsel %vm36_vm0, %v190_v23, 0 }
  0x81   :  { %578 = vmatpush3.bf16.msra.mxu0 %v139_v20  ;;  %584 = vmatpush3.bf16.msra.mxu1 %v195_v24 }
  0x82   :  { %v244_v27 = vpop.permute.xlu1 %243  ;;  %v242_v28 = vpop.permute.xlu0 %241  ;;  %579 = vmatprep.mubr.msk.bf16.mxu0 %vm632_vm1, %v631_v2  ;;  %589 = vmatprep.subr.bf16.mxu0 %v631_v2 }
  0x83   :  { %v246_v29 = vsel %vm245_vm6, %v242_v28, %v244_v27  ;;  %595 = vmatprep.subr.bf16.mxu1 %v631_v2 }
  0x84   :  { %586 = vmatmul.mubr.msk.bf16.vlgmr.msra.gmra.mrb[4].mxu1 %vm32_vm2, %v184_v25  ;;  %v251_v32 = vsel %vm36_vm0, %v246_v29, 0 }
  0x85   :  { %597 = vmatprep.mubr.msk.bf16.mxu1 %vm632_vm1, %v631_v2 }
  0x86   :  { %v300_v33 = vpop.permute.xlu1 %299  ;;  %v298_v34 = vpop.permute.xlu0 %297 }
  0x87   :  { %v302_v35 = vsel %vm301_vm7, %v298_v34, %v300_v33 }
  0x88   :  { %580 = vmatmul.mubr.msk.bf16.vlgmr.msra.gmra.mrb[4].mxu0 %vm32_vm2, %v128_v30  ;;  %v307_v36 = vsel %vm36_vm0, %v302_v35, 0 }
  0x89   :  { %590 = vmatpush3.bf16.msra.mxu0 %v251_v32  ;;  %596 = vmatpush3.bf16.msra.mxu1 %v307_v36 }
  0x8a   :  { %v356_v39 = vpop.permute.xlu1 %355  ;;  %v354_v40 = vpop.permute.xlu0 %353  ;;  %591 = vmatprep.mubr.msk.bf16.mxu0 %vm632_vm1, %v631_v2  ;;  %601 = vmatprep.subr.bf16.mxu0 %v631_v2 }
  0x8b   :  { %v358_v41 = vsel %vm357_vm8, %v354_v40, %v356_v39  ;;  %607 = vmatprep.subr.bf16.mxu1 %v631_v2 }
  0x8c   :  { %598 = vmatmul.mubr.msk.bf16.vlgmr.msra.gmra.mrb[8].mxu1 %vm32_vm2, %v296_v37  ;;  %v363_v44 = vsel %vm36_vm0, %v358_v41, 0 }
  0x8d   :  { %609 = vmatprep.mubr.msk.bf16.mxu1 %vm632_vm1, %v631_v2 }
  0x8e   :  { %v412_v45 = vpop.permute.xlu1 %411  ;;  %v410_v46 = vpop.permute.xlu0 %409 }
  0x8f   :  { %v414_v47 = vsel %vm413_vm9, %v410_v46, %v412_v45 }
  0x90   :  { %592 = vmatmul.mubr.msk.bf16.vlgmr.msra.gmra.mrb[8].mxu0 %vm32_vm2, %v240_v42  ;;  %v419_v48 = vsel %vm36_vm0, %v414_v47, 0 }
  0x91   :  { %602 = vmatpush3.bf16.msra.mxu0 %v363_v44  ;;  %608 = vmatpush3.bf16.msra.mxu1 %v419_v48 }
  0x92   :  { %v468_v51 = vpop.permute.xlu1 %467  ;;  %v466_v52 = vpop.permute.xlu0 %465  ;;  %603 = vmatprep.mubr.msk.bf16.mxu0 %vm632_vm1, %v631_v2  ;;  %613 = vmatprep.subr.bf16.mxu0 %v631_v2 }
  0x93   :  { %v470_v53 = vsel %vm469_vm10, %v466_v52, %v468_v51 }
  0x94   :  { %610 = vmatmul.mubr.msk.bf16.vlgmr.msra.gmra.mrb[12].mxu1 %vm32_vm2, %v408_v49  ;;  %v475_v55 = vsel %vm36_vm0, %v470_v53, 0 }
  0x98   :  { %604 = vmatmul.mubr.msk.bf16.vlgmr.msra.gmra.mrb[12].mxu0 %vm32_vm2, %v352_v54 }
  0x99   :  { %614 = vmatpush3.bf16.msra.mxu0 %v475_v55  ;;  %615 = vmatprep.mubr.msk.bf16.mxu0 %vm632_vm1, %v631_v2 }
  0xa0   :  { %616 = vmatmul.mubr.msk.bf16.vlgmr.msra.gmra.mrb[16].mxu0 %vm32_vm2, %v464_v57 }
  0xa3   :  { %v522_v34 = vpop.permute.xlu0 %521 }
  0xdc   :  { %v120_v58 = vpop.f32.mrb[0].mxu1 }
  0xdd   :  { %v575_v59 = vpop.f32.mrb[1].mxu1 }
  0xde   :  { %v123_v60 = vpop.f32.mrb[2].mxu1 }
  0xdf   :  { %v576_v61 = vpop.f32.mrb[3].mxu1 }
 0x153   :  { %v74_v62 = vpop.f32.mrb[0].mxu0 }
 0x154   :  { %v569_v63 = vpop.f32.mrb[1].mxu0  ;;  %v121_v0 = vadd.f32 %v120_v58, %v74_v62 }
 0x155   :  { %v77_v1 = vpop.f32.mrb[2].mxu0 }
 0x156   :  { %v570_v3 = vpop.f32.mrb[3].mxu0 }
 0x157   :  { %v231_v4 = vpop.f32.mrb[4].mxu1 }
 0x158   :  { %v587_v5 = vpop.f32.mrb[5].mxu1 }
 0x159   :  { %v234_v6 = vpop.f32.mrb[6].mxu1 }
 0x15a   :  { %v588_v2 = vpop.f32.mrb[7].mxu1 }
 0x15b   :  { %v175_v7 = vpop.f32.mrb[4].mxu0 }
 0x15c   :  { %v181_v8 = vadd.f32 %v175_v7, %v121_v0  ;;  %v581_v9 = vpop.f32.mrb[5].mxu0 }
 0x15d   :  { %v178_v10 = vpop.f32.mrb[6].mxu0 }
 0x15e   :  { %v237_v11 = vadd.f32 %v231_v4, %v181_v8  ;;  %v582_v12 = vpop.f32.mrb[7].mxu0 }
 0x15f   :  { %v343_v13 = vpop.f32.mrb[8].mxu1 }
 0x160   :  { %v599_v14 = vpop.f32.mrb[9].mxu1 }
 0x161   :  { %v346_v15 = vpop.f32.mrb[10].mxu1 }
 0x162   :  { %v600_v16 = vpop.f32.mrb[11].mxu1 }
 0x163   :  { %v287_v17 = vpop.f32.mrb[8].mxu0 }
 0x164   :  { %v293_v18 = vadd.f32 %v287_v17, %v237_v11  ;;  %v593_v19 = vpop.f32.mrb[9].mxu0 }
 0x165   :  { %v290_v20 = vpop.f32.mrb[10].mxu0 }
 0x166   :  { %v349_v21 = vadd.f32 %v343_v13, %v293_v18  ;;  %v594_v22 = vpop.f32.mrb[11].mxu0 }
 0x167   :  { %v455_v23 = vpop.f32.mrb[12].mxu1 }
 0x168   :  { %v611_v24 = vpop.f32.mrb[13].mxu1 }
 0x169   :  { %v458_v25 = vpop.f32.mrb[14].mxu1 }
 0x16a   :  { %v612_v26 = vpop.f32.mrb[15].mxu1 }
 0x16b   :  { %v399_v27 = vpop.f32.mrb[12].mxu0 }
 0x16c   :  { %v405_v28 = vadd.f32 %v399_v27, %v349_v21  ;;  %v605_v29 = vpop.f32.mrb[13].mxu0 }
 0x16d   :  { %v402_v30 = vpop.f32.mrb[14].mxu0 }
 0x16e   :  { %v461_v31 = vadd.f32 %v455_v23, %v405_v28  ;;  %v606_v32 = vpop.f32.mrb[15].mxu0 }
 0x173   :  { %v511_v33 = vpop.f32.mrb[16].mxu0 }
 0x174   :  { %v517_v35 = vadd.f32 %v511_v33, %v461_v31  ;;  %v617_v36 = vpop.f32.mrb[17].mxu0 }
 0x175   :  { %v514_v37 = vpop.f32.mrb[18].mxu0 }
 0x176   :  { %v524_v38 = vadd.f32 %v522_v34, %v517_v35  ;;  %v618_v39 = vpop.f32.mrb[19].mxu0 }
 0x178   :  { %525 = vst [vmem:[%s749_s3] sm:$0xff] %v524_v38 }

// kernel: usrm5_2_forward.21
= control target key start
LH: loop header
LB: loop body
LE: loop exit
PB: predicated region body
PF: predicated region fallthrough
CT: control target
= control target key end

     0   :  { %v638_v3 = vmov 0   ;;  %vm42_vm0 = vcmask 1043456   ;;  %s639_s20 = smov 127   ;;  %vm38_vm1 = vcmask 64512   ;;  %s641_s21 = smov 118   ;;  %vm35_vm2 = vcmask 1039360   ;;  %s749_s0 = inlined_call_operand.vmem [shape: f32[1,8,278], index: 0, kind: input, shape index: {}]   ;;  %s750_s1 = inlined_call_operand.vmem [shape: f32[9,8,8], index: 1, kind: input, shape index: {}]   ;;  %s751_s2 = inlined_call_operand.vmem [shape: f32[8,1], index: 2, kind: input, shape index: {}]   ;;  %s752_s3 = inlined_call_operand.vmem [shape: f32[8,256], index: 3, kind: output, shape index: {}]  }
   0x1   :  { %v21_v0 = vld [vmem:[%s749_s0 + $0x10] sm:$0xff]  ;;  %v15_v1 = vld [vmem:[%s749_s0] sm:$0xff]  ;;  %v16_v2 = vld [vmem:[%s749_s0 + $0x8] sm:$0xff]  ;;  %81 = vmatprep.mubr.bf16.mxu0 %v638_v3  ;;  %131 = vmatprep.mubr.bf16.mxu1 %v638_v3  ;;  %s640_s0 = smov 126   ;;  %s642_s22 = smov 117   ;;  %vm149_vm3 = vcmask 1031168  }
   0x2   :  { %v24_v4 = vpack.c.bf16 %v21_v0, %v21_v0  ;;  %v18_v5 = vpack.c.bf16 %v15_v1, %v15_v1  ;;  %v17_v6 = vld [vmem:[%s750_s1] sm:$0xff]  ;;  %637 = vset.pattern.permute.xlu0 %v638_v3  ;;  %v19_v7 = vpack.c.bf16 %v16_v2, %v16_v2  ;;  %s643_s23 = smov 116   ;;  %s644_s24 = smov 108   ;;  %v602_v13 = vld [vmem:[%s750_s1 + $0x8] sm:$0xff]  ;;  %v607_v25 = vld [vmem:[%s750_s1 + $0x10] sm:$0xff]  ;;  %vm213_vm4 = vcmask 965632  }
   0x3   :  { %v20_v9 = vpack.c.bf16 %v17_v6, %v17_v6  ;;  %s645_s25 = smov 107   ;;  %s646_s26 = smov 106   ;;  %v588_v10 = vld [vmem:[%s751_s2] sm:$0xff]  ;;  %v25_v19 = vpack.c.bf16 %v602_v13, %v602_v13  ;;  %v142_v28 = vpack.c.bf16 %v607_v25, %v607_v25  ;;  %v610_v30 = vld [vmem:[%s750_s1 + $0x18] sm:$0xff]  ;;  %vm277_vm5 = vcmask 957440   ;;  %v616_v46 = vld [vmem:[%s750_s1 + $0x28] sm:$0xff] }
   0x4   :  { %33 = vrot.lane.b32.xlu1 %v24_v4, %s639_s20  ;;  %29 = vrot.lane.b32.xlu0 %v18_v5, %s639_s20  ;;  %v94_v8 = vsel %vm42_vm0, %v18_v5, 0  ;;  %v206_v35 = vpack.c.bf16 %v610_v30, %v610_v30  ;;  %v613_v36 = vld [vmem:[%s750_s1 + $0x20] sm:$0xff]  ;;  %vm341_vm6 = vcmask 949248   ;;  %vm405_vm7 = vcmask 883712   ;;  %v619_v52 = vld [vmem:[%s750_s1 + $0x30] sm:$0xff] }
   0x5   :  { %605 = vmatprep.subr.msk.bf16.mxu1 %vm42_vm0, %v19_v7  ;;  %v270_v42 = vpack.c.bf16 %v613_v36, %v613_v36  ;;  %v334_v51 = vpack.c.bf16 %v616_v46, %v616_v46  ;;  %v398_v58 = vpack.c.bf16 %v619_v52, %v619_v52  ;;  %vm469_vm8 = vcmask 875520   ;;  %v622_v62 = vld [vmem:[%s750_s1 + $0x38] sm:$0xff] }
   0x6   :  { %100 = vmatpush1.bf16.msra.mxu1 %v94_v8  ;;  %vm533_vm9 = vcmask 867328  }
   0x8   :  { %143 = vrot.lane.b32.xlu1 %v18_v5, %s640_s0  ;;  %31 = vrot.lane.b32.xlu0 %v19_v7, %s639_s20 }
   0x9   :  { %606 = vmatmul.mubr.msk.bf16.vlgmr.msra.gmra.mrb[0].mxu1 %vm38_vm1, %v20_v9 }
   0xa   :  { %257 = vmatprep.mubr.bf16.mxu1 %v638_v3 }
   0xc   :  { %147 = vrot.lane.b32.xlu1 %v24_v4, %s640_s0  ;;  %145 = vrot.lane.b32.xlu0 %v19_v7, %s640_s0 }
  0x10   :  { %209 = vrot.lane.b32.xlu1 %v19_v7, %s641_s21  ;;  %207 = vrot.lane.b32.xlu0 %v18_v5, %s641_s21 }
  0x14   :  { %271 = vrot.lane.b32.xlu1 %v18_v5, %s642_s22  ;;  %211 = vrot.lane.b32.xlu0 %v24_v4, %s641_s21 }
  0x18   :  { %275 = vrot.lane.b32.xlu1 %v24_v4, %s642_s22  ;;  %273 = vrot.lane.b32.xlu0 %v19_v7, %s642_s22 }
  0x1c   :  { %337 = vrot.lane.b32.xlu1 %v19_v7, %s643_s23  ;;  %335 = vrot.lane.b32.xlu0 %v18_v5, %s643_s23 }
  0x20   :  { %399 = vrot.lane.b32.xlu1 %v18_v5, %s644_s24  ;;  %339 = vrot.lane.b32.xlu0 %v24_v4, %s643_s23 }
  0x24   :  { %403 = vrot.lane.b32.xlu1 %v24_v4, %s644_s24  ;;  %401 = vrot.lane.b32.xlu0 %v19_v7, %s644_s24 }
  0x28   :  { %465 = vrot.lane.b32.xlu1 %v19_v7, %s645_s25  ;;  %463 = vrot.lane.b32.xlu0 %v18_v5, %s645_s25 }
  0x2c   :  { %527 = vrot.lane.b32.xlu1 %v18_v5, %s646_s26  ;;  %467 = vrot.lane.b32.xlu0 %v24_v4, %s645_s25  ;;  %v625_v5 = vld [vmem:[%s750_s1 + $0x40] sm:$0xff] }
  0x30   :  { %531 = vrot.lane.b32.xlu1 %v24_v4, %s646_s26  ;;  %529 = vrot.lane.b32.xlu0 %v19_v7, %s646_s26  ;;  %v462_v4 = vpack.c.bf16 %v622_v62, %v622_v62 }
  0x34   :  { %591 = vperm.xlu0 %637, %v588_v10   ;;  %v526_v10 = vpack.c.bf16 %v625_v5, %v625_v5 }
  0x76   :  { %v34_v11 = vpop.permute.xlu1 %33  ;;  %v30_v12 = vpop.permute.xlu0 %29 }
  0x7a   :  { %v144_v14 = vpop.permute.xlu1 %143  ;;  %v32_v15 = vpop.permute.xlu0 %31 }
  0x7b   :  { %v37_v16 = vsel %vm35_vm2, %v32_v15, %v34_v11  ;;  %v36_v17 = vsel %vm35_vm2, %v30_v12, %v32_v15 }
  0x7c   :  { %603 = vmatprep.subr.msk.bf16.mxu0 %vm42_vm0, %v37_v16  ;;  %v44_v18 = vsel %vm42_vm0, %v36_v17, 0 }
  0x7d   :  { %50 = vmatpush1.bf16.msra.mxu0 %v44_v18 }
  0x7e   :  { %v148_v20 = vpop.permute.xlu1 %147  ;;  %v146_v21 = vpop.permute.xlu0 %145 }
  0x7f   :  { %v150_v22 = vsel %vm149_vm3, %v144_v14, %v146_v21  ;;  %v151_v23 = vsel %vm149_vm3, %v146_v21, %v148_v20 }
  0x80   :  { %v156_v24 = vsel %vm42_vm0, %v150_v22, 0  ;;  %608 = vmatprep.subr.msk.bf16.mxu0 %vm42_vm0, %v151_v23  ;;  %604 = vmatmul.mubr.msk.bf16.vlgmr.msra.gmra.mrb[0].mxu0 %vm38_vm1, %v25_v19 }
  0x81   :  { %162 = vmatpush1.bf16.msra.mxu0 %v156_v24  ;;  %193 = vmatprep.mubr.bf16.mxu0 %v638_v3 }
  0x82   :  { %v210_v26 = vpop.permute.xlu1 %209  ;;  %v208_v27 = vpop.permute.xlu0 %207 }
  0x83   :  { %v214_v29 = vsel %vm213_vm4, %v208_v27, %v210_v26 }
  0x84   :  { %v220_v34 = vsel %vm42_vm0, %v214_v29, 0 }
  0x86   :  { %v272_v31 = vpop.permute.xlu1 %271  ;;  %v212_v32 = vpop.permute.xlu0 %211 }
  0x87   :  { %v215_v33 = vsel %vm213_vm4, %v210_v26, %v212_v32 }
  0x88   :  { %611 = vmatprep.subr.msk.bf16.mxu1 %vm42_vm0, %v215_v33  ;;  %609 = vmatmul.mubr.msk.bf16.vlgmr.msra.gmra.mrb[4].mxu0 %vm38_vm1, %v142_v28 }
  0x89   :  { %226 = vmatpush1.bf16.msra.mxu1 %v220_v34  ;;  %321 = vmatprep.mubr.bf16.mxu0 %v638_v3 }
  0x8a   :  { %v276_v37 = vpop.permute.xlu1 %275  ;;  %v274_v38 = vpop.permute.xlu0 %273 }
  0x8b   :  { %v278_v39 = vsel %vm277_vm5, %v272_v31, %v274_v38  ;;  %v279_v40 = vsel %vm277_vm5, %v274_v38, %v276_v37 }
  0x8c   :  { %v284_v41 = vsel %vm42_vm0, %v278_v39, 0  ;;  %614 = vmatprep.subr.msk.bf16.mxu0 %vm42_vm0, %v279_v40  ;;  %612 = vmatmul.mubr.msk.bf16.vlgmr.msra.gmra.mrb[4].mxu1 %vm38_vm1, %v206_v35 }
  0x8d   :  { %290 = vmatpush1.bf16.msra.mxu0 %v284_v41  ;;  %385 = vmatprep.mubr.bf16.mxu1 %v638_v3 }
  0x8e   :  { %v338_v43 = vpop.permute.xlu1 %337  ;;  %v336_v44 = vpop.permute.xlu0 %335 }
  0x8f   :  { %v342_v45 = vsel %vm341_vm6, %v336_v44, %v338_v43 }
  0x90   :  { %615 = vmatmul.mubr.msk.bf16.vlgmr.msra.gmra.mrb[8].mxu0 %vm38_vm1, %v270_v42  ;;  %v348_v50 = vsel %vm42_vm0, %v342_v45, 0 }
  0x91   :  { %449 = vmatprep.mubr.bf16.mxu0 %v638_v3 }
  0x92   :  { %v400_v47 = vpop.permute.xlu1 %399  ;;  %v340_v48 = vpop.permute.xlu0 %339 }
  0x93   :  { %v343_v49 = vsel %vm341_vm6, %v338_v43, %v340_v48 }
  0x94   :  { %617 = vmatprep.subr.msk.bf16.mxu1 %vm42_vm0, %v343_v49 }
  0x95   :  { %354 = vmatpush1.bf16.msra.mxu1 %v348_v50 }
  0x96   :  { %v404_v53 = vpop.permute.xlu1 %403  ;;  %v402_v54 = vpop.permute.xlu0 %401 }
  0x97   :  { %v406_v55 = vsel %vm405_vm7, %v400_v47, %v402_v54  ;;  %v407_v56 = vsel %vm405_vm7, %v402_v54, %v404_v53 }
  0x98   :  { %v412_v57 = vsel %vm42_vm0, %v406_v55, 0  ;;  %618 = vmatmul.mubr.msk.bf16.vlgmr.msra.gmra.mrb[8].mxu1 %vm38_vm1, %v334_v51  ;;  %620 = vmatprep.subr.msk.bf16.mxu0 %vm42_vm0, %v407_v56 }
  0x99   :  { %418 = vmatpush1.bf16.msra.mxu0 %v412_v57  ;;  %513 = vmatprep.mubr.bf16.mxu1 %v638_v3 }
  0x9a   :  { %v466_v59 = vpop.permute.xlu1 %465  ;;  %v464_v60 = vpop.permute.xlu0 %463 }
  0x9b   :  { %v470_v61 = vsel %vm469_vm8, %v464_v60, %v466_v59 }
  0x9c   :  { %621 = vmatmul.mubr.msk.bf16.vlgmr.msra.gmra.mrb[12].mxu0 %vm38_vm1, %v398_v58  ;;  %v476_v2 = vsel %vm42_vm0, %v470_v61, 0 }
  0x9d   :  { %577 = vmatprep.mubr.bf16.mxu0 %v638_v3 }
  0x9e   :  { %v528_v63 = vpop.permute.xlu1 %527  ;;  %v468_v0 = vpop.permute.xlu0 %467 }
  0x9f   :  { %v471_v1 = vsel %vm469_vm8, %v466_v59, %v468_v0 }
  0xa0   :  { %623 = vmatprep.subr.msk.bf16.mxu1 %vm42_vm0, %v471_v1 }
  0xa1   :  { %482 = vmatpush1.bf16.msra.mxu1 %v476_v2 }
  0xa2   :  { %v532_v6 = vpop.permute.xlu1 %531  ;;  %v530_v7 = vpop.permute.xlu0 %529 }
  0xa3   :  { %v534_v8 = vsel %vm533_vm9, %v528_v63, %v530_v7  ;;  %v535_v9 = vsel %vm533_vm9, %v530_v7, %v532_v6 }
  0xa4   :  { %v540_v3 = vsel %vm42_vm0, %v534_v8, 0  ;;  %624 = vmatmul.mubr.msk.bf16.vlgmr.msra.gmra.mrb[12].mxu1 %vm38_vm1, %v462_v4  ;;  %626 = vmatprep.subr.msk.bf16.mxu0 %vm42_vm0, %v535_v9 }
  0xa5   :  { %546 = vmatpush1.bf16.msra.mxu0 %v540_v3 }
  0xa8   :  { %627 = vmatmul.mubr.msk.bf16.vlgmr.msra.gmra.mrb[16].mxu0 %vm38_vm1, %v526_v10 }
  0xb3   :  { %v592_v58 = vpop.permute.xlu0 %591 }
  0xdc   :  { %v133_v11 = vpop.f32.mrb[0].mxu1 }
  0xdd   :  { %v135_v12 = vpop.f32.mrb[1].mxu1 }
  0xde   :  { %v137_v13 = vpop.f32.mrb[2].mxu1 }
  0xdf   :  { %v138_v14 = vpop.f32.mrb[3].mxu1 }
 0x153   :  { %v83_v15 = vpop.f32.mrb[0].mxu0 }
 0x154   :  { %v85_v16 = vpop.f32.mrb[1].mxu0  ;;  %v134_v17 = vadd.f32 %v133_v11, %v83_v15 }
 0x155   :  { %v87_v18 = vpop.f32.mrb[2].mxu0  ;;  %v136_v19 = vadd.f32 %v135_v12, %v85_v16 }
 0x156   :  { %v88_v20 = vpop.f32.mrb[3].mxu0 }
 0x15b   :  { %v195_v21 = vpop.f32.mrb[4].mxu0 }
 0x15c   :  { %v202_v22 = vadd.f32 %v195_v21, %v134_v17  ;;  %v197_v23 = vpop.f32.mrb[5].mxu0 }
 0x15d   :  { %v203_v24 = vadd.f32 %v197_v23, %v136_v19  ;;  %v199_v25 = vpop.f32.mrb[6].mxu0 }
 0x15e   :  { %v200_v26 = vpop.f32.mrb[7].mxu0 }
 0x15f   :  { %v259_v27 = vpop.f32.mrb[4].mxu1 }
 0x160   :  { %v266_v28 = vadd.f32 %v259_v27, %v202_v22  ;;  %v261_v29 = vpop.f32.mrb[5].mxu1 }
 0x161   :  { %v267_v30 = vadd.f32 %v261_v29, %v203_v24  ;;  %v263_v31 = vpop.f32.mrb[6].mxu1 }
 0x162   :  { %v264_v32 = vpop.f32.mrb[7].mxu1 }
 0x163   :  { %v323_v33 = vpop.f32.mrb[8].mxu0 }
 0x164   :  { %v330_v34 = vadd.f32 %v323_v33, %v266_v28  ;;  %v325_v35 = vpop.f32.mrb[9].mxu0 }
 0x165   :  { %v331_v36 = vadd.f32 %v325_v35, %v267_v30  ;;  %v327_v37 = vpop.f32.mrb[10].mxu0 }
 0x166   :  { %v328_v38 = vpop.f32.mrb[11].mxu0 }
 0x16b   :  { %v387_v39 = vpop.f32.mrb[8].mxu1 }
 0x16c   :  { %v394_v40 = vadd.f32 %v387_v39, %v330_v34  ;;  %v389_v41 = vpop.f32.mrb[9].mxu1 }
 0x16d   :  { %v395_v42 = vadd.f32 %v389_v41, %v331_v36  ;;  %v391_v43 = vpop.f32.mrb[10].mxu1 }
 0x16e   :  { %v392_v44 = vpop.f32.mrb[11].mxu1 }
 0x16f   :  { %v451_v45 = vpop.f32.mrb[12].mxu0 }
 0x170   :  { %v458_v46 = vadd.f32 %v451_v45, %v394_v40  ;;  %v453_v47 = vpop.f32.mrb[13].mxu0 }
 0x171   :  { %v459_v48 = vadd.f32 %v453_v47, %v395_v42  ;;  %v455_v49 = vpop.f32.mrb[14].mxu0 }
 0x172   :  { %v456_v50 = vpop.f32.mrb[15].mxu0 }
 0x177   :  { %v515_v51 = vpop.f32.mrb[12].mxu1 }
 0x178   :  { %v522_v52 = vadd.f32 %v515_v51, %v458_v46  ;;  %v517_v53 = vpop.f32.mrb[13].mxu1 }
 0x179   :  { %v523_v54 = vadd.f32 %v517_v53, %v459_v48  ;;  %v519_v55 = vpop.f32.mrb[14].mxu1 }
 0x17a   :  { %v520_v56 = vpop.f32.mrb[15].mxu1 }
 0x17b   :  { %v579_v57 = vpop.f32.mrb[16].mxu0 }
 0x17c   :  { %v586_v59 = vadd.f32 %v579_v57, %v522_v52  ;;  %v581_v60 = vpop.f32.mrb[17].mxu0 }
 0x17d   :  { %v587_v61 = vadd.f32 %v581_v60, %v523_v54  ;;  %v583_v62 = vpop.f32.mrb[18].mxu0 }
 0x17e   :  { %v594_v63 = vadd.f32 %v592_v58, %v586_v59  ;;  %v584_v0 = vpop.f32.mrb[19].mxu0 }
 0x17f   :  { %v595_v1 = vadd.f32 %v592_v58, %v587_v61 }
 0x180   :  { %596 = vst [vmem:[%s752_s3] sm:$0xff] %v594_v63 }
 0x181   :  { %597 = vst [vmem:[%s752_s3 + $0x8] sm:$0xff] %v595_v1 }

// kernel: usrm5_2_forward.22
= control target key start
LH: loop header
LB: loop body
LE: loop exit
PB: predicated region body
PF: predicated region fallthrough
CT: control target
= control target key end

     0   :  { %v1657_v3 = vmov 0   ;;  %s1658_s20 = smov 127   ;;  %s1659_s25 = smov 126   ;;  %vm50_vm0 = vcmask 1039360   ;;  %vm60_vm1 = vcmask 1043456   ;;  %vm56_vm2 = vcmask 64512   ;;  %s1964_s0 = inlined_call_operand.vmem [shape: f32[1,8,678], index: 0, kind: input, shape index: {}]   ;;  %s1965_s2 = inlined_call_operand.vmem [shape: f32[8,1], index: 2, kind: input, shape index: {}]   ;;  %s1966_s1 = inlined_call_operand.vmem [shape: f32[9,8,8], index: 1, kind: input, shape index: {}]   ;;  %s1967_s3 = inlined_call_operand.vmem [shape: f32[8,640], index: 3, kind: output, shape index: {}]  }
   0x1   :  { %v17_v0 = vld [vmem:[%s1964_s0 + $0x10] sm:$0xff]  ;;  %v15_v1 = vld [vmem:[%s1964_s0] sm:$0xff]  ;;  %v18_v2 = vld [vmem:[%s1964_s0 + $0x18] sm:$0xff]  ;;  %108 = vmatprep.mubr.bf16.mxu0 %v1657_v3  ;;  %149 = vmatprep.mubr.bf16.mxu1 %v1657_v3  ;;  %s1661_s26 = smov 109   ;;  %s1662_s27 = smov 108   ;;  %v1666_v26 = vmov 0.0  }
   0x2   :  { %v1699_v4 = vpack.c.bf16 %v17_v0, %v17_v0  ;;  %v1701_v5 = vpack.c.bf16 %v15_v1, %v15_v1  ;;  %v16_v6 = vld [vmem:[%s1964_s0 + $0x8] sm:$0xff]  ;;  %1656 = vset.pattern.permute.xlu0 %v1657_v3  ;;  %v1709_v7 = vpack.c.bf16 %v18_v2, %v18_v2  ;;  %v19_v10 = vld [vmem:[%s1964_s0 + $0x20] sm:$0xff]  ;;  %s1663_s28 = smov 92   ;;  %s1664_s29 = smov 91   ;;  %vm1667_vm3 = vmmov 0   ;;  %v1531_v49 = vld [vmem:[%s1966_s1 + $0x10] sm:$0xff] }
   0x3   :  { %v1711_v8 = vpack.c.bf16 %v16_v6, %v16_v6  ;;  %v27_v9 = vld [vmem:[%s1964_s0 + $0x28] sm:$0xff]  ;;  %v1721_v12 = vpack.c.bf16 %v19_v10, %v19_v10  ;;  %s1660_s0 = smov 110   ;;  %s1665_s30 = smov 90   ;;  %v1500_v13 = vld [vmem:[%s1965_s2] sm:$0xff]  ;;  %vm353_vm4 = vcmask 1031168   ;;  %vm519_vm5 = vcmask 900096  }
   0x4   :  { %42 = vrot.lane.b32.xlu1 %v1699_v4, %s1658_s20  ;;  %38 = vrot.lane.b32.xlu0 %v1701_v5, %s1658_s20  ;;  %v30_v11 = vpack.c.bf16 %v27_v9, %v27_v9  ;;  %v1520_v16 = vld [vmem:[%s1966_s1 + $0x8] sm:$0xff]  ;;  %v202_v31 = vsel %vm60_vm1, %v1701_v5, 0  ;;  %v20_v34 = vld [vmem:[%s1966_s1] sm:$0xff]  ;;  %v208_v35 = vsel %vm60_vm1, %v1699_v4, 0  ;;  %v340_v55 = vpack.c.bf16 %v1531_v49, %v1531_v49 }
   0x5   :  { %v31_v22 = vpack.c.bf16 %v1520_v16, %v1520_v16  ;;  %v26_v39 = vpack.c.bf16 %v20_v34, %v20_v34  ;;  %v214_v40 = vsel %vm60_vm1, %v1721_v12, 0  ;;  %vm685_vm6 = vcmask 891904   ;;  %v1537_v1 = vld [vmem:[%s1966_s1 + $0x18] sm:$0xff] }
   0x6   :  { %vm851_vm7 = vcmask 883712   ;;  %vm1017_vm8 = vcmask 752640   ;;  %vm1183_vm9 = vcmask 744448   ;;  %vm1349_vm10 = vcmask 736256  }
   0x8   :  { %44 = vrot.lane.b32.xlu1 %v1709_v7, %s1658_s20  ;;  %40 = vrot.lane.b32.xlu0 %v1711_v8, %s1658_s20 }
   0xc   :  { %48 = vrot.lane.b32.xlu1 %v30_v11, %s1658_s20  ;;  %46 = vrot.lane.b32.xlu0 %v1721_v12, %s1658_s20 }
  0x10   :  { %341 = vrot.lane.b32.xlu0 %v1701_v5, %s1659_s25  ;;  %343 = vrot.lane.b32.xlu1 %v1711_v8, %s1659_s25 }
  0x14   :  { %345 = vrot.lane.b32.xlu0 %v1699_v4, %s1659_s25  ;;  %347 = vrot.lane.b32.xlu1 %v1709_v7, %s1659_s25 }
  0x18   :  { %349 = vrot.lane.b32.xlu0 %v1721_v12, %s1659_s25  ;;  %351 = vrot.lane.b32.xlu1 %v30_v11, %s1659_s25 }
  0x1c   :  { %507 = vrot.lane.b32.xlu0 %v1701_v5, %s1660_s0  ;;  %509 = vrot.lane.b32.xlu1 %v1711_v8, %s1660_s0 }
  0x20   :  { %511 = vrot.lane.b32.xlu0 %v1699_v4, %s1660_s0  ;;  %513 = vrot.lane.b32.xlu1 %v1709_v7, %s1660_s0 }
  0x24   :  { %515 = vrot.lane.b32.xlu0 %v1721_v12, %s1660_s0  ;;  %517 = vrot.lane.b32.xlu1 %v30_v11, %s1660_s0 }
  0x28   :  { %673 = vrot.lane.b32.xlu0 %v1701_v5, %s1661_s26  ;;  %675 = vrot.lane.b32.xlu1 %v1711_v8, %s1661_s26 }
  0x2c   :  { %677 = vrot.lane.b32.xlu0 %v1699_v4, %s1661_s26  ;;  %679 = vrot.lane.b32.xlu1 %v1709_v7, %s1661_s26 }
  0x30   :  { %681 = vrot.lane.b32.xlu0 %v1721_v12, %s1661_s26  ;;  %683 = vrot.lane.b32.xlu1 %v30_v11, %s1661_s26 }
  0x34   :  { %839 = vrot.lane.b32.xlu0 %v1701_v5, %s1662_s27  ;;  %841 = vrot.lane.b32.xlu1 %v1711_v8, %s1662_s27 }
  0x38   :  { %843 = vrot.lane.b32.xlu0 %v1699_v4, %s1662_s27  ;;  %845 = vrot.lane.b32.xlu1 %v1709_v7, %s1662_s27 }
  0x3c   :  { %847 = vrot.lane.b32.xlu0 %v1721_v12, %s1662_s27  ;;  %849 = vrot.lane.b32.xlu1 %v30_v11, %s1662_s27 }
  0x40   :  { %1005 = vrot.lane.b32.xlu0 %v1701_v5, %s1663_s28  ;;  %1007 = vrot.lane.b32.xlu1 %v1711_v8, %s1663_s28 }
  0x44   :  { %1009 = vrot.lane.b32.xlu0 %v1699_v4, %s1663_s28  ;;  %1011 = vrot.lane.b32.xlu1 %v1709_v7, %s1663_s28 }
  0x48   :  { %1013 = vrot.lane.b32.xlu0 %v1721_v12, %s1663_s28  ;;  %1015 = vrot.lane.b32.xlu1 %v30_v11, %s1663_s28 }
  0x4c   :  { %1171 = vrot.lane.b32.xlu0 %v1701_v5, %s1664_s29  ;;  %1173 = vrot.lane.b32.xlu1 %v1711_v8, %s1664_s29 }
  0x50   :  { %1175 = vrot.lane.b32.xlu0 %v1699_v4, %s1664_s29  ;;  %1177 = vrot.lane.b32.xlu1 %v1709_v7, %s1664_s29 }
  0x54   :  { %1179 = vrot.lane.b32.xlu0 %v1721_v12, %s1664_s29  ;;  %1181 = vrot.lane.b32.xlu1 %v30_v11, %s1664_s29 }
  0x58   :  { %1337 = vrot.lane.b32.xlu0 %v1701_v5, %s1665_s30  ;;  %1339 = vrot.lane.b32.xlu1 %v1711_v8, %s1665_s30 }
  0x5c   :  { %1341 = vrot.lane.b32.xlu0 %v1699_v4, %s1665_s30  ;;  %1343 = vrot.lane.b32.xlu1 %v1709_v7, %s1665_s30 }
  0x60   :  { %1345 = vrot.lane.b32.xlu0 %v1721_v12, %s1665_s30  ;;  %1347 = vrot.lane.b32.xlu1 %v30_v11, %s1665_s30 }
  0x64   :  { %1503 = vperm.xlu0 %1656, %v1500_v13  }
  0x76   :  { %v43_v14 = vpop.permute.xlu1 %42  ;;  %v39_v15 = vpop.permute.xlu0 %38 }
  0x7a   :  { %v45_v17 = vpop.permute.xlu1 %44  ;;  %v41_v18 = vpop.permute.xlu0 %40 }
  0x7b   :  { %v52_v19 = vsel %vm50_vm0, %v41_v18, %v43_v14  ;;  %v51_v20 = vsel %vm50_vm0, %v39_v15, %v41_v18  ;;  %v53_v23 = vsel %vm50_vm0, %v43_v14, %v45_v17  ;;  %v1543_v18 = vld [vmem:[%s1966_s1 + $0x20] sm:$0xff] }
  0x7c   :  { %1521 = vmatprep.subr.msk.bf16.mxu0 %vm60_vm1, %v52_v19  ;;  %v62_v21 = vsel %vm60_vm1, %v51_v20, 0  ;;  %v68_v30 = vsel %vm60_vm1, %v53_v23, 0 }
  0x7d   :  { %77 = vmatpush1.bf16.msra.mxu0 %v62_v21 }
  0x7e   :  { %v49_v24 = vpop.permute.xlu1 %48  ;;  %v47_v25 = vpop.permute.xlu0 %46  ;;  %1591 = vmatprep.subr.bf16.mxu0 %v1666_v26 }
  0x7f   :  { %v55_v27 = vsel %vm50_vm0, %v47_v25, %v49_v24  ;;  %v54_v28 = vsel %vm50_vm0, %v45_v17, %v47_v25  ;;  %v672_v24 = vpack.c.bf16 %v1543_v18, %v1543_v18  ;;  %v1567_v18 = vld [vmem:[%s1966_s1 + $0x40] sm:$0xff] }
  0x80   :  { %v74_v29 = vsel %vm60_vm1, %v55_v27, 0  ;;  %1522 = vmatmul.mubr.msk.bf16.vlgmr.msra.gmra.mrb[0].mxu0 %vm56_vm2, %v31_v22  ;;  %1523 = vmatprep.subr.msk.bf16.mxu1 %vm60_vm1, %v54_v28 }
  0x81   :  { %118 = vmatpush1.bf16.msra.mxu1 %v68_v30  ;;  %1592 = vmatpush3.bf16.msra.mxu0 %v74_v29 }
  0x82   :  { %1593 = vmatprep.mubr.msk.bf16.mxu0 %vm1667_vm3, %v1666_v26  ;;  %1526 = vmatprep.subr.msk.bf16.mxu1 %vm60_vm1, %v1711_v8  ;;  %v342_v32 = vpop.permute.xlu0 %341  ;;  %v344_v33 = vpop.permute.xlu1 %343  ;;  %v506_v8 = vpack.c.bf16 %v1537_v1, %v1537_v1 }
  0x83   :  { %1528 = vmatprep.subr.msk.bf16.mxu0 %vm60_vm1, %v1709_v7  ;;  %v354_v43 = vsel %vm353_vm4, %v342_v32, %v344_v33 }
  0x84   :  { %1524 = vmatmul.mubr.msk.bf16.vlgmr.msra.gmra.mrb[0].mxu1 %vm56_vm2, %v31_v22  ;;  %v363_v45 = vsel %vm60_vm1, %v354_v43, 0 }
  0x85   :  { %217 = vmatpush1.bf16.msra.mxu1 %v202_v31  ;;  %248 = vmatprep.mubr.bf16.mxu1 %v1657_v3 }
  0x86   :  { %v346_v36 = vpop.permute.xlu0 %345  ;;  %v348_v37 = vpop.permute.xlu1 %347  ;;  %1597 = vmatprep.subr.bf16.mxu1 %v1666_v26 }
  0x87   :  { %v355_v38 = vsel %vm353_vm4, %v344_v33, %v346_v36  ;;  %v356_v48 = vsel %vm353_vm4, %v346_v36, %v348_v37 }
  0x88   :  { %1594 = vmatmul.mubr.msk.bf16.vlgmr.msra.gmra.mrb[4].mxu0 %vm56_vm2, %v31_v22  ;;  %v369_v50 = vsel %vm60_vm1, %v356_v48, 0 }
  0x89   :  { %258 = vmatpush1.bf16.msra.mxu0 %v208_v35  ;;  %289 = vmatprep.mubr.bf16.mxu0 %v1657_v3  ;;  %v1549_v35 = vld [vmem:[%s1966_s1 + $0x28] sm:$0xff] }
  0x8a   :  { %1532 = vmatprep.subr.msk.bf16.mxu0 %vm60_vm1, %v355_v38  ;;  %v350_v41 = vpop.permute.xlu0 %349  ;;  %v352_v42 = vpop.permute.xlu1 %351 }
  0x8b   :  { %v357_v44 = vsel %vm353_vm4, %v348_v37, %v350_v41  ;;  %v358_v53 = vsel %vm353_vm4, %v350_v41, %v352_v42  ;;  %v838_v41 = vpack.c.bf16 %v1549_v35, %v1549_v35 }
  0x8c   :  { %1527 = vmatmul.mubr.msk.bf16.vlgmr.msra.gmra.mrb[4].mxu1 %vm56_vm2, %v26_v39  ;;  %v375_v56 = vsel %vm60_vm1, %v358_v53, 0 }
  0x8d   :  { %1598 = vmatpush3.bf16.msra.mxu1 %v214_v40  ;;  %1599 = vmatprep.mubr.msk.bf16.mxu1 %vm1667_vm3, %v1666_v26 }
  0x8e   :  { %1534 = vmatprep.subr.msk.bf16.mxu1 %vm60_vm1, %v357_v44  ;;  %v508_v46 = vpop.permute.xlu0 %507  ;;  %v510_v47 = vpop.permute.xlu1 %509 }
  0x8f   :  { %v520_v59 = vsel %vm519_vm5, %v508_v46, %v510_v47 }
  0x90   :  { %1529 = vmatmul.mubr.msk.bf16.vlgmr.msra.gmra.mrb[8].mxu0 %vm56_vm2, %v26_v39  ;;  %v529_v61 = vsel %vm60_vm1, %v520_v59, 0 }
  0x91   :  { %378 = vmatpush1.bf16.msra.mxu0 %v363_v45  ;;  %409 = vmatprep.mubr.bf16.mxu0 %v1657_v3 }
  0x92   :  { %1603 = vmatprep.subr.bf16.mxu0 %v1666_v26  ;;  %v512_v51 = vpop.permute.xlu0 %511  ;;  %v514_v52 = vpop.permute.xlu1 %513 }
  0x93   :  { %v521_v54 = vsel %vm519_vm5, %v510_v47, %v512_v51  ;;  %v522_v0 = vsel %vm519_vm5, %v512_v51, %v514_v52  ;;  %v1555_v51 = vld [vmem:[%s1966_s1 + $0x30] sm:$0xff] }
  0x94   :  { %1600 = vmatmul.mubr.msk.bf16.vlgmr.msra.gmra.mrb[8].mxu1 %vm56_vm2, %v26_v39  ;;  %v535_v2 = vsel %vm60_vm1, %v522_v0, 0 }
  0x95   :  { %419 = vmatpush1.bf16.msra.mxu1 %v369_v50  ;;  %450 = vmatprep.mubr.bf16.mxu1 %v1657_v3 }
  0x96   :  { %1538 = vmatprep.subr.msk.bf16.mxu1 %vm60_vm1, %v521_v54  ;;  %v516_v57 = vpop.permute.xlu0 %515  ;;  %v518_v58 = vpop.permute.xlu1 %517 }
  0x97   :  { %v523_v60 = vsel %vm519_vm5, %v514_v52, %v516_v57  ;;  %v524_v6 = vsel %vm519_vm5, %v516_v57, %v518_v58  ;;  %v1004_v57 = vpack.c.bf16 %v1555_v51, %v1555_v51 }
  0x98   :  { %1533 = vmatmul.mubr.msk.bf16.vlgmr.msra.gmra.mrb[12].mxu0 %vm56_vm2, %v340_v55  ;;  %v541_v9 = vsel %vm60_vm1, %v524_v6, 0 }
  0x99   :  { %1604 = vmatpush3.bf16.msra.mxu0 %v375_v56  ;;  %1605 = vmatprep.mubr.msk.bf16.mxu0 %vm1667_vm3, %v1666_v26 }
  0x9a   :  { %1540 = vmatprep.subr.msk.bf16.mxu0 %vm60_vm1, %v523_v60  ;;  %v674_v62 = vpop.permute.xlu0 %673  ;;  %v676_v63 = vpop.permute.xlu1 %675 }
  0x9b   :  { %v686_v12 = vsel %vm685_vm6, %v674_v62, %v676_v63 }
  0x9c   :  { %1535 = vmatmul.mubr.msk.bf16.vlgmr.msra.gmra.mrb[12].mxu1 %vm56_vm2, %v340_v55  ;;  %v695_v14 = vsel %vm60_vm1, %v686_v12, 0 }
  0x9d   :  { %544 = vmatpush1.bf16.msra.mxu1 %v529_v61  ;;  %575 = vmatprep.mubr.bf16.mxu1 %v1657_v3 }
  0x9e   :  { %1609 = vmatprep.subr.bf16.mxu1 %v1666_v26  ;;  %v678_v4 = vpop.permute.xlu0 %677  ;;  %v680_v5 = vpop.permute.xlu1 %679 }
  0x9f   :  { %v687_v7 = vsel %vm685_vm6, %v676_v63, %v678_v4  ;;  %v688_v17 = vsel %vm685_vm6, %v678_v4, %v680_v5  ;;  %v1561_v4 = vld [vmem:[%s1966_s1 + $0x38] sm:$0xff] }
  0xa0   :  { %1606 = vmatmul.mubr.msk.bf16.vlgmr.msra.gmra.mrb[16].mxu0 %vm56_vm2, %v340_v55  ;;  %v701_v19 = vsel %vm60_vm1, %v688_v17, 0 }
  0xa1   :  { %585 = vmatpush1.bf16.msra.mxu0 %v535_v2  ;;  %616 = vmatprep.mubr.bf16.mxu0 %v1657_v3 }
  0xa2   :  { %1544 = vmatprep.subr.msk.bf16.mxu0 %vm60_vm1, %v687_v7  ;;  %v682_v10 = vpop.permute.xlu0 %681  ;;  %v684_v11 = vpop.permute.xlu1 %683 }
  0xa3   :  { %v689_v13 = vsel %vm685_vm6, %v680_v5, %v682_v10  ;;  %v690_v22 = vsel %vm685_vm6, %v682_v10, %v684_v11 }
  0xa4   :  { %1539 = vmatmul.mubr.msk.bf16.vlgmr.msra.gmra.mrb[16].mxu1 %vm56_vm2, %v506_v8  ;;  %v707_v25 = vsel %vm60_vm1, %v690_v22, 0 }
  0xa5   :  { %1610 = vmatpush3.bf16.msra.mxu1 %v541_v9  ;;  %1611 = vmatprep.mubr.msk.bf16.mxu1 %vm1667_vm3, %v1666_v26  ;;  %v1170_v9 = vpack.c.bf16 %v1561_v4, %v1561_v4 }
  0xa6   :  { %1546 = vmatprep.subr.msk.bf16.mxu1 %vm60_vm1, %v689_v13  ;;  %v840_v15 = vpop.permute.xlu0 %839  ;;  %v842_v16 = vpop.permute.xlu1 %841 }
  0xa7   :  { %v852_v29 = vsel %vm851_vm7, %v840_v15, %v842_v16 }
  0xa8   :  { %1541 = vmatmul.mubr.msk.bf16.vlgmr.msra.gmra.mrb[20].mxu0 %vm56_vm2, %v506_v8  ;;  %v861_v31 = vsel %vm60_vm1, %v852_v29, 0 }
  0xa9   :  { %710 = vmatpush1.bf16.msra.mxu0 %v695_v14  ;;  %741 = vmatprep.mubr.bf16.mxu0 %v1657_v3 }
  0xaa   :  { %1615 = vmatprep.subr.bf16.mxu0 %v1666_v26  ;;  %v844_v20 = vpop.permute.xlu0 %843  ;;  %v846_v21 = vpop.permute.xlu1 %845 }
  0xab   :  { %v853_v23 = vsel %vm851_vm7, %v842_v16, %v844_v20  ;;  %v854_v34 = vsel %vm851_vm7, %v844_v20, %v846_v21 }
  0xac   :  { %1612 = vmatmul.mubr.msk.bf16.vlgmr.msra.gmra.mrb[20].mxu1 %vm56_vm2, %v506_v8  ;;  %v867_v36 = vsel %vm60_vm1, %v854_v34, 0 }
  0xad   :  { %751 = vmatpush1.bf16.msra.mxu1 %v701_v19  ;;  %782 = vmatprep.mubr.bf16.mxu1 %v1657_v3 }
  0xae   :  { %1550 = vmatprep.subr.msk.bf16.mxu1 %vm60_vm1, %v853_v23  ;;  %v848_v27 = vpop.permute.xlu0 %847  ;;  %v850_v28 = vpop.permute.xlu1 %849 }
  0xaf   :  { %v855_v30 = vsel %vm851_vm7, %v846_v21, %v848_v27  ;;  %v856_v39 = vsel %vm851_vm7, %v848_v27, %v850_v28  ;;  %v1336_v21 = vpack.c.bf16 %v1567_v18, %v1567_v18 }
  0xb0   :  { %1545 = vmatmul.mubr.msk.bf16.vlgmr.msra.gmra.mrb[24].mxu0 %vm56_vm2, %v672_v24  ;;  %v873_v42 = vsel %vm60_vm1, %v856_v39, 0 }
  0xb1   :  { %1616 = vmatpush3.bf16.msra.mxu0 %v707_v25  ;;  %1617 = vmatprep.mubr.msk.bf16.mxu0 %vm1667_vm3, %v1666_v26 }
  0xb2   :  { %1552 = vmatprep.subr.msk.bf16.mxu0 %vm60_vm1, %v855_v30  ;;  %v1006_v32 = vpop.permute.xlu0 %1005  ;;  %v1008_v33 = vpop.permute.xlu1 %1007 }
  0xb3   :  { %v1018_v45 = vsel %vm1017_vm8, %v1006_v32, %v1008_v33 }
  0xb4   :  { %1547 = vmatmul.mubr.msk.bf16.vlgmr.msra.gmra.mrb[24].mxu1 %vm56_vm2, %v672_v24  ;;  %v1027_v47 = vsel %vm60_vm1, %v1018_v45, 0 }
  0xb5   :  { %876 = vmatpush1.bf16.msra.mxu1 %v861_v31  ;;  %907 = vmatprep.mubr.bf16.mxu1 %v1657_v3 }
  0xb6   :  { %1621 = vmatprep.subr.bf16.mxu1 %v1666_v26  ;;  %v1010_v37 = vpop.permute.xlu0 %1009  ;;  %v1012_v38 = vpop.permute.xlu1 %1011 }
  0xb7   :  { %v1019_v40 = vsel %vm1017_vm8, %v1008_v33, %v1010_v37  ;;  %v1020_v50 = vsel %vm1017_vm8, %v1010_v37, %v1012_v38 }
  0xb8   :  { %1618 = vmatmul.mubr.msk.bf16.vlgmr.msra.gmra.mrb[28].mxu0 %vm56_vm2, %v672_v24  ;;  %v1033_v52 = vsel %vm60_vm1, %v1020_v50, 0 }
  0xb9   :  { %917 = vmatpush1.bf16.msra.mxu0 %v867_v36  ;;  %948 = vmatprep.mubr.bf16.mxu0 %v1657_v3 }
  0xba   :  { %1556 = vmatprep.subr.msk.bf16.mxu0 %vm60_vm1, %v1019_v40  ;;  %v1014_v43 = vpop.permute.xlu0 %1013  ;;  %v1016_v44 = vpop.permute.xlu1 %1015 }
  0xbb   :  { %v1021_v46 = vsel %vm1017_vm8, %v1012_v38, %v1014_v43  ;;  %v1022_v55 = vsel %vm1017_vm8, %v1014_v43, %v1016_v44 }
  0xbc   :  { %1551 = vmatmul.mubr.msk.bf16.vlgmr.msra.gmra.mrb[28].mxu1 %vm56_vm2, %v838_v41  ;;  %v1039_v58 = vsel %vm60_vm1, %v1022_v55, 0 }
  0xbd   :  { %1622 = vmatpush3.bf16.msra.mxu1 %v873_v42  ;;  %1623 = vmatprep.mubr.msk.bf16.mxu1 %vm1667_vm3, %v1666_v26 }
  0xbe   :  { %1558 = vmatprep.subr.msk.bf16.mxu1 %vm60_vm1, %v1021_v46  ;;  %v1172_v48 = vpop.permute.xlu0 %1171  ;;  %v1174_v49 = vpop.permute.xlu1 %1173 }
  0xbf   :  { %v1184_v61 = vsel %vm1183_vm9, %v1172_v48, %v1174_v49 }
  0xc0   :  { %1553 = vmatmul.mubr.msk.bf16.vlgmr.msra.gmra.mrb[32].mxu0 %vm56_vm2, %v838_v41  ;;  %v1193_v63 = vsel %vm60_vm1, %v1184_v61, 0 }
  0xc1   :  { %1042 = vmatpush1.bf16.msra.mxu0 %v1027_v47  ;;  %1073 = vmatprep.mubr.bf16.mxu0 %v1657_v3 }
  0xc2   :  { %1627 = vmatprep.subr.bf16.mxu0 %v1666_v26  ;;  %v1176_v53 = vpop.permute.xlu0 %1175  ;;  %v1178_v54 = vpop.permute.xlu1 %1177 }
  0xc3   :  { %v1185_v56 = vsel %vm1183_vm9, %v1174_v49, %v1176_v53  ;;  %v1186_v2 = vsel %vm1183_vm9, %v1176_v53, %v1178_v54 }
  0xc4   :  { %1624 = vmatmul.mubr.msk.bf16.vlgmr.msra.gmra.mrb[32].mxu1 %vm56_vm2, %v838_v41  ;;  %v1199_v5 = vsel %vm60_vm1, %v1186_v2, 0 }
  0xc5   :  { %1083 = vmatpush1.bf16.msra.mxu1 %v1033_v52  ;;  %1114 = vmatprep.mubr.bf16.mxu1 %v1657_v3 }
  0xc6   :  { %1562 = vmatprep.subr.msk.bf16.mxu1 %vm60_vm1, %v1185_v56  ;;  %v1180_v59 = vpop.permute.xlu0 %1179  ;;  %v1182_v60 = vpop.permute.xlu1 %1181 }
  0xc7   :  { %v1187_v62 = vsel %vm1183_vm9, %v1178_v54, %v1180_v59  ;;  %v1188_v7 = vsel %vm1183_vm9, %v1180_v59, %v1182_v60 }
  0xc8   :  { %1557 = vmatmul.mubr.msk.bf16.vlgmr.msra.gmra.mrb[36].mxu0 %vm56_vm2, %v1004_v57  ;;  %v1205_v11 = vsel %vm60_vm1, %v1188_v7, 0 }
  0xc9   :  { %1628 = vmatpush3.bf16.msra.mxu0 %v1039_v58  ;;  %1629 = vmatprep.mubr.msk.bf16.mxu0 %vm1667_vm3, %v1666_v26 }
  0xca   :  { %1564 = vmatprep.subr.msk.bf16.mxu0 %vm60_vm1, %v1187_v62  ;;  %v1338_v0 = vpop.permute.xlu0 %1337  ;;  %v1340_v1 = vpop.permute.xlu1 %1339 }
  0xcb   :  { %v1350_v13 = vsel %vm1349_vm10, %v1338_v0, %v1340_v1 }
  0xcc   :  { %1559 = vmatmul.mubr.msk.bf16.vlgmr.msra.gmra.mrb[36].mxu1 %vm56_vm2, %v1004_v57  ;;  %v1359_v15 = vsel %vm60_vm1, %v1350_v13, 0 }
  0xcd   :  { %1208 = vmatpush1.bf16.msra.mxu1 %v1193_v63  ;;  %1239 = vmatprep.mubr.bf16.mxu1 %v1657_v3 }
  0xce   :  { %1633 = vmatprep.subr.bf16.mxu1 %v1666_v26  ;;  %v1342_v6 = vpop.permute.xlu0 %1341  ;;  %v1344_v10 = vpop.permute.xlu1 %1343 }
  0xcf   :  { %v1351_v8 = vsel %vm1349_vm10, %v1340_v1, %v1342_v6  ;;  %v1352_v16 = vsel %vm1349_vm10, %v1342_v6, %v1344_v10 }
  0xd0   :  { %1630 = vmatmul.mubr.msk.bf16.vlgmr.msra.gmra.mrb[40].mxu0 %vm56_vm2, %v1004_v57  ;;  %v1365_v19 = vsel %vm60_vm1, %v1352_v16, 0 }
  0xd1   :  { %1249 = vmatpush1.bf16.msra.mxu0 %v1199_v5  ;;  %1280 = vmatprep.mubr.bf16.mxu0 %v1657_v3 }
  0xd2   :  { %1568 = vmatprep.subr.msk.bf16.mxu0 %vm60_vm1, %v1351_v8  ;;  %v1346_v12 = vpop.permute.xlu0 %1345  ;;  %v1348_v17 = vpop.permute.xlu1 %1347 }
  0xd3   :  { %v1353_v14 = vsel %vm1349_vm10, %v1344_v10, %v1346_v12  ;;  %v1354_v20 = vsel %vm1349_vm10, %v1346_v12, %v1348_v17 }
  0xd4   :  { %1563 = vmatmul.mubr.msk.bf16.vlgmr.msra.gmra.mrb[40].mxu1 %vm56_vm2, %v1170_v9  ;;  %v1371_v22 = vsel %vm60_vm1, %v1354_v20, 0 }
  0xd5   :  { %1634 = vmatpush3.bf16.msra.mxu1 %v1205_v11  ;;  %1635 = vmatprep.mubr.msk.bf16.mxu1 %vm1667_vm3, %v1666_v26 }
  0xd6   :  { %1570 = vmatprep.subr.msk.bf16.mxu1 %vm60_vm1, %v1353_v14 }
  0xd8   :  { %1565 = vmatmul.mubr.msk.bf16.vlgmr.msra.gmra.mrb[44].mxu0 %vm56_vm2, %v1170_v9 }
  0xd9   :  { %1374 = vmatpush1.bf16.msra.mxu0 %v1359_v15  ;;  %1405 = vmatprep.mubr.bf16.mxu0 %v1657_v3 }
  0xda   :  { %1639 = vmatprep.subr.bf16.mxu0 %v1666_v26 }
  0xdc   :  { %1636 = vmatmul.mubr.msk.bf16.vlgmr.msra.gmra.mrb[44].mxu1 %vm56_vm2, %v1170_v9 }
  0xdd   :  { %1415 = vmatpush1.bf16.msra.mxu1 %v1365_v19  ;;  %1446 = vmatprep.mubr.bf16.mxu1 %v1657_v3 }
  0xe0   :  { %1569 = vmatmul.mubr.msk.bf16.vlgmr.msra.gmra.mrb[48].mxu0 %vm56_vm2, %v1336_v21 }
  0xe1   :  { %1640 = vmatpush3.bf16.msra.mxu0 %v1371_v22  ;;  %1641 = vmatprep.mubr.msk.bf16.mxu0 %vm1667_vm3, %v1666_v26 }
  0xe4   :  { %1571 = vmatmul.mubr.msk.bf16.vlgmr.msra.gmra.mrb[48].mxu1 %vm56_vm2, %v1336_v21 }
  0xe8   :  { %1642 = vmatmul.mubr.msk.bf16.vlgmr.msra.gmra.mrb[52].mxu0 %vm56_vm2, %v1336_v21 }
 0x153   :  { %v110_v23 = vpop.f32.mrb[0].mxu0 }
 0x154   :  { %v112_v24 = vpop.f32.mrb[1].mxu0 }
 0x155   :  { %v114_v25 = vpop.f32.mrb[2].mxu0 }
 0x156   :  { %v115_v27 = vpop.f32.mrb[3].mxu0 }
 0x157   :  { %v151_v28 = vpop.f32.mrb[0].mxu1 }
 0x158   :  { %v153_v29 = vpop.f32.mrb[1].mxu1 }
 0x159   :  { %v155_v30 = vpop.f32.mrb[2].mxu1 }
 0x15a   :  { %v156_v3 = vpop.f32.mrb[3].mxu1 }
 0x15b   :  { %v192_v31 = vpop.f32.mrb[4].mxu0 }
 0x15c   :  { %v1595_v32 = vpop.f32.mrb[5].mxu0 }
 0x15d   :  { %v195_v33 = vpop.f32.mrb[6].mxu0 }
 0x15e   :  { %v1596_v34 = vpop.f32.mrb[7].mxu0 }
 0x15f   :  { %v250_v35 = vpop.f32.mrb[4].mxu1 }
 0x160   :  { %v251_v36 = vadd.f32 %v250_v35, %v110_v23  ;;  %v252_v37 = vpop.f32.mrb[5].mxu1 }
 0x161   :  { %v253_v26 = vadd.f32 %v252_v37, %v112_v24  ;;  %v254_v38 = vpop.f32.mrb[6].mxu1 }
 0x162   :  { %v255_v39 = vpop.f32.mrb[7].mxu1 }
 0x163   :  { %v291_v40 = vpop.f32.mrb[8].mxu0 }
 0x164   :  { %v292_v41 = vadd.f32 %v291_v40, %v151_v28  ;;  %v293_v42 = vpop.f32.mrb[9].mxu0 }
 0x165   :  { %v294_v43 = vadd.f32 %v293_v42, %v153_v29  ;;  %v295_v44 = vpop.f32.mrb[10].mxu0 }
 0x166   :  { %v296_v45 = vpop.f32.mrb[11].mxu0 }
 0x167   :  { %v332_v46 = vpop.f32.mrb[8].mxu1 }
 0x168   :  { %v333_v47 = vadd.f32 %v332_v46, %v192_v31  ;;  %v1601_v48 = vpop.f32.mrb[9].mxu1 }
 0x169   :  { %v335_v49 = vpop.f32.mrb[10].mxu1 }
 0x16a   :  { %v1602_v50 = vpop.f32.mrb[11].mxu1 }
 0x16b   :  { %v411_v51 = vpop.f32.mrb[12].mxu0 }
 0x16c   :  { %v499_v52 = vadd.f32 %v411_v51, %v251_v36  ;;  %v413_v53 = vpop.f32.mrb[13].mxu0 }
 0x16d   :  { %v500_v54 = vadd.f32 %v413_v53, %v253_v26  ;;  %v415_v55 = vpop.f32.mrb[14].mxu0 }
 0x16e   :  { %v416_v56 = vpop.f32.mrb[15].mxu0 }
 0x16f   :  { %v452_v57 = vpop.f32.mrb[12].mxu1 }
 0x170   :  { %v501_v58 = vadd.f32 %v452_v57, %v292_v41  ;;  %v454_v59 = vpop.f32.mrb[13].mxu1 }
 0x171   :  { %v502_v60 = vadd.f32 %v454_v59, %v294_v43  ;;  %v456_v61 = vpop.f32.mrb[14].mxu1 }
 0x172   :  { %v457_v62 = vpop.f32.mrb[15].mxu1 }
 0x173   :  { %v493_v63 = vpop.f32.mrb[16].mxu0 }
 0x174   :  { %v503_v0 = vadd.f32 %v493_v63, %v333_v47  ;;  %v1607_v1 = vpop.f32.mrb[17].mxu0 }
 0x175   :  { %v496_v2 = vpop.f32.mrb[18].mxu0 }
 0x176   :  { %v1608_v4 = vpop.f32.mrb[19].mxu0 }
 0x177   :  { %v577_v5 = vpop.f32.mrb[16].mxu1 }
 0x178   :  { %v665_v6 = vadd.f32 %v577_v5, %v499_v52  ;;  %v579_v7 = vpop.f32.mrb[17].mxu1 }
 0x179   :  { %v666_v8 = vadd.f32 %v579_v7, %v500_v54  ;;  %v581_v9 = vpop.f32.mrb[18].mxu1 }
 0x17a   :  { %v582_v10 = vpop.f32.mrb[19].mxu1 }
 0x17b   :  { %v618_v11 = vpop.f32.mrb[20].mxu0 }
 0x17c   :  { %v667_v12 = vadd.f32 %v618_v11, %v501_v58  ;;  %v620_v13 = vpop.f32.mrb[21].mxu0 }
 0x17d   :  { %v668_v14 = vadd.f32 %v620_v13, %v502_v60  ;;  %v622_v15 = vpop.f32.mrb[22].mxu0 }
 0x17e   :  { %v623_v16 = vpop.f32.mrb[23].mxu0 }
 0x17f   :  { %v659_v17 = vpop.f32.mrb[20].mxu1 }
 0x180   :  { %v669_v18 = vadd.f32 %v659_v17, %v503_v0  ;;  %v1613_v19 = vpop.f32.mrb[21].mxu1 }
 0x181   :  { %v662_v20 = vpop.f32.mrb[22].mxu1 }
 0x182   :  { %v1614_v21 = vpop.f32.mrb[23].mxu1 }
 0x183   :  { %v743_v22 = vpop.f32.mrb[24].mxu0 }
 0x184   :  { %v831_v23 = vadd.f32 %v743_v22, %v665_v6  ;;  %v745_v24 = vpop.f32.mrb[25].mxu0 }
 0x185   :  { %v832_v25 = vadd.f32 %v745_v24, %v666_v8  ;;  %v747_v27 = vpop.f32.mrb[26].mxu0 }
 0x186   :  { %v748_v28 = vpop.f32.mrb[27].mxu0 }
 0x187   :  { %v784_v29 = vpop.f32.mrb[24].mxu1  ;;  %v1504_v28 = vpop.permute.xlu0 %1503 }
 0x188   :  { %v833_v30 = vadd.f32 %v784_v29, %v667_v12  ;;  %v786_v3 = vpop.f32.mrb[25].mxu1 }
 0x189   :  { %v834_v31 = vadd.f32 %v786_v3, %v668_v14  ;;  %v788_v32 = vpop.f32.mrb[26].mxu1 }
 0x18a   :  { %v789_v33 = vpop.f32.mrb[27].mxu1 }
 0x18b   :  { %v825_v34 = vpop.f32.mrb[28].mxu0 }
 0x18c   :  { %v835_v35 = vadd.f32 %v825_v34, %v669_v18  ;;  %v1619_v36 = vpop.f32.mrb[29].mxu0 }
 0x18d   :  { %v828_v37 = vpop.f32.mrb[30].mxu0 }
 0x18e   :  { %v1620_v26 = vpop.f32.mrb[31].mxu0 }
 0x18f   :  { %v909_v38 = vpop.f32.mrb[28].mxu1 }
 0x190   :  { %v997_v39 = vadd.f32 %v909_v38, %v831_v23  ;;  %v911_v40 = vpop.f32.mrb[29].mxu1 }
 0x191   :  { %v998_v41 = vadd.f32 %v911_v40, %v832_v25  ;;  %v913_v42 = vpop.f32.mrb[30].mxu1 }
 0x192   :  { %v914_v43 = vpop.f32.mrb[31].mxu1 }
 0x193   :  { %v950_v44 = vpop.f32.mrb[32].mxu0 }
 0x194   :  { %v999_v45 = vadd.f32 %v950_v44, %v833_v30  ;;  %v952_v46 = vpop.f32.mrb[33].mxu0 }
 0x195   :  { %v1000_v47 = vadd.f32 %v952_v46, %v834_v31  ;;  %v954_v48 = vpop.f32.mrb[34].mxu0 }
 0x196   :  { %v955_v49 = vpop.f32.mrb[35].mxu0 }
 0x197   :  { %v991_v50 = vpop.f32.mrb[32].mxu1 }
 0x198   :  { %v1001_v51 = vadd.f32 %v991_v50, %v835_v35  ;;  %v1625_v52 = vpop.f32.mrb[33].mxu1 }
 0x199   :  { %v994_v53 = vpop.f32.mrb[34].mxu1 }
 0x19a   :  { %v1626_v54 = vpop.f32.mrb[35].mxu1 }
 0x19b   :  { %v1075_v55 = vpop.f32.mrb[36].mxu0 }
 0x19c   :  { %v1163_v56 = vadd.f32 %v1075_v55, %v997_v39  ;;  %v1077_v57 = vpop.f32.mrb[37].mxu0 }
 0x19d   :  { %v1164_v58 = vadd.f32 %v1077_v57, %v998_v41  ;;  %v1079_v59 = vpop.f32.mrb[38].mxu0 }
 0x19e   :  { %v1080_v60 = vpop.f32.mrb[39].mxu0 }
 0x19f   :  { %v1116_v61 = vpop.f32.mrb[36].mxu1 }
 0x1a0   :  { %v1165_v62 = vadd.f32 %v1116_v61, %v999_v45  ;;  %v1118_v63 = vpop.f32.mrb[37].mxu1 }
 0x1a1   :  { %v1166_v0 = vadd.f32 %v1118_v63, %v1000_v47  ;;  %v1120_v1 = vpop.f32.mrb[38].mxu1 }
 0x1a2   :  { %v1121_v2 = vpop.f32.mrb[39].mxu1 }
 0x1a3   :  { %v1157_v4 = vpop.f32.mrb[40].mxu0 }
 0x1a4   :  { %v1167_v5 = vadd.f32 %v1157_v4, %v1001_v51  ;;  %v1631_v6 = vpop.f32.mrb[41].mxu0 }
 0x1a5   :  { %v1160_v7 = vpop.f32.mrb[42].mxu0 }
 0x1a6   :  { %v1632_v8 = vpop.f32.mrb[43].mxu0 }
 0x1a7   :  { %v1241_v9 = vpop.f32.mrb[40].mxu1 }
 0x1a8   :  { %v1329_v10 = vadd.f32 %v1241_v9, %v1163_v56  ;;  %v1243_v11 = vpop.f32.mrb[41].mxu1 }
 0x1a9   :  { %v1330_v12 = vadd.f32 %v1243_v11, %v1164_v58  ;;  %v1245_v13 = vpop.f32.mrb[42].mxu1 }
 0x1aa   :  { %v1246_v14 = vpop.f32.mrb[43].mxu1 }
 0x1ab   :  { %v1282_v15 = vpop.f32.mrb[44].mxu0 }
 0x1ac   :  { %v1331_v16 = vadd.f32 %v1282_v15, %v1165_v62  ;;  %v1284_v17 = vpop.f32.mrb[45].mxu0 }
 0x1ad   :  { %v1332_v18 = vadd.f32 %v1284_v17, %v1166_v0  ;;  %v1286_v19 = vpop.f32.mrb[46].mxu0 }
 0x1ae   :  { %v1287_v20 = vpop.f32.mrb[47].mxu0 }
 0x1af   :  { %v1323_v21 = vpop.f32.mrb[44].mxu1 }
 0x1b0   :  { %v1333_v22 = vadd.f32 %v1323_v21, %v1167_v5  ;;  %v1637_v23 = vpop.f32.mrb[45].mxu1 }
 0x1b1   :  { %v1326_v24 = vpop.f32.mrb[46].mxu1 }
 0x1b2   :  { %v1638_v25 = vpop.f32.mrb[47].mxu1 }
 0x1b3   :  { %v1407_v27 = vpop.f32.mrb[48].mxu0 }
 0x1b4   :  { %v1495_v29 = vadd.f32 %v1407_v27, %v1329_v10  ;;  %v1409_v30 = vpop.f32.mrb[49].mxu0 }
 0x1b5   :  { %v1496_v3 = vadd.f32 %v1409_v30, %v1330_v12  ;;  %v1411_v31 = vpop.f32.mrb[50].mxu0 }
 0x1b6   :  { %v1506_v32 = vadd.f32 %v1504_v28, %v1495_v29  ;;  %v1412_v33 = vpop.f32.mrb[51].mxu0 }
 0x1b7   :  { %v1507_v34 = vadd.f32 %v1504_v28, %v1496_v3  ;;  %v1448_v35 = vpop.f32.mrb[48].mxu1 }
 0x1b8   :  { %1511 = vst [vmem:[%s1967_s3] sm:$0xff] %v1506_v32  ;;  %v1497_v36 = vadd.f32 %v1448_v35, %v1331_v16  ;;  %v1450_v37 = vpop.f32.mrb[49].mxu1 }
 0x1b9   :  { %1512 = vst [vmem:[%s1967_s3 + $0x8] sm:$0xff] %v1507_v34  ;;  %v1498_v26 = vadd.f32 %v1450_v37, %v1332_v18  ;;  %v1452_v38 = vpop.f32.mrb[50].mxu1 }
 0x1ba   :  { %v1508_v39 = vadd.f32 %v1504_v28, %v1497_v36  ;;  %v1453_v40 = vpop.f32.mrb[51].mxu1 }
 0x1bb   :  { %v1509_v41 = vadd.f32 %v1504_v28, %v1498_v26  ;;  %v1489_v42 = vpop.f32.mrb[52].mxu0 }
 0x1bc   :  { %1513 = vst [vmem:[%s1967_s3 + $0x10] sm:$0xff] %v1508_v39  ;;  %v1499_v43 = vadd.f32 %v1489_v42, %v1333_v22  ;;  %v1643_v44 = vpop.f32.mrb[53].mxu0 }
 0x1bd   :  { %1514 = vst [vmem:[%s1967_s3 + $0x18] sm:$0xff] %v1509_v41  ;;  %v1492_v45 = vpop.f32.mrb[54].mxu0 }
 0x1be   :  { %v1510_v46 = vadd.f32 %v1504_v28, %v1499_v43  ;;  %v1644_v47 = vpop.f32.mrb[55].mxu0 }
 0x1c0   :  { %1515 = vst [vmem:[%s1967_s3 + $0x20] sm:$0xff] %v1510_v46 }

</bundles_post_ra>
